<compile_context>
chip_gen: v6e
topology: v6e:2x2x1
jax: 0.10.0
libtpu: 0.0.40
codegen_flags: <defaults>
</compile_context>

<pallas_src>
import functools
import math

import jax
import jax.numpy as jnp
from jax.experimental import pallas as pl
from jax.experimental.pallas import tpu as pltpu

# ---------------- tiny synthetic VITS config ----------------
VOCAB = 50        # n_vocab
H = 32            # hidden_channels
C = 32            # inter_channels (latent channels)
FF = 64           # filter_channels (encoder FFN)
N_HEADS = 2
N_LAYERS = 2
DP_FF = 64        # duration predictor hidden size
MAX_DUR = 4       # static cap on per-token duration -> static spec length
# TODO(synk): true VITS output length is data dependent (sum of predicted
# durations); the spec axis is padded to the static bound MAX_DUR*T and masked,
# since JAX/Pallas require static shapes.


# ================= BlockSpec helpers =================

def _const_spec(a):
    """Full-array block, same block for every grid step (weights/bias)."""
    zeros = (0,) * a.ndim
    return pl.BlockSpec(a.shape, lambda i: zeros)


def _batch_spec(a):
    """One batch row per grid step; remaining dims full."""
    zeros = (0,) * (a.ndim - 1)
    return pl.BlockSpec((1,) + a.shape[1:], lambda b: (b,) + zeros)


# ================= in-kernel helpers =================

def _layer_norm2d(x, g, b, eps=1e-5):
    mean = jnp.mean(x, axis=-1, keepdims=True)
    var = jnp.mean(jnp.square(x - mean), axis=-1, keepdims=True)
    return (x - mean) * jax.lax.rsqrt(var + eps) * g + b


def _conv3_2d(x, w_ref, b_ref, act="none"):
    """'same' 1-D conv, kernel 3, on a VMEM-resident (T, Cin) tile.
    w_ref: (3, Cin, Cout) bf16 (taps: t-1, t, t+1), b_ref: (1, Cout) f32."""
    Tt, Cin = x.shape
    zero = jnp.zeros((1, Cin), x.dtype)
    xm = jnp.concatenate([zero, x[:-1]], axis=0)     # row t holds x[t-1]
    xp = jnp.concatenate([x[1:], zero], axis=0)      # row t holds x[t+1]
    y = (jnp.dot(xm.astype(jnp.bfloat16), w_ref[0], preferred_element_type=jnp.float32)
         + jnp.dot(x.astype(jnp.bfloat16), w_ref[1], preferred_element_type=jnp.float32)
         + jnp.dot(xp.astype(jnp.bfloat16), w_ref[2], preferred_element_type=jnp.float32)
         + b_ref[...])
    if act == "relu":
        y = jnp.maximum(y, 0.0)
    elif act == "lrelu":
        y = jnp.where(y >= 0.0, y, 0.1 * y)
    return y


def _up2(x):
    """Nearest-neighbour 2x time upsample via a 0/1 matmul (MXU-friendly,
    avoids HBM round-trip of jnp.repeat)."""
    Tt, _ = x.shape
    r = jax.lax.broadcasted_iota(jnp.int32, (2 * Tt, Tt), 0)
    c = jax.lax.broadcasted_iota(jnp.int32, (2 * Tt, Tt), 1)
    up = ((r == 2 * c) | (r == 2 * c + 1)).astype(jnp.float32)
    return jnp.dot(up, x, preferred_element_type=jnp.float32)


# ================= fused encoder-layer kernel =================

def _enc_layer_kernel(h_ref, mq_ref, mk_ref, wqkv_ref, bqkv_ref, wo_ref, bo_ref,
                      w1_ref, b1_ref, w2_ref, b2_ref, ln_ref, o_ref,
                      *, n_heads, head_dim):
    B, T, Hc = h_ref.shape
    h2 = h_ref[...].reshape(B * T, Hc)               # f32, stays in VMEM
    mq = mq_ref[...]                                 # (B, T, 1)
    mk = mk_ref[...]                                 # (B, 1, T)

    # fused QKV projection (bf16 operands, f32 accumulation)
    qkv = (jnp.dot(h2.astype(jnp.bfloat16), wqkv_ref[...],
                   preferred_element_type=jnp.float32) + bqkv_ref[...])

    amask = (1.0 - mq * mk) * (-1e9)                 # (B, T, T) additive mask
    scale = 1.0 / math.sqrt(head_dim)

    head_outs = []
    for hh in range(n_heads):                        # static unrolled loop
        lo = hh * head_dim
        q = qkv[:, lo:lo + head_dim].reshape(B, T, head_dim)
        k = qkv[:, Hc + lo:Hc + lo + head_dim].reshape(B, T, head_dim)
        v = qkv[:, 2 * Hc + lo:2 * Hc + lo + head_dim].reshape(B, T, head_dim)
        s = jnp.einsum('bqd,bkd->bqk', q, k,
                       preferred_element_type=jnp.float32) * scale + amask
        s = s - jnp.max(s, axis=-1, keepdims=True)
        p = jnp.exp(s)
        p = p * pl.reciprocal(jnp.sum(p, axis=-1, keepdims=True), approx=True)
        o_h = jnp.einsum('bqk,bkd->bqd', p, v, preferred_element_type=jnp.float32)
        head_outs.append(o_h.reshape(B * T, head_dim))
    attn = jnp.concatenate(head_outs, axis=-1)       # (B*T, Hc)

    o = (jnp.dot(attn.astype(jnp.bfloat16), wo_ref[...],
                 preferred_element_type=jnp.float32) + bo_ref[...])

    ln = ln_ref[...]                                 # (4, Hc): g1, b1, g2, b2
    h2 = _layer_norm2d(h2 + o, ln[0:1, :], ln[1:2, :])

    ff = (jnp.dot(h2.astype(jnp.bfloat16), w1_ref[...],
                  preferred_element_type=jnp.float32) + b1_ref[...])
    ff = jnp.maximum(ff, 0.0)
    ff = (jnp.dot(ff.astype(jnp.bfloat16), w2_ref[...],
                  preferred_element_type=jnp.float32) + b2_ref[...])
    h2 = _layer_norm2d(h2 + ff, ln[2:3, :], ln[3:4, :])

    # keep the trailing mask: fully-masked rows got a uniform softmax above.
    o_ref[...] = h2.reshape(B, T, Hc) * mq


def pallas_encoder_layer(h, mq, mk, p):
    B, T, Hc = h.shape
    return pl.pallas_call(
        functools.partial(_enc_layer_kernel, n_heads=N_HEADS,
                          head_dim=Hc // N_HEADS),
        out_shape=jax.ShapeDtypeStruct((B, T, Hc), jnp.float32),
        grid=(1,),
        in_specs=[_const_spec(h), _const_spec(mq), _const_spec(mk),
                  _const_spec(p["wqkv"]), _const_spec(p["bqkv"]),
                  _const_spec(p["wo"]), _const_spec(p["bo"]),
                  _const_spec(p["w1"]), _const_spec(p["b1"]),
                  _const_spec(p["w2"]), _const_spec(p["b2"]),
                  _const_spec(p["ln"])],
        out_specs=pl.BlockSpec((B, T, Hc), lambda i: (0, 0, 0)),
        compiler_params=pltpu.CompilerParams(dimension_semantics=("arbitrary",)),
    )(h, mq, mk, p["wqkv"], p["bqkv"], p["wo"], p["bo"],
      p["w1"], p["b1"], p["w2"], p["b2"], p["ln"])


# ============ fused stats-projection + duration-predictor kernel ============

def _stats_dur_kernel(h_ref, mq_ref, w_ref, b_ref, dpw2_ref, dpb2_ref,
                      stats_ref, logw_ref):
    B, T, Hc = h_ref.shape
    h2 = h_ref[...].reshape(B * T, Hc)
    mcol = mq_ref[...].reshape(B * T, 1)
    # single lane-dense (H, 2C+DP_FF)=(32,128) matmul for stats + DP hidden
    full = (jnp.dot(h2.astype(jnp.bfloat16), w_ref[...],
                    preferred_element_type=jnp.float32) + b_ref[...])
    stats = full[:, :2 * C] * mcol
    dph = jnp.maximum(full[:, 2 * C:], 0.0)
    logw = (jnp.sum(dph * dpw2_ref[...], axis=-1, keepdims=True)
            + dpb2_ref[...]) * mcol
    stats_ref[...] = stats.reshape(B, T, 2 * C)
    logw_ref[...] = logw.reshape(B, T, 1)


def pallas_stats_duration(h, mq, params):
    B, T, _ = h.shape
    return pl.pallas_call(
        _stats_dur_kernel,
        out_shape=(jax.ShapeDtypeStruct((B, T, 2 * C), jnp.float32),
                   jax.ShapeDtypeStruct((B, T, 1), jnp.float32)),
        grid=(1,),
        in_specs=[_const_spec(h), _const_spec(mq),
                  _const_spec(params["w_sd"]), _const_spec(params["b_sd"]),
                  _const_spec(params["dp_w2"]), _const_spec(params["dp_b2"])],
        out_specs=[pl.BlockSpec((B, T, 2 * C), lambda i: (0, 0, 0)),
                   pl.BlockSpec((B, T, 1), lambda i: (0, 0, 0))],
        compiler_params=pltpu.CompilerParams(dimension_semantics=("arbitrary",)),
    )(h, mq, params["w_sd"], params["b_sd"], params["dp_w2"], params["dp_b2"])


# ============ fused expand + reparameterize + reverse-flow kernel ============

def _expand_flow_kernel(attn_ref, mp_ref, lp_ref, eps_ref, ym_ref,
                        fw1_ref, fb1_ref, fw2_ref, fb2_ref, z_ref,
                        *, noise_scale):
    a = attn_ref[0]                                  # (Ts, T) 0/1 path
    mp = mp_ref[0]                                   # (T, C)
    lp = lp_ref[0]
    eps = eps_ref[0]                                 # (Ts, C)
    ym = ym_ref[0]                                   # (Ts, 1)

    m_exp = jnp.dot(a, mp, preferred_element_type=jnp.float32)
    l_exp = jnp.dot(a, lp, preferred_element_type=jnp.float32)
    z_p = (m_exp + eps * jnp.exp(l_exp) * noise_scale) * ym

    # TODO(synk): full 4-layer WaveNet-conditioned residual coupling flow
    #             reduced to a single mean-only coupling layer (reverse pass).
    half = C // 2
    z0 = z_p[:, :half]
    z1 = z_p[:, half:]
    hfl = _conv3_2d(z0, fw1_ref, fb1_ref, act="relu")
    mfl = _conv3_2d(hfl, fw2_ref, fb2_ref, act="none")
    z1 = (z1 - mfl) * ym
    z_ref[0] = jnp.concatenate([z0, z1], axis=-1) * ym


def pallas_expand_flow(attn, m_p, logs_p, eps, ym, params, noise_scale):
    B, Ts, _ = attn.shape
    Cc = m_p.shape[-1]
    return pl.pallas_call(
        functools.partial(_expand_flow_kernel, noise_scale=float(noise_scale)),
        out_shape=jax.ShapeDtypeStruct((B, Ts, Cc), jnp.float32),
        grid=(B,),
        in_specs=[_batch_spec(attn), _batch_spec(m_p), _batch_spec(logs_p),
                  _batch_spec(eps), _batch_spec(ym),
                  _const_spec(params["flow_w1"]), _const_spec(params["flow_b1"]),
                  _const_spec(params["flow_w2"]), _const_spec(params["flow_b2"])],
        out_specs=pl.BlockSpec((1, Ts, Cc), lambda b: (b, 0, 0)),
        compiler_params=pltpu.CompilerParams(dimension_semantics=("parallel",)),
    )(attn, m_p, logs_p, eps, ym,
      params["flow_w1"], params["flow_b1"], params["flow_w2"], params["flow_b2"])


# ================= fused decoder kernel (per-batch) =================

def _decoder_kernel(z_ref, prew_ref, preb_ref, w1_ref, b1_ref, w2_ref, b2_ref,
                    wpost_ref, bpost_ref, o_ref):
    # TODO(synk): transposed-conv upsampling + MRF resblocks approximated by
    #             nearest-repeat upsampling + k=3 convs (all fused in-kernel).
    z = z_ref[0]                                      # (Ts, C)
    o = _conv3_2d(z, prew_ref, preb_ref, act="lrelu")     # (Ts, 32)
    o = _up2(o)                                           # (2Ts, 32)
    o = _conv3_2d(o, w1_ref, b1_ref, act="lrelu")         # (2Ts, 16)
    o = _up2(o)                                           # (4Ts, 16)
    o = _conv3_2d(o, w2_ref, b2_ref, act="lrelu")         # (Twav, 8)

    # post conv (Cout=1): put time on the lane axis for a dense (1, Twav) store
    Cin = o.shape[1]
    zero = jnp.zeros((1, Cin), jnp.float32)
    om = jnp.concatenate([zero, o[:-1]], axis=0)
    op = jnp.concatenate([o[1:], zero], axis=0)
    wpost = wpost_ref[...]                            # (3, 1, Cin) f32
    y = (jnp.dot(wpost[0], om.T, preferred_element_type=jnp.float32)
         + jnp.dot(wpost[1], o.T, preferred_element_type=jnp.float32)
         + jnp.dot(wpost[2], op.T, preferred_element_type=jnp.float32)
         + bpost_ref[...])                            # (1, Twav)
    o_ref[0] = jnp.tanh(y)


def pallas_decoder(z, params):
    B, Ts, Cc = z.shape
    Twav = 4 * Ts
    return pl.pallas_call(
        _decoder_kernel,
        out_shape=jax.ShapeDtypeStruct((B, 1, Twav), jnp.float32),
        grid=(B,),
        in_specs=[pl.BlockSpec((1, Ts, Cc), lambda b: (b, 0, 0)),
                  _const_spec(params["dec_pre_w"]), _const_spec(params["dec_pre_b"]),
                  _const_spec(params["dec_w1"]), _const_spec(params["dec_b1"]),
                  _const_spec(params["dec_w2"]), _const_spec(params["dec_b2"]),
                  _const_spec(params["dec_post_w"]), _const_spec(params["dec_post_b"])],
        out_specs=pl.BlockSpec((1, 1, Twav), lambda b: (b, 0, 0)),
        compiler_params=pltpu.CompilerParams(dimension_semantics=("parallel",)),
    )(z, params["dec_pre_w"], params["dec_pre_b"],
      params["dec_w1"], params["dec_b1"], params["dec_w2"], params["dec_b2"],
      params["dec_post_w"], params["dec_post_b"])


# ================= plain-JAX glue =================

def sequence_mask(lengths, max_len):
    return (jnp.arange(max_len)[None, :] < lengths[:, None]).astype(jnp.float32)


def generate_path(duration, t_y):
    """duration:(B,Tx) integer-valued floats -> path:(B,Ty,Tx)."""
    cum = jnp.cumsum(duration, axis=-1)                       # (B, Tx)
    t = jnp.arange(t_y, dtype=jnp.float32)[None, :, None]     # (1, Ty, 1)
    ge_start = t >= (cum - duration)[:, None, :]
    lt_end = t < cum[:, None, :]
    return (ge_start & lt_end).astype(jnp.float32)


# ================= full VITS-style inference =================

def vits_infer(params, x, x_lengths, noise_scale=1.0, length_scale=1.0,
               noise_scale_w=1.0, sid=0, max_len=None):
    # TODO(synk): speaker embedding (sid) omitted — single-speaker config.
    # TODO(synk): stochastic duration predictor (which consumes noise_scale_w)
    #             replaced by the deterministic DurationPredictor path.
    del noise_scale_w, sid
    B, T = x.shape

    # ---- text encoder ----
    x_mask = sequence_mask(x_lengths, T)                       # (B, T)
    mq = x_mask[:, :, None]                                    # (B, T, 1)
    mk = x_mask[:, None, :]                                    # (B, 1, T)
    h = params["emb"][x] * math.sqrt(H)                        # (B, T, H)
    h = h * mq
    for lp in params["enc_layers"]:
        h = pallas_encoder_layer(h, mq, mk, lp)

    # ---- stats projection + duration predictor (one fused kernel) ----
    stats, logw3 = pallas_stats_duration(h, mq, params)
    m_p, logs_p = jnp.split(stats, 2, axis=-1)                 # (B, T, C) each
    logw = logw3[..., 0]                                       # (B, T)

    w = jnp.exp(logw) * x_mask * length_scale
    w_ceil = jnp.minimum(jnp.ceil(w), float(MAX_DUR)) * x_mask
    y_lengths = jnp.maximum(jnp.sum(w_ceil, axis=-1), 1.0)

    T_spec = MAX_DUR * T                                       # static bound
    y_mask = sequence_mask(y_lengths, T_spec)                  # (B, T_spec)
    attn = generate_path(w_ceil, T_spec)                       # (B, T_spec, T)
    attn = attn * y_mask[:, :, None] * x_mask[:, None, :]

    # ---- expand + reparameterize + flow (one fused per-batch kernel) ----
    # TODO(synk): PyTorch uses a fresh randn_like per call; fixed key here.
    eps = jax.random.normal(jax.random.PRNGKey(1234), (B, T_spec, C), jnp.float32)
    z = pallas_expand_flow(attn, m_p, logs_p, eps, y_mask[..., None],
                           params, noise_scale)

    if max_len is not None:
        z = z[:, :max_len]

    # ---- decoder (HiFi-GAN style, fully fused per batch) ----
    return pallas_decoder(z, params)                           # (B, 1, T_wav)


# ================= deterministic parameter init =================

def init_params(key):
    keys = iter(jax.random.split(key, 64))

    def nrm(shape, fan_in, dtype=jnp.bfloat16, scale=None):
        if scale is None:
            scale = 1.0 / math.sqrt(fan_in)
        w = scale * jax.random.normal(next(keys), shape, jnp.float32)
        return w.astype(dtype)

    p = {"emb": nrm((VOCAB, H), 1, dtype=jnp.float32, scale=0.1)}
    layers = []
    for _ in range(N_LAYERS):
        layers.append({
            "wqkv": nrm((H, 3 * H), H),                    # fused Q/K/V weight
            "bqkv": jnp.zeros((1, 3 * H), jnp.float32),
            "wo": nrm((H, H), H),
            "bo": jnp.zeros((1, H), jnp.float32),
            "w1": nrm((H, FF), H),
            "b1": jnp.zeros((1, FF), jnp.float32),
            "w2": nrm((FF, H), FF),
            "b2": jnp.zeros((1, H), jnp.float32),
            "ln": jnp.stack([jnp.ones((H,)), jnp.zeros((H,)),
                             jnp.ones((H,)), jnp.zeros((H,))]).astype(jnp.float32),
        })
    p["enc_layers"] = layers
    # fused (m_p, logs_p) projection + duration-predictor hidden layer: N = 128
    p["w_sd"] = nrm((H, 2 * C + DP_FF), H)
    p["b_sd"] = jnp.zeros((1, 2 * C + DP_FF), jnp.float32)
    p["dp_w2"] = nrm((1, DP_FF), DP_FF, dtype=jnp.float32)
    p["dp_b2"] = jnp.zeros((1, 1), jnp.float32)
    # flow coupling convs (k=3), weights laid out (tap, Cin, Cout)
    p["flow_w1"] = nrm((3, C // 2, 32), 3 * (C // 2))
    p["flow_b1"] = jnp.zeros((1, 32), jnp.float32)
    p["flow_w2"] = nrm((3, 32, C // 2), 3 * 32)
    p["flow_b2"] = jnp.zeros((1, C // 2), jnp.float32)
    # decoder convs
    p["dec_pre_w"] = nrm((3, C, 32), 3 * C)
    p["dec_pre_b"] = jnp.zeros((1, 32), jnp.float32)
    p["dec_w1"] = nrm((3, 32, 16), 3 * 32)
    p["dec_b1"] = jnp.zeros((1, 16), jnp.float32)
    p["dec_w2"] = nrm((3, 16, 8), 3 * 16)
    p["dec_b2"] = jnp.zeros((1, 8), jnp.float32)
    p["dec_post_w"] = nrm((3, 1, 8), 3 * 8, dtype=jnp.float32)
    p["dec_post_b"] = jnp.zeros((1, 1), jnp.float32)
    return p


if __name__ == "__main__":
    B, T = 2, 8
    key = jax.random.PRNGKey(0)
    kx, _ = jax.random.split(key)
    x = jax.random.randint(kx, (B, T), 0, VOCAB, dtype=jnp.int32)
    x_lengths = jnp.array([T, T - 2], dtype=jnp.int32)
    params = init_params(jax.random.PRNGKey(42))

    run = jax.jit(lambda p, xx, xl: vits_infer(
        p, xx, xl, noise_scale=1.0, length_scale=1.0,
        noise_scale_w=1.0, sid=0, max_len=None))

    out = run(params, x, x_lengths)
    out = jax.block_until_ready(out)

    expected_wav_len = MAX_DUR * T * 4     # static spec bound * 2x2 upsampling
    assert out.shape == (B, 1, expected_wav_len), out.shape
    assert jnp.all(jnp.isfinite(out))
    print("KERNEL_OK")
</pallas_src>

<mosaic_0001>
module attributes {stable_mosaic.version = 11 : i64} {
  func.func @_stats_dur_kernel(%arg0: i32, %arg1: memref<2x8x32xf32, #tpu.memory_space<vmem>>, %arg2: memref<2x8x1xf32, #tpu.memory_space<vmem>>, %arg3: memref<32x128xbf16, #tpu.memory_space<vmem>>, %arg4: memref<1x128xf32, #tpu.memory_space<vmem>>, %arg5: memref<1x64xf32, #tpu.memory_space<vmem>>, %arg6: memref<1x1xf32, #tpu.memory_space<vmem>>, %arg7: memref<2x8x64xf32, #tpu.memory_space<vmem>>, %arg8: memref<2x8x1xf32, #tpu.memory_space<vmem>>) attributes {dimension_semantics = [#tpu.dimension_semantics<arbitrary>], iteration_bounds = array<i64: 1>, scalar_prefetch = 0 : i64, scratch_operands = 0 : i64, tpu.core_type = #tpu.core_type<tc>, window_params = [{pipeline_mode = #tpu.pipeline_mode<synchronous>, transform_indices = @transform_0, window_bounds = array<i64: 2, 8, 32>}, {pipeline_mode = #tpu.pipeline_mode<synchronous>, transform_indices = @transform_1, window_bounds = array<i64: 2, 8, 1>}, {pipeline_mode = #tpu.pipeline_mode<synchronous>, transform_indices = @transform_2, window_bounds = array<i64: 32, 128>}, {pipeline_mode = #tpu.pipeline_mode<synchronous>, transform_indices = @transform_3, window_bounds = array<i64: 1, 128>}, {pipeline_mode = #tpu.pipeline_mode<synchronous>, transform_indices = @transform_4, window_bounds = array<i64: 1, 64>}, {pipeline_mode = #tpu.pipeline_mode<synchronous>, transform_indices = @transform_5, window_bounds = array<i64: 1, 1>}, {pipeline_mode = #tpu.pipeline_mode<synchronous>, transform_indices = @transform_6, window_bounds = array<i64: 2, 8, 64>}, {pipeline_mode = #tpu.pipeline_mode<synchronous>, transform_indices = @transform_7, window_bounds = array<i64: 2, 8, 1>}]} {
    %c0 = arith.constant 0 : index
    %c0_0 = arith.constant 0 : index
    %c0_1 = arith.constant 0 : index
    %0 = vector.load %arg1[%c0, %c0_0, %c0_1] : memref<2x8x32xf32, #tpu.memory_space<vmem>>, vector<2x8x32xf32>
    %1 = vector.shape_cast %0 : vector<2x8x32xf32> to vector<16x32xf32>
    %c0_2 = arith.constant 0 : index
    %c0_3 = arith.constant 0 : index
    %c0_4 = arith.constant 0 : index
    %2 = vector.load %arg2[%c0_2, %c0_3, %c0_4] : memref<2x8x1xf32, #tpu.memory_space<vmem>>, vector<2x8x1xf32>
    %3 = vector.shape_cast %2 : vector<2x8x1xf32> to vector<16x1xf32>
    %4 = arith.truncf %1 : vector<16x32xf32> to vector<16x32xbf16>
    %c0_5 = arith.constant 0 : index
    %c0_6 = arith.constant 0 : index
    %5 = vector.load %arg3[%c0_5, %c0_6] : memref<32x128xbf16, #tpu.memory_space<vmem>>, vector<32x128xbf16>
    %cst = arith.constant dense<0.000000e+00> : vector<16x128xf32>
    %6 = tpu.matmul %4, %5, %cst {dimension_numbers = #tpu.dot_dimension_numbers<[1], [0], [0], [1], [0, 0, 1, 1], [], []>} : vector<16x32xbf16>, vector<32x128xbf16>, vector<16x128xf32> -> vector<16x128xf32>
    %c0_7 = arith.constant 0 : index
    %c0_8 = arith.constant 0 : index
    %7 = vector.load %arg4[%c0_7, %c0_8] : memref<1x128xf32, #tpu.memory_space<vmem>>, vector<1x128xf32>
    %8 = vector.broadcast %7 : vector<1x128xf32> to vector<16x128xf32>
    %9 = arith.addf %6, %8 : vector<16x128xf32>
    %10 = vector.extract_strided_slice %9 {offsets = [0, 0], sizes = [16, 64], strides = [1, 1]} : vector<16x128xf32> to vector<16x64xf32>
    %11 = vector.broadcast %3 : vector<16x1xf32> to vector<16x64xf32>
    %12 = arith.mulf %10, %11 : vector<16x64xf32>
    %13 = vector.extract_strided_slice %9 {offsets = [0, 64], sizes = [16, 64], strides = [1, 1]} : vector<16x128xf32> to vector<16x64xf32>
    %cst_9 = arith.constant 0.000000e+00 : f32
    %14 = vector.broadcast %cst_9 : f32 to vector<16x64xf32>
    %15 = arith.maximumf %13, %14 : vector<16x64xf32>
    %c0_10 = arith.constant 0 : index
    %c0_11 = arith.constant 0 : index
    %16 = vector.load %arg5[%c0_10, %c0_11] : memref<1x64xf32, #tpu.memory_space<vmem>>, vector<1x64xf32>
    %17 = vector.broadcast %16 : vector<1x64xf32> to vector<16x64xf32>
    %18 = arith.mulf %15, %17 : vector<16x64xf32>
    %cst_12 = arith.constant dense<0.000000e+00> : vector<16xf32>
    %19 = vector.multi_reduction <add>, %18, %cst_12 [1] : vector<16x64xf32> to vector<16xf32>
    %20 = vector.shape_cast %19 : vector<16xf32> to vector<16x1xf32>
    %c0_13 = arith.constant 0 : index
    %c0_14 = arith.constant 0 : index
    %21 = vector.load %arg6[%c0_13, %c0_14] : memref<1x1xf32, #tpu.memory_space<vmem>>, vector<1x1xf32>
    %22 = vector.broadcast %21 : vector<1x1xf32> to vector<16x1xf32>
    %23 = arith.addf %20, %22 : vector<16x1xf32>
    %24 = arith.mulf %23, %3 : vector<16x1xf32>
    %25 = vector.shape_cast %12 : vector<16x64xf32> to vector<2x8x64xf32>
    %c0_15 = arith.constant 0 : index
    %c0_16 = arith.constant 0 : index
    %c0_17 = arith.constant 0 : index
    %26 = vector.load %arg7[%c0_15, %c0_16, %c0_17] : memref<2x8x64xf32, #tpu.memory_space<vmem>>, vector<2x8x64xf32>
    tpu.vector_store %arg7[%c0_15, %c0_16, %c0_17], %25 {strides = array<i32>} : memref<2x8x64xf32, #tpu.memory_space<vmem>>, vector<2x8x64xf32>,
    %27 = vector.shape_cast %24 : vector<16x1xf32> to vector<2x8x1xf32>
    %c0_18 = arith.constant 0 : index
    %c0_19 = arith.constant 0 : index
    %c0_20 = arith.constant 0 : index
    %28 = vector.load %arg8[%c0_18, %c0_19, %c0_20] : memref<2x8x1xf32, #tpu.memory_space<vmem>>, vector<2x8x1xf32>
    tpu.vector_store %arg8[%c0_18, %c0_19, %c0_20], %27 {strides = array<i32>} : memref<2x8x1xf32, #tpu.memory_space<vmem>>, vector<2x8x1xf32>,
    return
  }
  func.func @transform_0(%arg0: i32) -> (i32, i32, i32) {
    %c0_i32 = arith.constant 0 : i32
    %c0_i32_0 = arith.constant 0 : i32
    %c0_i32_1 = arith.constant 0 : i32
    %c0_i32_2 = arith.constant 0 : i32
    return %c0_i32, %c0_i32_0, %c0_i32_1 : i32, i32, i32
  }
  func.func @transform_1(%arg0: i32) -> (i32, i32, i32) {
    %c0_i32 = arith.constant 0 : i32
    %c0_i32_0 = arith.constant 0 : i32
    %c0_i32_1 = arith.constant 0 : i32
    %c0_i32_2 = arith.constant 0 : i32
    return %c0_i32, %c0_i32_0, %c0_i32_1 : i32, i32, i32
  }
  func.func @transform_2(%arg0: i32) -> (i32, i32) {
    %c0_i32 = arith.constant 0 : i32
    %c0_i32_0 = arith.constant 0 : i32
    %c0_i32_1 = arith.constant 0 : i32
    return %c0_i32, %c0_i32_0 : i32, i32
  }
  func.func @transform_3(%arg0: i32) -> (i32, i32) {
    %c0_i32 = arith.constant 0 : i32
    %c0_i32_0 = arith.constant 0 : i32
    %c0_i32_1 = arith.constant 0 : i32
    return %c0_i32, %c0_i32_0 : i32, i32
  }
  func.func @transform_4(%arg0: i32) -> (i32, i32) {
    %c0_i32 = arith.constant 0 : i32
    %c0_i32_0 = arith.constant 0 : i32
    %c0_i32_1 = arith.constant 0 : i32
    return %c0_i32, %c0_i32_0 : i32, i32
  }
  func.func @transform_5(%arg0: i32) -> (i32, i32) {
    %c0_i32 = arith.constant 0 : i32
    %c0_i32_0 = arith.constant 0 : i32
    %c0_i32_1 = arith.constant 0 : i32
    return %c0_i32, %c0_i32_0 : i32, i32
  }
  func.func @transform_6(%arg0: i32) -> (i32, i32, i32) {
    %c0_i32 = arith.constant 0 : i32
    %c0_i32_0 = arith.constant 0 : i32
    %c0_i32_1 = arith.constant 0 : i32
    %c0_i32_2 = arith.constant 0 : i32
    return %c0_i32, %c0_i32_0, %c0_i32_1 : i32, i32, i32
  }
  func.func @transform_7(%arg0: i32) -> (i32, i32, i32) {
    %c0_i32 = arith.constant 0 : i32
    %c0_i32_0 = arith.constant 0 : i32
    %c0_i32_1 = arith.constant 0 : i32
    %c0_i32_2 = arith.constant 0 : i32
    return %c0_i32, %c0_i32_0, %c0_i32_1 : i32, i32, i32
  }
}

module attributes {stable_mosaic.version = 11 : i64} {
  func.func @_enc_layer_kernel(%arg0: i32, %arg1: memref<2x8x32xf32, #tpu.memory_space<vmem>>, %arg2: memref<2x8x1xf32, #tpu.memory_space<vmem>>, %arg3: memref<2x1x8xf32, #tpu.memory_space<vmem>>, %arg4: memref<32x96xbf16, #tpu.memory_space<vmem>>, %arg5: memref<1x96xf32, #tpu.memory_space<vmem>>, %arg6: memref<32x32xbf16, #tpu.memory_space<vmem>>, %arg7: memref<1x32xf32, #tpu.memory_space<vmem>>, %arg8: memref<32x64xbf16, #tpu.memory_space<vmem>>, %arg9: memref<1x64xf32, #tpu.memory_space<vmem>>, %arg10: memref<64x32xbf16, #tpu.memory_space<vmem>>, %arg11: memref<1x32xf32, #tpu.memory_space<vmem>>, %arg12: memref<4x32xf32, #tpu.memory_space<vmem>>, %arg13: memref<2x8x32xf32, #tpu.memory_space<vmem>>) attributes {dimension_semantics = [#tpu.dimension_semantics<arbitrary>], iteration_bounds = array<i64: 1>, scalar_prefetch = 0 : i64, scratch_operands = 0 : i64, tpu.core_type = #tpu.core_type<tc>, window_params = [{pipeline_mode = #tpu.pipeline_mode<synchronous>, transform_indices = @transform_0, window_bounds = array<i64: 2, 8, 32>}, {pipeline_mode = #tpu.pipeline_mode<synchronous>, transform_indices = @transform_1, window_bounds = array<i64: 2, 8, 1>}, {pipeline_mode = #tpu.pipeline_mode<synchronous>, transform_indices = @transform_2, window_bounds = array<i64: 2, 1, 8>}, {pipeline_mode = #tpu.pipeline_mode<synchronous>, transform_indices = @transform_3, window_bounds = array<i64: 32, 96>}, {pipeline_mode = #tpu.pipeline_mode<synchronous>, transform_indices = @transform_4, window_bounds = array<i64: 1, 96>}, {pipeline_mode = #tpu.pipeline_mode<synchronous>, transform_indices = @transform_5, window_bounds = array<i64: 32, 32>}, {pipeline_mode = #tpu.pipeline_mode<synchronous>, transform_indices = @transform_6, window_bounds = array<i64: 1, 32>}, {pipeline_mode = #tpu.pipeline_mode<synchronous>, transform_indices = @transform_7, window_bounds = array<i64: 32, 64>}, {pipeline_mode = #tpu.pipeline_mode<synchronous>, transform_indices = @transform_8, window_bounds = array<i64: 1, 64>}, {pipeline_mode = #tpu.pipeline_mode<synchronous>, transform_indices = @transform_9, window_bounds = array<i64: 64, 32>}, {pipeline_mode = #tpu.pipeline_mode<synchronous>, transform_indices = @transform_10, window_bounds = array<i64: 1, 32>}, {pipeline_mode = #tpu.pipeline_mode<synchronous>, transform_indices = @transform_11, window_bounds = array<i64: 4, 32>}, {pipeline_mode = #tpu.pipeline_mode<synchronous>, transform_indices = @transform_12, window_bounds = array<i64: 2, 8, 32>}]} {
    %c0 = arith.constant 0 : index
    %c0_0 = arith.constant 0 : index
    %c0_1 = arith.constant 0 : index
    %0 = vector.load %arg1[%c0, %c0_0, %c0_1] : memref<2x8x32xf32, #tpu.memory_space<vmem>>, vector<2x8x32xf32>
    %1 = vector.shape_cast %0 : vector<2x8x32xf32> to vector<16x32xf32>
    %c0_2 = arith.constant 0 : index
    %c0_3 = arith.constant 0 : index
    %c0_4 = arith.constant 0 : index
    %2 = vector.load %arg2[%c0_2, %c0_3, %c0_4] : memref<2x8x1xf32, #tpu.memory_space<vmem>>, vector<2x8x1xf32>
    %c0_5 = arith.constant 0 : index
    %c0_6 = arith.constant 0 : index
    %c0_7 = arith.constant 0 : index
    %3 = vector.load %arg3[%c0_5, %c0_6, %c0_7] : memref<2x1x8xf32, #tpu.memory_space<vmem>>, vector<2x1x8xf32>
    %4 = arith.truncf %1 : vector<16x32xf32> to vector<16x32xbf16>
    %c0_8 = arith.constant 0 : index
    %c0_9 = arith.constant 0 : index
    %5 = vector.load %arg4[%c0_8, %c0_9] : memref<32x96xbf16, #tpu.memory_space<vmem>>, vector<32x96xbf16>
    %cst = arith.constant dense<0.000000e+00> : vector<16x96xf32>
    %6 = tpu.matmul %4, %5, %cst {dimension_numbers = #tpu.dot_dimension_numbers<[1], [0], [0], [1], [0, 0, 1, 1], [], []>} : vector<16x32xbf16>, vector<32x96xbf16>, vector<16x96xf32> -> vector<16x96xf32>
    %c0_10 = arith.constant 0 : index
    %c0_11 = arith.constant 0 : index
    %7 = vector.load %arg5[%c0_10, %c0_11] : memref<1x96xf32, #tpu.memory_space<vmem>>, vector<1x96xf32>
    %8 = vector.broadcast %7 : vector<1x96xf32> to vector<16x96xf32>
    %9 = arith.addf %6, %8 : vector<16x96xf32>
    %10 = vector.broadcast %2 : vector<2x8x1xf32> to vector<2x8x8xf32>
    %11 = vector.broadcast %3 : vector<2x1x8xf32> to vector<2x8x8xf32>
    %12 = arith.mulf %10, %11 : vector<2x8x8xf32>
    %cst_12 = arith.constant 1.000000e+00 : f32
    %13 = vector.broadcast %cst_12 : f32 to vector<2x8x8xf32>
    %14 = arith.subf %13, %12 : vector<2x8x8xf32>
    %cst_13 = arith.constant -1.000000e+09 : f32
    %15 = vector.broadcast %cst_13 : f32 to vector<2x8x8xf32>
    %16 = arith.mulf %14, %15 : vector<2x8x8xf32>
    %17 = vector.extract_strided_slice %9 {offsets = [0, 0], sizes = [16, 16], strides = [1, 1]} : vector<16x96xf32> to vector<16x16xf32>
    %18 = vector.shape_cast %17 : vector<16x16xf32> to vector<2x8x16xf32>
    %19 = vector.extract_strided_slice %9 {offsets = [0, 32], sizes = [16, 16], strides = [1, 1]} : vector<16x96xf32> to vector<16x16xf32>
    %20 = vector.shape_cast %19 : vector<16x16xf32> to vector<2x8x16xf32>
    %21 = vector.extract_strided_slice %9 {offsets = [0, 64], sizes = [16, 16], strides = [1, 1]} : vector<16x96xf32> to vector<16x16xf32>
    %22 = vector.shape_cast %21 : vector<16x16xf32> to vector<2x8x16xf32>
    "tpu.trace_start"() <{level = 10 : i32, message = "bqd,bkd->bqk"}> : () -> ()
    %cst_14 = arith.constant dense<0.000000e+00> : vector<2x8x8xf32>
    %23 = tpu.matmul %18, %20, %cst_14 {dimension_numbers = #tpu.dot_dimension_numbers<[2], [2], [1], [1], [0, 0, 0, 1, 1, 1], [0], [0]>} : vector<2x8x16xf32>, vector<2x8x16xf32>, vector<2x8x8xf32> -> vector<2x8x8xf32>
    "tpu.trace_stop"() : () -> ()
    %cst_15 = arith.constant 2.500000e-01 : f32
    %24 = vector.broadcast %cst_15 : f32 to vector<2x8x8xf32>
    %25 = arith.mulf %23, %24 : vector<2x8x8xf32>
    %26 = arith.addf %25, %16 : vector<2x8x8xf32>
    %cst_16 = arith.constant dense<0xFF800000> : vector<2x8xf32>
    %27 = vector.multi_reduction <maximumf>, %26, %cst_16 [2] : vector<2x8x8xf32> to vector<2x8xf32>
    %28 = vector.shape_cast %27 : vector<2x8xf32> to vector<2x8x1xf32>
    %29 = vector.broadcast %28 : vector<2x8x1xf32> to vector<2x8x8xf32>
    %30 = arith.subf %26, %29 : vector<2x8x8xf32>
    %31 = math.exp %30 : vector<2x8x8xf32>
    %cst_17 = arith.constant dense<0.000000e+00> : vector<2x8xf32>
    %32 = vector.multi_reduction <add>, %31, %cst_17 [2] : vector<2x8x8xf32> to vector<2x8xf32>
    %33 = vector.shape_cast %32 : vector<2x8xf32> to vector<2x8x1xf32>
    %34 = tpu.reciprocal %33 {approx = true} : vector<2x8x1xf32> -> vector<2x8x1xf32>
    %35 = vector.broadcast %34 : vector<2x8x1xf32> to vector<2x8x8xf32>
    %36 = arith.mulf %31, %35 : vector<2x8x8xf32>
    "tpu.trace_start"() <{level = 10 : i32, message = "bqk,bkd->bqd"}> : () -> ()
    %cst_18 = arith.constant dense<0.000000e+00> : vector<2x8x16xf32>
    %37 = tpu.matmul %36, %22, %cst_18 {dimension_numbers = #tpu.dot_dimension_numbers<[2], [1], [1], [2], [0, 0, 0, 1, 1, 2], [0], [0]>} : vector<2x8x8xf32>, vector<2x8x16xf32>, vector<2x8x16xf32> -> vector<2x8x16xf32>
    "tpu.trace_stop"() : () -> ()
    %38 = vector.shape_cast %37 : vector<2x8x16xf32> to vector<16x16xf32>
    %39 = vector.extract_strided_slice %9 {offsets = [0, 16], sizes = [16, 16], strides = [1, 1]} : vector<16x96xf32> to vector<16x16xf32>
    %40 = vector.shape_cast %39 : vector<16x16xf32> to vector<2x8x16xf32>
    %41 = vector.extract_strided_slice %9 {offsets = [0, 48], sizes = [16, 16], strides = [1, 1]} : vector<16x96xf32> to vector<16x16xf32>
    %42 = vector.shape_cast %41 : vector<16x16xf32> to vector<2x8x16xf32>
    %43 = vector.extract_strided_slice %9 {offsets = [0, 80], sizes = [16, 16], strides = [1, 1]} : vector<16x96xf32> to vector<16x16xf32>
    %44 = vector.shape_cast %43 : vector<16x16xf32> to vector<2x8x16xf32>
    "tpu.trace_start"() <{level = 10 : i32, message = "bqd,bkd->bqk"}> : () -> ()
    %cst_19 = arith.constant dense<0.000000e+00> : vector<2x8x8xf32>
    %45 = tpu.matmul %40, %42, %cst_19 {dimension_numbers = #tpu.dot_dimension_numbers<[2], [2], [1], [1], [0, 0, 0, 1, 1, 1], [0], [0]>} : vector<2x8x16xf32>, vector<2x8x16xf32>, vector<2x8x8xf32> -> vector<2x8x8xf32>
    "tpu.trace_stop"() : () -> ()
    %cst_20 = arith.constant 2.500000e-01 : f32
    %46 = vector.broadcast %cst_20 : f32 to vector<2x8x8xf32>
    %47 = arith.mulf %45, %46 : vector<2x8x8xf32>
    %48 = arith.addf %47, %16 : vector<2x8x8xf32>
    %cst_21 = arith.constant dense<0xFF800000> : vector<2x8xf32>
    %49 = vector.multi_reduction <maximumf>, %48, %cst_21 [2] : vector<2x8x8xf32> to vector<2x8xf32>
    %50 = vector.shape_cast %49 : vector<2x8xf32> to vector<2x8x1xf32>
    %51 = vector.broadcast %50 : vector<2x8x1xf32> to vector<2x8x8xf32>
    %52 = arith.subf %48, %51 : vector<2x8x8xf32>
    %53 = math.exp %52 : vector<2x8x8xf32>
    %cst_22 = arith.constant dense<0.000000e+00> : vector<2x8xf32>
    %54 = vector.multi_reduction <add>, %53, %cst_22 [2] : vector<2x8x8xf32> to vector<2x8xf32>
    %55 = vector.shape_cast %54 : vector<2x8xf32> to vector<2x8x1xf32>
    %56 = tpu.reciprocal %55 {approx = true} : vector<2x8x1xf32> -> vector<2x8x1xf32>
    %57 = vector.broadcast %56 : vector<2x8x1xf32> to vector<2x8x8xf32>
    %58 = arith.mulf %53, %57 : vector<2x8x8xf32>
    "tpu.trace_start"() <{level = 10 : i32, message = "bqk,bkd->bqd"}> : () -> ()
    %cst_23 = arith.constant dense<0.000000e+00> : vector<2x8x16xf32>
    %59 = tpu.matmul %58, %44, %cst_23 {dimension_numbers = #tpu.dot_dimension_numbers<[2], [1], [1], [2], [0, 0, 0, 1, 1, 2], [0], [0]>} : vector<2x8x8xf32>, vector<2x8x16xf32>, vector<2x8x16xf32> -> vector<2x8x16xf32>
    "tpu.trace_stop"() : () -> ()
    %60 = vector.shape_cast %59 : vector<2x8x16xf32> to vector<16x16xf32>
    %61 = tpu.concatenate %38, %60 in 1 : vector<16x16xf32>, vector<16x16xf32> -> vector<16x32xf32>
    %62 = arith.truncf %61 : vector<16x32xf32> to vector<16x32xbf16>
    %c0_24 = arith.constant 0 : index
    %c0_25 = arith.constant 0 : index
    %63 = vector.load %arg6[%c0_24, %c0_25] : memref<32x32xbf16, #tpu.memory_space<vmem>>, vector<32x32xbf16>
    %cst_26 = arith.constant dense<0.000000e+00> : vector<16x32xf32>
    %64 = tpu.matmul %62, %63, %cst_26 {dimension_numbers = #tpu.dot_dimension_numbers<[1], [0], [0], [1], [0, 0, 1, 1], [], []>} : vector<16x32xbf16>, vector<32x32xbf16>, vector<16x32xf32> -> vector<16x32xf32>
    %c0_27 = arith.constant 0 : index
    %c0_28 = arith.constant 0 : index
    %65 = vector.load %arg7[%c0_27, %c0_28] : memref<1x32xf32, #tpu.memory_space<vmem>>, vector<1x32xf32>
    %66 = vector.broadcast %65 : vector<1x32xf32> to vector<16x32xf32>
    %67 = arith.addf %64, %66 : vector<16x32xf32>
    %c0_29 = arith.constant 0 : index
    %c0_30 = arith.constant 0 : index
    %68 = vector.load %arg12[%c0_29, %c0_30] : memref<4x32xf32, #tpu.memory_space<vmem>>, vector<4x32xf32>
    %69 = arith.addf %1, %67 : vector<16x32xf32>
    %70 = vector.extract_strided_slice %68 {offsets = [0, 0], sizes = [1, 32], strides = [1, 1]} : vector<4x32xf32> to vector<1x32xf32>
    %71 = vector.extract_strided_slice %68 {offsets = [1, 0], sizes = [1, 32], strides = [1, 1]} : vector<4x32xf32> to vector<1x32xf32>
    %cst_31 = arith.constant dense<0.000000e+00> : vector<16xf32>
    %72 = vector.multi_reduction <add>, %69, %cst_31 [1] : vector<16x32xf32> to vector<16xf32>
    %73 = vector.shape_cast %72 : vector<16xf32> to vector<16x1xf32>
    %cst_32 = arith.constant 3.200000e+01 : f32
    %74 = vector.broadcast %cst_32 : f32 to vector<16x1xf32>
    %75 = arith.divf %73, %74 : vector<16x1xf32>
    %76 = vector.broadcast %75 : vector<16x1xf32> to vector<16x32xf32>
    %77 = arith.subf %69, %76 : vector<16x32xf32>
    %78 = arith.mulf %77, %77 : vector<16x32xf32>
    %cst_33 = arith.constant dense<0.000000e+00> : vector<16xf32>
    %79 = vector.multi_reduction <add>, %78, %cst_33 [1] : vector<16x32xf32> to vector<16xf32>
    %80 = vector.shape_cast %79 : vector<16xf32> to vector<16x1xf32>
    %cst_34 = arith.constant 3.200000e+01 : f32
    %81 = vector.broadcast %cst_34 : f32 to vector<16x1xf32>
    %82 = arith.divf %80, %81 : vector<16x1xf32>
    %83 = vector.broadcast %75 : vector<16x1xf32> to vector<16x32xf32>
    %84 = arith.subf %69, %83 : vector<16x32xf32>
    %cst_35 = arith.constant 9.99999974E-6 : f32
    %85 = vector.broadcast %cst_35 : f32 to vector<16x1xf32>
    %86 = arith.addf %82, %85 : vector<16x1xf32>
    %87 = math.rsqrt %86 : vector<16x1xf32>
    %88 = vector.broadcast %87 : vector<16x1xf32> to vector<16x32xf32>
    %89 = arith.mulf %84, %88 : vector<16x32xf32>
    %90 = vector.broadcast %70 : vector<1x32xf32> to vector<16x32xf32>
    %91 = arith.mulf %89, %90 : vector<16x32xf32>
    %92 = vector.broadcast %71 : vector<1x32xf32> to vector<16x32xf32>
    %93 = arith.addf %91, %92 : vector<16x32xf32>
    %94 = arith.truncf %93 : vector<16x32xf32> to vector<16x32xbf16>
    %c0_36 = arith.constant 0 : index
    %c0_37 = arith.constant 0 : index
    %95 = vector.load %arg8[%c0_36, %c0_37] : memref<32x64xbf16, #tpu.memory_space<vmem>>, vector<32x64xbf16>
    %cst_38 = arith.constant dense<0.000000e+00> : vector<16x64xf32>
    %96 = tpu.matmul %94, %95, %cst_38 {dimension_numbers = #tpu.dot_dimension_numbers<[1], [0], [0], [1], [0, 0, 1, 1], [], []>} : vector<16x32xbf16>, vector<32x64xbf16>, vector<16x64xf32> -> vector<16x64xf32>
    %c0_39 = arith.constant 0 : index
    %c0_40 = arith.constant 0 : index
    %97 = vector.load %arg9[%c0_39, %c0_40] : memref<1x64xf32, #tpu.memory_space<vmem>>, vector<1x64xf32>
    %98 = vector.broadcast %97 : vector<1x64xf32> to vector<16x64xf32>
    %99 = arith.addf %96, %98 : vector<16x64xf32>
    %cst_41 = arith.constant 0.000000e+00 : f32
    %100 = vector.broadcast %cst_41 : f32 to vector<16x64xf32>
    %101 = arith.maximumf %99, %100 : vector<16x64xf32>
    %102 = arith.truncf %101 : vector<16x64xf32> to vector<16x64xbf16>
    %c0_42 = arith.constant 0 : index
    %c0_43 = arith.constant 0 : index
    %103 = vector.load %arg10[%c0_42, %c0_43] : memref<64x32xbf16, #tpu.memory_space<vmem>>, vector<64x32xbf16>
    %cst_44 = arith.constant dense<0.000000e+00> : vector<16x32xf32>
    %104 = tpu.matmul %102, %103, %cst_44 {dimension_numbers = #tpu.dot_dimension_numbers<[1], [0], [0], [1], [0, 0, 1, 1], [], []>} : vector<16x64xbf16>, vector<64x32xbf16>, vector<16x32xf32> -> vector<16x32xf32>
    %c0_45 = arith.constant 0 : index
    %c0_46 = arith.constant 0 : index
    %105 = vector.load %arg11[%c0_45, %c0_46] : memref<1x32xf32, #tpu.memory_space<vmem>>, vector<1x32xf32>
    %106 = vector.broadcast %105 : vector<1x32xf32> to vector<16x32xf32>
    %107 = arith.addf %104, %106 : vector<16x32xf32>
    %108 = arith.addf %93, %107 : vector<16x32xf32>
    %109 = vector.extract_strided_slice %68 {offsets = [2, 0], sizes = [1, 32], strides = [1, 1]} : vector<4x32xf32> to vector<1x32xf32>
    %110 = vector.extract_strided_slice %68 {offsets = [3, 0], sizes = [1, 32], strides = [1, 1]} : vector<4x32xf32> to vector<1x32xf32>
    %cst_47 = arith.constant dense<0.000000e+00> : vector<16xf32>
    %111 = vector.multi_reduction <add>, %108, %cst_47 [1] : vector<16x32xf32> to vector<16xf32>
    %112 = vector.shape_cast %111 : vector<16xf32> to vector<16x1xf32>
    %cst_48 = arith.constant 3.200000e+01 : f32
    %113 = vector.broadcast %cst_48 : f32 to vector<16x1xf32>
    %114 = arith.divf %112, %113 : vector<16x1xf32>
    %115 = vector.broadcast %114 : vector<16x1xf32> to vector<16x32xf32>
    %116 = arith.subf %108, %115 : vector<16x32xf32>
    %117 = arith.mulf %116, %116 : vector<16x32xf32>
    %cst_49 = arith.constant dense<0.000000e+00> : vector<16xf32>
    %118 = vector.multi_reduction <add>, %117, %cst_49 [1] : vector<16x32xf32> to vector<16xf32>
    %119 = vector.shape_cast %118 : vector<16xf32> to vector<16x1xf32>
    %cst_50 = arith.constant 3.200000e+01 : f32
    %120 = vector.broadcast %cst_50 : f32 to vector<16x1xf32>
    %121 = arith.divf %119, %120 : vector<16x1xf32>
    %122 = vector.broadcast %114 : vector<16x1xf32> to vector<16x32xf32>
    %123 = arith.subf %108, %122 : vector<16x32xf32>
    %cst_51 = arith.constant 9.99999974E-6 : f32
    %124 = vector.broadcast %cst_51 : f32 to vector<16x1xf32>
    %125 = arith.addf %121, %124 : vector<16x1xf32>
    %126 = math.rsqrt %125 : vector<16x1xf32>
    %127 = vector.broadcast %126 : vector<16x1xf32> to vector<16x32xf32>
    %128 = arith.mulf %123, %127 : vector<16x32xf32>
    %129 = vector.broadcast %109 : vector<1x32xf32> to vector<16x32xf32>
    %130 = arith.mulf %128, %129 : vector<16x32xf32>
    %131 = vector.broadcast %110 : vector<1x32xf32> to vector<16x32xf32>
    %132 = arith.addf %130, %131 : vector<16x32xf32>
    %133 = vector.shape_cast %132 : vector<16x32xf32> to vector<2x8x32xf32>
    %134 = vector.broadcast %2 : vector<2x8x1xf32> to vector<2x8x32xf32>
    %135 = arith.mulf %133, %134 : vector<2x8x32xf32>
    %c0_52 = arith.constant 0 : index
    %c0_53 = arith.constant 0 : index
    %c0_54 = arith.constant 0 : index
    %136 = vector.load %arg13[%c0_52, %c0_53, %c0_54] : memref<2x8x32xf32, #tpu.memory_space<vmem>>, vector<2x8x32xf32>
    tpu.vector_store %arg13[%c0_52, %c0_53, %c0_54], %135 {strides = array<i32>} : memref<2x8x32xf32, #tpu.memory_space<vmem>>, vector<2x8x32xf32>,
    return
  }
  func.func @transform_0(%arg0: i32) -> (i32, i32, i32) {
    %c0_i32 = arith.constant 0 : i32
    %c0_i32_0 = arith.constant 0 : i32
    %c0_i32_1 = arith.constant 0 : i32
    %c0_i32_2 = arith.constant 0 : i32
    return %c0_i32, %c0_i32_0, %c0_i32_1 : i32, i32, i32
  }
  func.func @transform_1(%arg0: i32) -> (i32, i32, i32) {
    %c0_i32 = arith.constant 0 : i32
    %c0_i32_0 = arith.constant 0 : i32
    %c0_i32_1 = arith.constant 0 : i32
    %c0_i32_2 = arith.constant 0 : i32
    return %c0_i32, %c0_i32_0, %c0_i32_1 : i32, i32, i32
  }
  func.func @transform_2(%arg0: i32) -> (i32, i32, i32) {
    %c0_i32 = arith.constant 0 : i32
    %c0_i32_0 = arith.constant 0 : i32
    %c0_i32_1 = arith.constant 0 : i32
    %c0_i32_2 = arith.constant 0 : i32
    return %c0_i32, %c0_i32_0, %c0_i32_1 : i32, i32, i32
  }
  func.func @transform_3(%arg0: i32) -> (i32, i32) {
    %c0_i32 = arith.constant 0 : i32
    %c0_i32_0 = arith.constant 0 : i32
    %c0_i32_1 = arith.constant 0 : i32
    return %c0_i32, %c0_i32_0 : i32, i32
  }
  func.func @transform_4(%arg0: i32) -> (i32, i32) {
    %c0_i32 = arith.constant 0 : i32
    %c0_i32_0 = arith.constant 0 : i32
    %c0_i32_1 = arith.constant 0 : i32
    return %c0_i32, %c0_i32_0 : i32, i32
  }
  func.func @transform_5(%arg0: i32) -> (i32, i32) {
    %c0_i32 = arith.constant 0 : i32
    %c0_i32_0 = arith.constant 0 : i32
    %c0_i32_1 = arith.constant 0 : i32
    return %c0_i32, %c0_i32_0 : i32, i32
  }
  func.func @transform_6(%arg0: i32) -> (i32, i32) {
    %c0_i32 = arith.constant 0 : i32
    %c0_i32_0 = arith.constant 0 : i32
    %c0_i32_1 = arith.constant 0 : i32
    return %c0_i32, %c0_i32_0 : i32, i32
  }
  func.func @transform_7(%arg0: i32) -> (i32, i32) {
    %c0_i32 = arith.constant 0 : i32
    %c0_i32_0 = arith.constant 0 : i32
    %c0_i32_1 = arith.constant 0 : i32
    return %c0_i32, %c0_i32_0 : i32, i32
  }
  func.func @transform_8(%arg0: i32) -> (i32, i32) {
    %c0_i32 = arith.constant 0 : i32
    %c0_i32_0 = arith.constant 0 : i32
    %c0_i32_1 = arith.constant 0 : i32
    return %c0_i32, %c0_i32_0 : i32, i32
  }
  func.func @transform_9(%arg0: i32) -> (i32, i32) {
    %c0_i32 = arith.constant 0 : i32
    %c0_i32_0 = arith.constant 0 : i32
    %c0_i32_1 = arith.constant 0 : i32
    return %c0_i32, %c0_i32_0 : i32, i32
  }
  func.func @transform_10(%arg0: i32) -> (i32, i32) {
    %c0_i32 = arith.constant 0 : i32
    %c0_i32_0 = arith.constant 0 : i32
    %c0_i32_1 = arith.constant 0 : i32
    return %c0_i32, %c0_i32_0 : i32, i32
  }
  func.func @transform_11(%arg0: i32) -> (i32, i32) {
    %c0_i32 = arith.constant 0 : i32
    %c0_i32_0 = arith.constant 0 : i32
    %c0_i32_1 = arith.constant 0 : i32
    return %c0_i32, %c0_i32_0 : i32, i32
  }
  func.func @transform_12(%arg0: i32) -> (i32, i32, i32) {
    %c0_i32 = arith.constant 0 : i32
    %c0_i32_0 = arith.constant 0 : i32
    %c0_i32_1 = arith.constant 0 : i32
    %c0_i32_2 = arith.constant 0 : i32
    return %c0_i32, %c0_i32_0, %c0_i32_1 : i32, i32, i32
  }
}

module attributes {stable_mosaic.version = 11 : i64} {
  func.func @_expand_flow_kernel(%arg0: i32, %arg1: memref<1x32x8xf32, #tpu.memory_space<vmem>>, %arg2: memref<1x8x32xf32, #tpu.memory_space<vmem>>, %arg3: memref<1x8x32xf32, #tpu.memory_space<vmem>>, %arg4: memref<1x32x32xf32, #tpu.memory_space<vmem>>, %arg5: memref<1x32x1xf32, #tpu.memory_space<vmem>>, %arg6: memref<3x16x32xbf16, #tpu.memory_space<vmem>>, %arg7: memref<1x32xf32, #tpu.memory_space<vmem>>, %arg8: memref<3x32x16xbf16, #tpu.memory_space<vmem>>, %arg9: memref<1x16xf32, #tpu.memory_space<vmem>>, %arg10: memref<1x32x32xf32, #tpu.memory_space<vmem>>) attributes {dimension_semantics = [#tpu.dimension_semantics<parallel>], iteration_bounds = array<i64: 2>, scalar_prefetch = 0 : i64, scratch_operands = 0 : i64, tpu.core_type = #tpu.core_type<tc>, window_params = [{transform_indices = @transform_0, window_bounds = array<i64: 1, 32, 8>}, {transform_indices = @transform_1, window_bounds = array<i64: 1, 8, 32>}, {transform_indices = @transform_2, window_bounds = array<i64: 1, 8, 32>}, {transform_indices = @transform_3, window_bounds = array<i64: 1, 32, 32>}, {transform_indices = @transform_4, window_bounds = array<i64: 1, 32, 1>}, {pipeline_mode = #tpu.pipeline_mode<synchronous>, transform_indices = @transform_5, window_bounds = array<i64: 3, 16, 32>}, {pipeline_mode = #tpu.pipeline_mode<synchronous>, transform_indices = @transform_6, window_bounds = array<i64: 1, 32>}, {pipeline_mode = #tpu.pipeline_mode<synchronous>, transform_indices = @transform_7, window_bounds = array<i64: 3, 32, 16>}, {pipeline_mode = #tpu.pipeline_mode<synchronous>, transform_indices = @transform_8, window_bounds = array<i64: 1, 16>}, {transform_indices = @transform_9, window_bounds = array<i64: 1, 32, 32>}]} {
    %c0 = arith.constant 0 : index
    %c0_0 = arith.constant 0 : index
    %c0_1 = arith.constant 0 : index
    %0 = vector.load %arg1[%c0, %c0_0, %c0_1] : memref<1x32x8xf32, #tpu.memory_space<vmem>>, vector<1x32x8xf32>
    %1 = vector.shape_cast %0 : vector<1x32x8xf32> to vector<32x8xf32>
    %c0_2 = arith.constant 0 : index
    %c0_3 = arith.constant 0 : index
    %c0_4 = arith.constant 0 : index
    %2 = vector.load %arg2[%c0_2, %c0_3, %c0_4] : memref<1x8x32xf32, #tpu.memory_space<vmem>>, vector<1x8x32xf32>
    %3 = vector.shape_cast %2 : vector<1x8x32xf32> to vector<8x32xf32>
    %c0_5 = arith.constant 0 : index
    %c0_6 = arith.constant 0 : index
    %c0_7 = arith.constant 0 : index
    %4 = vector.load %arg3[%c0_5, %c0_6, %c0_7] : memref<1x8x32xf32, #tpu.memory_space<vmem>>, vector<1x8x32xf32>
    %5 = vector.shape_cast %4 : vector<1x8x32xf32> to vector<8x32xf32>
    %c0_8 = arith.constant 0 : index
    %c0_9 = arith.constant 0 : index
    %c0_10 = arith.constant 0 : index
    %6 = vector.load %arg4[%c0_8, %c0_9, %c0_10] : memref<1x32x32xf32, #tpu.memory_space<vmem>>, vector<1x32x32xf32>
    %7 = vector.shape_cast %6 : vector<1x32x32xf32> to vector<32x32xf32>
    %c0_11 = arith.constant 0 : index
    %c0_12 = arith.constant 0 : index
    %c0_13 = arith.constant 0 : index
    %8 = vector.load %arg5[%c0_11, %c0_12, %c0_13] : memref<1x32x1xf32, #tpu.memory_space<vmem>>, vector<1x32x1xf32>
    %9 = vector.shape_cast %8 : vector<1x32x1xf32> to vector<32x1xf32>
    %cst = arith.constant dense<0.000000e+00> : vector<32x32xf32>
    %10 = tpu.matmul %1, %3, %cst {dimension_numbers = #tpu.dot_dimension_numbers<[1], [0], [0], [1], [0, 0, 1, 1], [], []>} : vector<32x8xf32>, vector<8x32xf32>, vector<32x32xf32> -> vector<32x32xf32>
    %cst_14 = arith.constant dense<0.000000e+00> : vector<32x32xf32>
    %11 = tpu.matmul %1, %5, %cst_14 {dimension_numbers = #tpu.dot_dimension_numbers<[1], [0], [0], [1], [0, 0, 1, 1], [], []>} : vector<32x8xf32>, vector<8x32xf32>, vector<32x32xf32> -> vector<32x32xf32>
    %12 = math.exp %11 : vector<32x32xf32>
    %13 = arith.mulf %7, %12 : vector<32x32xf32>
    %cst_15 = arith.constant 1.000000e+00 : f32
    %14 = vector.broadcast %cst_15 : f32 to vector<32x32xf32>
    %15 = arith.mulf %13, %14 : vector<32x32xf32>
    %16 = arith.addf %10, %15 : vector<32x32xf32>
    %17 = vector.broadcast %9 : vector<32x1xf32> to vector<32x32xf32>
    %18 = arith.mulf %16, %17 : vector<32x32xf32>
    %19 = vector.extract_strided_slice %18 {offsets = [0, 0], sizes = [32, 16], strides = [1, 1]} : vector<32x32xf32> to vector<32x16xf32>
    %20 = vector.extract_strided_slice %18 {offsets = [0, 16], sizes = [32, 16], strides = [1, 1]} : vector<32x32xf32> to vector<32x16xf32>
    %cst_16 = arith.constant 0.000000e+00 : f32
    %21 = vector.broadcast %cst_16 : f32 to vector<1x16xf32>
    %22 = vector.extract_strided_slice %19 {offsets = [0, 0], sizes = [31, 16], strides = [1, 1]} : vector<32x16xf32> to vector<31x16xf32>
    %23 = tpu.concatenate %21, %22 in 0 : vector<1x16xf32>, vector<31x16xf32> -> vector<32x16xf32>
    %24 = vector.extract_strided_slice %19 {offsets = [1, 0], sizes = [31, 16], strides = [1, 1]} : vector<32x16xf32> to vector<31x16xf32>
    %25 = tpu.concatenate %24, %21 in 0 : vector<31x16xf32>, vector<1x16xf32> -> vector<32x16xf32>
    %26 = arith.truncf %23 : vector<32x16xf32> to vector<32x16xbf16>
    %c0_17 = arith.constant 0 : index
    %c0_18 = arith.constant 0 : index
    %c0_19 = arith.constant 0 : index
    %27 = vector.load %arg6[%c0_17, %c0_18, %c0_19] : memref<3x16x32xbf16, #tpu.memory_space<vmem>>, vector<1x16x32xbf16>
    %28 = vector.shape_cast %27 : vector<1x16x32xbf16> to vector<16x32xbf16>
    %cst_20 = arith.constant dense<0.000000e+00> : vector<32x32xf32>
    %29 = tpu.matmul %26, %28, %cst_20 {dimension_numbers = #tpu.dot_dimension_numbers<[1], [0], [0], [1], [0, 0, 1, 1], [], []>} : vector<32x16xbf16>, vector<16x32xbf16>, vector<32x32xf32> -> vector<32x32xf32>
    %30 = arith.truncf %19 : vector<32x16xf32> to vector<32x16xbf16>
    %c1 = arith.constant 1 : index
    %c0_21 = arith.constant 0 : index
    %c0_22 = arith.constant 0 : index
    %31 = vector.load %arg6[%c1, %c0_21, %c0_22] : memref<3x16x32xbf16, #tpu.memory_space<vmem>>, vector<1x16x32xbf16>
    %32 = vector.shape_cast %31 : vector<1x16x32xbf16> to vector<16x32xbf16>
    %cst_23 = arith.constant dense<0.000000e+00> : vector<32x32xf32>
    %33 = tpu.matmul %30, %32, %cst_23 {dimension_numbers = #tpu.dot_dimension_numbers<[1], [0], [0], [1], [0, 0, 1, 1], [], []>} : vector<32x16xbf16>, vector<16x32xbf16>, vector<32x32xf32> -> vector<32x32xf32>
    %34 = arith.addf %29, %33 : vector<32x32xf32>
    %35 = arith.truncf %25 : vector<32x16xf32> to vector<32x16xbf16>
    %c2 = arith.constant 2 : index
    %c0_24 = arith.constant 0 : index
    %c0_25 = arith.constant 0 : index
    %36 = vector.load %arg6[%c2, %c0_24, %c0_25] : memref<3x16x32xbf16, #tpu.memory_space<vmem>>, vector<1x16x32xbf16>
    %37 = vector.shape_cast %36 : vector<1x16x32xbf16> to vector<16x32xbf16>
    %cst_26 = arith.constant dense<0.000000e+00> : vector<32x32xf32>
    %38 = tpu.matmul %35, %37, %cst_26 {dimension_numbers = #tpu.dot_dimension_numbers<[1], [0], [0], [1], [0, 0, 1, 1], [], []>} : vector<32x16xbf16>, vector<16x32xbf16>, vector<32x32xf32> -> vector<32x32xf32>
    %39 = arith.addf %34, %38 : vector<32x32xf32>
    %c0_27 = arith.constant 0 : index
    %c0_28 = arith.constant 0 : index
    %40 = vector.load %arg7[%c0_27, %c0_28] : memref<1x32xf32, #tpu.memory_space<vmem>>, vector<1x32xf32>
    %41 = vector.broadcast %40 : vector<1x32xf32> to vector<32x32xf32>
    %42 = arith.addf %39, %41 : vector<32x32xf32>
    %cst_29 = arith.constant 0.000000e+00 : f32
    %43 = vector.broadcast %cst_29 : f32 to vector<32x32xf32>
    %44 = arith.maximumf %42, %43 : vector<32x32xf32>
    %cst_30 = arith.constant 0.000000e+00 : f32
    %45 = vector.broadcast %cst_30 : f32 to vector<1x32xf32>
    %46 = vector.extract_strided_slice %44 {offsets = [0, 0], sizes = [31, 32], strides = [1, 1]} : vector<32x32xf32> to vector<31x32xf32>
    %47 = tpu.concatenate %45, %46 in 0 : vector<1x32xf32>, vector<31x32xf32> -> vector<32x32xf32>
    %48 = vector.extract_strided_slice %44 {offsets = [1, 0], sizes = [31, 32], strides = [1, 1]} : vector<32x32xf32> to vector<31x32xf32>
    %49 = tpu.concatenate %48, %45 in 0 : vector<31x32xf32>, vector<1x32xf32> -> vector<32x32xf32>
    %50 = arith.truncf %47 : vector<32x32xf32> to vector<32x32xbf16>
    %c0_31 = arith.constant 0 : index
    %c0_32 = arith.constant 0 : index
    %c0_33 = arith.constant 0 : index
    %51 = vector.load %arg8[%c0_31, %c0_32, %c0_33] : memref<3x32x16xbf16, #tpu.memory_space<vmem>>, vector<1x32x16xbf16>
    %52 = vector.shape_cast %51 : vector<1x32x16xbf16> to vector<32x16xbf16>
    %cst_34 = arith.constant dense<0.000000e+00> : vector<32x16xf32>
    %53 = tpu.matmul %50, %52, %cst_34 {dimension_numbers = #tpu.dot_dimension_numbers<[1], [0], [0], [1], [0, 0, 1, 1], [], []>} : vector<32x32xbf16>, vector<32x16xbf16>, vector<32x16xf32> -> vector<32x16xf32>
    %54 = arith.truncf %44 : vector<32x32xf32> to vector<32x32xbf16>
    %c1_35 = arith.constant 1 : index
    %c0_36 = arith.constant 0 : index
    %c0_37 = arith.constant 0 : index
    %55 = vector.load %arg8[%c1_35, %c0_36, %c0_37] : memref<3x32x16xbf16, #tpu.memory_space<vmem>>, vector<1x32x16xbf16>
    %56 = vector.shape_cast %55 : vector<1x32x16xbf16> to vector<32x16xbf16>
    %cst_38 = arith.constant dense<0.000000e+00> : vector<32x16xf32>
    %57 = tpu.matmul %54, %56, %cst_38 {dimension_numbers = #tpu.dot_dimension_numbers<[1], [0], [0], [1], [0, 0, 1, 1], [], []>} : vector<32x32xbf16>, vector<32x16xbf16>, vector<32x16xf32> -> vector<32x16xf32>
    %58 = arith.addf %53, %57 : vector<32x16xf32>
    %59 = arith.truncf %49 : vector<32x32xf32> to vector<32x32xbf16>
    %c2_39 = arith.constant 2 : index
    %c0_40 = arith.constant 0 : index
    %c0_41 = arith.constant 0 : index
    %60 = vector.load %arg8[%c2_39, %c0_40, %c0_41] : memref<3x32x16xbf16, #tpu.memory_space<vmem>>, vector<1x32x16xbf16>
    %61 = vector.shape_cast %60 : vector<1x32x16xbf16> to vector<32x16xbf16>
    %cst_42 = arith.constant dense<0.000000e+00> : vector<32x16xf32>
    %62 = tpu.matmul %59, %61, %cst_42 {dimension_numbers = #tpu.dot_dimension_numbers<[1], [0], [0], [1], [0, 0, 1, 1], [], []>} : vector<32x32xbf16>, vector<32x16xbf16>, vector<32x16xf32> -> vector<32x16xf32>
    %63 = arith.addf %58, %62 : vector<32x16xf32>
    %c0_43 = arith.constant 0 : index
    %c0_44 = arith.constant 0 : index
    %64 = vector.load %arg9[%c0_43, %c0_44] : memref<1x16xf32, #tpu.memory_space<vmem>>, vector<1x16xf32>
    %65 = vector.broadcast %64 : vector<1x16xf32> to vector<32x16xf32>
    %66 = arith.addf %63, %65 : vector<32x16xf32>
    %67 = arith.subf %20, %66 : vector<32x16xf32>
    %68 = vector.broadcast %9 : vector<32x1xf32> to vector<32x16xf32>
    %69 = arith.mulf %67, %68 : vector<32x16xf32>
    %70 = tpu.concatenate %19, %69 in 1 : vector<32x16xf32>, vector<32x16xf32> -> vector<32x32xf32>
    %71 = vector.broadcast %9 : vector<32x1xf32> to vector<32x32xf32>
    %72 = arith.mulf %70, %71 : vector<32x32xf32>
    %c0_45 = arith.constant 0 : index
    %c0_46 = arith.constant 0 : index
    %c0_47 = arith.constant 0 : index
    %73 = vector.load %arg10[%c0_45, %c0_46, %c0_47] : memref<1x32x32xf32, #tpu.memory_space<vmem>>, vector<1x32x32xf32>
    %74 = vector.shape_cast %73 : vector<1x32x32xf32> to vector<32x32xf32>
    %75 = vector.shape_cast %72 : vector<32x32xf32> to vector<1x32x32xf32>
    tpu.vector_store %arg10[%c0_45, %c0_46, %c0_47], %75 {strides = array<i32>} : memref<1x32x32xf32, #tpu.memory_space<vmem>>, vector<1x32x32xf32>,
    return
  }
  func.func @transform_0(%arg0: i32) -> (i32, i32, i32) {
    %c0_i32 = arith.constant 0 : i32
    %c0_i32_0 = arith.constant 0 : i32
    %c0_i32_1 = arith.constant 0 : i32
    return %arg0, %c0_i32, %c0_i32_0 : i32, i32, i32
  }
  func.func @transform_1(%arg0: i32) -> (i32, i32, i32) {
    %c0_i32 = arith.constant 0 : i32
    %c0_i32_0 = arith.constant 0 : i32
    %c0_i32_1 = arith.constant 0 : i32
    return %arg0, %c0_i32, %c0_i32_0 : i32, i32, i32
  }
  func.func @transform_2(%arg0: i32) -> (i32, i32, i32) {
    %c0_i32 = arith.constant 0 : i32
    %c0_i32_0 = arith.constant 0 : i32
    %c0_i32_1 = arith.constant 0 : i32
    return %arg0, %c0_i32, %c0_i32_0 : i32, i32, i32
  }
  func.func @transform_3(%arg0: i32) -> (i32, i32, i32) {
    %c0_i32 = arith.constant 0 : i32
    %c0_i32_0 = arith.constant 0 : i32
    %c0_i32_1 = arith.constant 0 : i32
    return %arg0, %c0_i32, %c0_i32_0 : i32, i32, i32
  }
  func.func @transform_4(%arg0: i32) -> (i32, i32, i32) {
    %c0_i32 = arith.constant 0 : i32
    %c0_i32_0 = arith.constant 0 : i32
    %c0_i32_1 = arith.constant 0 : i32
    return %arg0, %c0_i32, %c0_i32_0 : i32, i32, i32
  }
  func.func @transform_5(%arg0: i32) -> (i32, i32, i32) {
    %c0_i32 = arith.constant 0 : i32
    %c0_i32_0 = arith.constant 0 : i32
    %c0_i32_1 = arith.constant 0 : i32
    %c0_i32_2 = arith.constant 0 : i32
    return %c0_i32, %c0_i32_0, %c0_i32_1 : i32, i32, i32
  }
  func.func @transform_6(%arg0: i32) -> (i32, i32) {
    %c0_i32 = arith.constant 0 : i32
    %c0_i32_0 = arith.constant 0 : i32
    %c0_i32_1 = arith.constant 0 : i32
    return %c0_i32, %c0_i32_0 : i32, i32
  }
  func.func @transform_7(%arg0: i32) -> (i32, i32, i32) {
    %c0_i32 = arith.constant 0 : i32
    %c0_i32_0 = arith.constant 0 : i32
    %c0_i32_1 = arith.constant 0 : i32
    %c0_i32_2 = arith.constant 0 : i32
    return %c0_i32, %c0_i32_0, %c0_i32_1 : i32, i32, i32
  }
  func.func @transform_8(%arg0: i32) -> (i32, i32) {
    %c0_i32 = arith.constant 0 : i32
    %c0_i32_0 = arith.constant 0 : i32
    %c0_i32_1 = arith.constant 0 : i32
    return %c0_i32, %c0_i32_0 : i32, i32
  }
  func.func @transform_9(%arg0: i32) -> (i32, i32, i32) {
    %c0_i32 = arith.constant 0 : i32
    %c0_i32_0 = arith.constant 0 : i32
    %c0_i32_1 = arith.constant 0 : i32
    return %arg0, %c0_i32, %c0_i32_0 : i32, i32, i32
  }
}

module attributes {stable_mosaic.version = 11 : i64} {
  func.func @_decoder_kernel(%arg0: i32, %arg1: memref<1x32x32xf32, #tpu.memory_space<vmem>>, %arg2: memref<3x32x32xbf16, #tpu.memory_space<vmem>>, %arg3: memref<1x32xf32, #tpu.memory_space<vmem>>, %arg4: memref<3x32x16xbf16, #tpu.memory_space<vmem>>, %arg5: memref<1x16xf32, #tpu.memory_space<vmem>>, %arg6: memref<3x16x8xbf16, #tpu.memory_space<vmem>>, %arg7: memref<1x8xf32, #tpu.memory_space<vmem>>, %arg8: memref<3x1x8xf32, #tpu.memory_space<vmem>>, %arg9: memref<1x1xf32, #tpu.memory_space<vmem>>, %arg10: memref<1x1x128xf32, #tpu.memory_space<vmem>>) attributes {dimension_semantics = [#tpu.dimension_semantics<parallel>], iteration_bounds = array<i64: 2>, scalar_prefetch = 0 : i64, scratch_operands = 0 : i64, tpu.core_type = #tpu.core_type<tc>, window_params = [{transform_indices = @transform_0, window_bounds = array<i64: 1, 32, 32>}, {pipeline_mode = #tpu.pipeline_mode<synchronous>, transform_indices = @transform_1, window_bounds = array<i64: 3, 32, 32>}, {pipeline_mode = #tpu.pipeline_mode<synchronous>, transform_indices = @transform_2, window_bounds = array<i64: 1, 32>}, {pipeline_mode = #tpu.pipeline_mode<synchronous>, transform_indices = @transform_3, window_bounds = array<i64: 3, 32, 16>}, {pipeline_mode = #tpu.pipeline_mode<synchronous>, transform_indices = @transform_4, window_bounds = array<i64: 1, 16>}, {pipeline_mode = #tpu.pipeline_mode<synchronous>, transform_indices = @transform_5, window_bounds = array<i64: 3, 16, 8>}, {pipeline_mode = #tpu.pipeline_mode<synchronous>, transform_indices = @transform_6, window_bounds = array<i64: 1, 8>}, {pipeline_mode = #tpu.pipeline_mode<synchronous>, transform_indices = @transform_7, window_bounds = array<i64: 3, 1, 8>}, {pipeline_mode = #tpu.pipeline_mode<synchronous>, transform_indices = @transform_8, window_bounds = array<i64: 1, 1>}, {transform_indices = @transform_9, window_bounds = array<i64: 1, 1, 128>}]} {
    %c0 = arith.constant 0 : index
    %c0_0 = arith.constant 0 : index
    %c0_1 = arith.constant 0 : index
    %0 = vector.load %arg1[%c0, %c0_0, %c0_1] : memref<1x32x32xf32, #tpu.memory_space<vmem>>, vector<1x32x32xf32>
    %1 = vector.shape_cast %0 : vector<1x32x32xf32> to vector<32x32xf32>
    %cst = arith.constant 0.000000e+00 : f32
    %2 = vector.broadcast %cst : f32 to vector<1x32xf32>
    %3 = vector.extract_strided_slice %1 {offsets = [0, 0], sizes = [31, 32], strides = [1, 1]} : vector<32x32xf32> to vector<31x32xf32>
    %4 = tpu.concatenate %2, %3 in 0 : vector<1x32xf32>, vector<31x32xf32> -> vector<32x32xf32>
    %5 = vector.extract_strided_slice %1 {offsets = [1, 0], sizes = [31, 32], strides = [1, 1]} : vector<32x32xf32> to vector<31x32xf32>
    %6 = tpu.concatenate %5, %2 in 0 : vector<31x32xf32>, vector<1x32xf32> -> vector<32x32xf32>
    %7 = arith.truncf %4 : vector<32x32xf32> to vector<32x32xbf16>
    %c0_2 = arith.constant 0 : index
    %c0_3 = arith.constant 0 : index
    %c0_4 = arith.constant 0 : index
    %8 = vector.load %arg2[%c0_2, %c0_3, %c0_4] : memref<3x32x32xbf16, #tpu.memory_space<vmem>>, vector<1x32x32xbf16>
    %9 = vector.shape_cast %8 : vector<1x32x32xbf16> to vector<32x32xbf16>
    %cst_5 = arith.constant dense<0.000000e+00> : vector<32x32xf32>
    %10 = tpu.matmul %7, %9, %cst_5 {dimension_numbers = #tpu.dot_dimension_numbers<[1], [0], [0], [1], [0, 0, 1, 1], [], []>} : vector<32x32xbf16>, vector<32x32xbf16>, vector<32x32xf32> -> vector<32x32xf32>
    %11 = arith.truncf %1 : vector<32x32xf32> to vector<32x32xbf16>
    %c1 = arith.constant 1 : index
    %c0_6 = arith.constant 0 : index
    %c0_7 = arith.constant 0 : index
    %12 = vector.load %arg2[%c1, %c0_6, %c0_7] : memref<3x32x32xbf16, #tpu.memory_space<vmem>>, vector<1x32x32xbf16>
    %13 = vector.shape_cast %12 : vector<1x32x32xbf16> to vector<32x32xbf16>
    %cst_8 = arith.constant dense<0.000000e+00> : vector<32x32xf32>
    %14 = tpu.matmul %11, %13, %cst_8 {dimension_numbers = #tpu.dot_dimension_numbers<[1], [0], [0], [1], [0, 0, 1, 1], [], []>} : vector<32x32xbf16>, vector<32x32xbf16>, vector<32x32xf32> -> vector<32x32xf32>
    %15 = arith.addf %10, %14 : vector<32x32xf32>
    %16 = arith.truncf %6 : vector<32x32xf32> to vector<32x32xbf16>
    %c2 = arith.constant 2 : index
    %c0_9 = arith.constant 0 : index
    %c0_10 = arith.constant 0 : index
    %17 = vector.load %arg2[%c2, %c0_9, %c0_10] : memref<3x32x32xbf16, #tpu.memory_space<vmem>>, vector<1x32x32xbf16>
    %18 = vector.shape_cast %17 : vector<1x32x32xbf16> to vector<32x32xbf16>
    %cst_11 = arith.constant dense<0.000000e+00> : vector<32x32xf32>
    %19 = tpu.matmul %16, %18, %cst_11 {dimension_numbers = #tpu.dot_dimension_numbers<[1], [0], [0], [1], [0, 0, 1, 1], [], []>} : vector<32x32xbf16>, vector<32x32xbf16>, vector<32x32xf32> -> vector<32x32xf32>
    %20 = arith.addf %15, %19 : vector<32x32xf32>
    %c0_12 = arith.constant 0 : index
    %c0_13 = arith.constant 0 : index
    %21 = vector.load %arg3[%c0_12, %c0_13] : memref<1x32xf32, #tpu.memory_space<vmem>>, vector<1x32xf32>
    %22 = vector.broadcast %21 : vector<1x32xf32> to vector<32x32xf32>
    %23 = arith.addf %20, %22 : vector<32x32xf32>
    %cst_14 = arith.constant 0.000000e+00 : f32
    %24 = vector.broadcast %cst_14 : f32 to vector<32x32xf32>
    %25 = arith.cmpf oge, %23, %24 : vector<32x32xf32>
    %cst_15 = arith.constant 1.000000e-01 : f32
    %26 = vector.broadcast %cst_15 : f32 to vector<32x32xf32>
    %27 = arith.mulf %26, %23 : vector<32x32xf32>
    %28 = arith.select %25, %23, %27 : vector<32x32xi1>, vector<32x32xf32>
    %29 = tpu.iota {dimensions = array<i32: 0>} : vector<64x32xi32>
    %30 = tpu.iota {dimensions = array<i32: 1>} : vector<64x32xi32>
    %c2_i32 = arith.constant 2 : i32
    %31 = vector.broadcast %c2_i32 : i32 to vector<64x32xi32>
    %32 = arith.muli %31, %30 : vector<64x32xi32>
    %33 = arith.cmpi eq, %29, %32 : vector<64x32xi32>
    %c2_i32_16 = arith.constant 2 : i32
    %34 = vector.broadcast %c2_i32_16 : i32 to vector<64x32xi32>
    %35 = arith.muli %34, %30 : vector<64x32xi32>
    %c1_i32 = arith.constant 1 : i32
    %36 = vector.broadcast %c1_i32 : i32 to vector<64x32xi32>
    %37 = arith.addi %35, %36 : vector<64x32xi32>
    %38 = arith.cmpi eq, %29, %37 : vector<64x32xi32>
    %39 = arith.ori %33, %38 : vector<64x32xi1>
    %40 = arith.extui %39 : vector<64x32xi1> to vector<64x32xi32>
    %41 = arith.sitofp %40 : vector<64x32xi32> to vector<64x32xf32>
    %cst_17 = arith.constant dense<0.000000e+00> : vector<64x32xf32>
    %42 = tpu.matmul %41, %28, %cst_17 {dimension_numbers = #tpu.dot_dimension_numbers<[1], [0], [0], [1], [0, 0, 1, 1], [], []>} : vector<64x32xf32>, vector<32x32xf32>, vector<64x32xf32> -> vector<64x32xf32>
    %cst_18 = arith.constant 0.000000e+00 : f32
    %43 = vector.broadcast %cst_18 : f32 to vector<1x32xf32>
    %44 = vector.extract_strided_slice %42 {offsets = [0, 0], sizes = [63, 32], strides = [1, 1]} : vector<64x32xf32> to vector<63x32xf32>
    %45 = tpu.concatenate %43, %44 in 0 : vector<1x32xf32>, vector<63x32xf32> -> vector<64x32xf32>
    %46 = vector.extract_strided_slice %42 {offsets = [1, 0], sizes = [63, 32], strides = [1, 1]} : vector<64x32xf32> to vector<63x32xf32>
    %47 = tpu.concatenate %46, %43 in 0 : vector<63x32xf32>, vector<1x32xf32> -> vector<64x32xf32>
    %48 = arith.truncf %45 : vector<64x32xf32> to vector<64x32xbf16>
    %c0_19 = arith.constant 0 : index
    %c0_20 = arith.constant 0 : index
    %c0_21 = arith.constant 0 : index
    %49 = vector.load %arg4[%c0_19, %c0_20, %c0_21] : memref<3x32x16xbf16, #tpu.memory_space<vmem>>, vector<1x32x16xbf16>
    %50 = vector.shape_cast %49 : vector<1x32x16xbf16> to vector<32x16xbf16>
    %cst_22 = arith.constant dense<0.000000e+00> : vector<64x16xf32>
    %51 = tpu.matmul %48, %50, %cst_22 {dimension_numbers = #tpu.dot_dimension_numbers<[1], [0], [0], [1], [0, 0, 1, 1], [], []>} : vector<64x32xbf16>, vector<32x16xbf16>, vector<64x16xf32> -> vector<64x16xf32>
    %52 = arith.truncf %42 : vector<64x32xf32> to vector<64x32xbf16>
    %c1_23 = arith.constant 1 : index
    %c0_24 = arith.constant 0 : index
    %c0_25 = arith.constant 0 : index
    %53 = vector.load %arg4[%c1_23, %c0_24, %c0_25] : memref<3x32x16xbf16, #tpu.memory_space<vmem>>, vector<1x32x16xbf16>
    %54 = vector.shape_cast %53 : vector<1x32x16xbf16> to vector<32x16xbf16>
    %cst_26 = arith.constant dense<0.000000e+00> : vector<64x16xf32>
    %55 = tpu.matmul %52, %54, %cst_26 {dimension_numbers = #tpu.dot_dimension_numbers<[1], [0], [0], [1], [0, 0, 1, 1], [], []>} : vector<64x32xbf16>, vector<32x16xbf16>, vector<64x16xf32> -> vector<64x16xf32>
    %56 = arith.addf %51, %55 : vector<64x16xf32>
    %57 = arith.truncf %47 : vector<64x32xf32> to vector<64x32xbf16>
    %c2_27 = arith.constant 2 : index
    %c0_28 = arith.constant 0 : index
    %c0_29 = arith.constant 0 : index
    %58 = vector.load %arg4[%c2_27, %c0_28, %c0_29] : memref<3x32x16xbf16, #tpu.memory_space<vmem>>, vector<1x32x16xbf16>
    %59 = vector.shape_cast %58 : vector<1x32x16xbf16> to vector<32x16xbf16>
    %cst_30 = arith.constant dense<0.000000e+00> : vector<64x16xf32>
    %60 = tpu.matmul %57, %59, %cst_30 {dimension_numbers = #tpu.dot_dimension_numbers<[1], [0], [0], [1], [0, 0, 1, 1], [], []>} : vector<64x32xbf16>, vector<32x16xbf16>, vector<64x16xf32> -> vector<64x16xf32>
    %61 = arith.addf %56, %60 : vector<64x16xf32>
    %c0_31 = arith.constant 0 : index
    %c0_32 = arith.constant 0 : index
    %62 = vector.load %arg5[%c0_31, %c0_32] : memref<1x16xf32, #tpu.memory_space<vmem>>, vector<1x16xf32>
    %63 = vector.broadcast %62 : vector<1x16xf32> to vector<64x16xf32>
    %64 = arith.addf %61, %63 : vector<64x16xf32>
    %cst_33 = arith.constant 0.000000e+00 : f32
    %65 = vector.broadcast %cst_33 : f32 to vector<64x16xf32>
    %66 = arith.cmpf oge, %64, %65 : vector<64x16xf32>
    %cst_34 = arith.constant 1.000000e-01 : f32
    %67 = vector.broadcast %cst_34 : f32 to vector<64x16xf32>
    %68 = arith.mulf %67, %64 : vector<64x16xf32>
    %69 = arith.select %66, %64, %68 : vector<64x16xi1>, vector<64x16xf32>
    %70 = tpu.iota {dimensions = array<i32: 0>} : vector<128x64xi32>
    %71 = tpu.iota {dimensions = array<i32: 1>} : vector<128x64xi32>
    %c2_i32_35 = arith.constant 2 : i32
    %72 = vector.broadcast %c2_i32_35 : i32 to vector<128x64xi32>
    %73 = arith.muli %72, %71 : vector<128x64xi32>
    %74 = arith.cmpi eq, %70, %73 : vector<128x64xi32>
    %c2_i32_36 = arith.constant 2 : i32
    %75 = vector.broadcast %c2_i32_36 : i32 to vector<128x64xi32>
    %76 = arith.muli %75, %71 : vector<128x64xi32>
    %c1_i32_37 = arith.constant 1 : i32
    %77 = vector.broadcast %c1_i32_37 : i32 to vector<128x64xi32>
    %78 = arith.addi %76, %77 : vector<128x64xi32>
    %79 = arith.cmpi eq, %70, %78 : vector<128x64xi32>
    %80 = arith.ori %74, %79 : vector<128x64xi1>
    %81 = arith.extui %80 : vector<128x64xi1> to vector<128x64xi32>
    %82 = arith.sitofp %81 : vector<128x64xi32> to vector<128x64xf32>
    %cst_38 = arith.constant dense<0.000000e+00> : vector<128x16xf32>
    %83 = tpu.matmul %82, %69, %cst_38 {dimension_numbers = #tpu.dot_dimension_numbers<[1], [0], [0], [1], [0, 0, 1, 1], [], []>} : vector<128x64xf32>, vector<64x16xf32>, vector<128x16xf32> -> vector<128x16xf32>
    %cst_39 = arith.constant 0.000000e+00 : f32
    %84 = vector.broadcast %cst_39 : f32 to vector<1x16xf32>
    %85 = vector.extract_strided_slice %83 {offsets = [0, 0], sizes = [127, 16], strides = [1, 1]} : vector<128x16xf32> to vector<127x16xf32>
    %86 = tpu.concatenate %84, %85 in 0 : vector<1x16xf32>, vector<127x16xf32> -> vector<128x16xf32>
    %87 = vector.extract_strided_slice %83 {offsets = [1, 0], sizes = [127, 16], strides = [1, 1]} : vector<128x16xf32> to vector<127x16xf32>
    %88 = tpu.concatenate %87, %84 in 0 : vector<127x16xf32>, vector<1x16xf32> -> vector<128x16xf32>
    %89 = arith.truncf %86 : vector<128x16xf32> to vector<128x16xbf16>
    %c0_40 = arith.constant 0 : index
    %c0_41 = arith.constant 0 : index
    %c0_42 = arith.constant 0 : index
    %90 = vector.load %arg6[%c0_40, %c0_41, %c0_42] : memref<3x16x8xbf16, #tpu.memory_space<vmem>>, vector<1x16x8xbf16>
    %91 = vector.shape_cast %90 : vector<1x16x8xbf16> to vector<16x8xbf16>
    %cst_43 = arith.constant dense<0.000000e+00> : vector<128x8xf32>
    %92 = tpu.matmul %89, %91, %cst_43 {dimension_numbers = #tpu.dot_dimension_numbers<[1], [0], [0], [1], [0, 0, 1, 1], [], []>} : vector<128x16xbf16>, vector<16x8xbf16>, vector<128x8xf32> -> vector<128x8xf32>
    %93 = arith.truncf %83 : vector<128x16xf32> to vector<128x16xbf16>
    %c1_44 = arith.constant 1 : index
    %c0_45 = arith.constant 0 : index
    %c0_46 = arith.constant 0 : index
    %94 = vector.load %arg6[%c1_44, %c0_45, %c0_46] : memref<3x16x8xbf16, #tpu.memory_space<vmem>>, vector<1x16x8xbf16>
    %95 = vector.shape_cast %94 : vector<1x16x8xbf16> to vector<16x8xbf16>
    %cst_47 = arith.constant dense<0.000000e+00> : vector<128x8xf32>
    %96 = tpu.matmul %93, %95, %cst_47 {dimension_numbers = #tpu.dot_dimension_numbers<[1], [0], [0], [1], [0, 0, 1, 1], [], []>} : vector<128x16xbf16>, vector<16x8xbf16>, vector<128x8xf32> -> vector<128x8xf32>
    %97 = arith.addf %92, %96 : vector<128x8xf32>
    %98 = arith.truncf %88 : vector<128x16xf32> to vector<128x16xbf16>
    %c2_48 = arith.constant 2 : index
    %c0_49 = arith.constant 0 : index
    %c0_50 = arith.constant 0 : index
    %99 = vector.load %arg6[%c2_48, %c0_49, %c0_50] : memref<3x16x8xbf16, #tpu.memory_space<vmem>>, vector<1x16x8xbf16>
    %100 = vector.shape_cast %99 : vector<1x16x8xbf16> to vector<16x8xbf16>
    %cst_51 = arith.constant dense<0.000000e+00> : vector<128x8xf32>
    %101 = tpu.matmul %98, %100, %cst_51 {dimension_numbers = #tpu.dot_dimension_numbers<[1], [0], [0], [1], [0, 0, 1, 1], [], []>} : vector<128x16xbf16>, vector<16x8xbf16>, vector<128x8xf32> -> vector<128x8xf32>
    %102 = arith.addf %97, %101 : vector<128x8xf32>
    %c0_52 = arith.constant 0 : index
    %c0_53 = arith.constant 0 : index
    %103 = vector.load %arg7[%c0_52, %c0_53] : memref<1x8xf32, #tpu.memory_space<vmem>>, vector<1x8xf32>
    %104 = vector.broadcast %103 : vector<1x8xf32> to vector<128x8xf32>
    %105 = arith.addf %102, %104 : vector<128x8xf32>
    %cst_54 = arith.constant 0.000000e+00 : f32
    %106 = vector.broadcast %cst_54 : f32 to vector<128x8xf32>
    %107 = arith.cmpf oge, %105, %106 : vector<128x8xf32>
    %cst_55 = arith.constant 1.000000e-01 : f32
    %108 = vector.broadcast %cst_55 : f32 to vector<128x8xf32>
    %109 = arith.mulf %108, %105 : vector<128x8xf32>
    %110 = arith.select %107, %105, %109 : vector<128x8xi1>, vector<128x8xf32>
    %cst_56 = arith.constant 0.000000e+00 : f32
    %111 = vector.broadcast %cst_56 : f32 to vector<1x8xf32>
    %112 = vector.extract_strided_slice %110 {offsets = [0, 0], sizes = [127, 8], strides = [1, 1]} : vector<128x8xf32> to vector<127x8xf32>
    %113 = tpu.concatenate %111, %112 in 0 : vector<1x8xf32>, vector<127x8xf32> -> vector<128x8xf32>
    %114 = vector.extract_strided_slice %110 {offsets = [1, 0], sizes = [127, 8], strides = [1, 1]} : vector<128x8xf32> to vector<127x8xf32>
    %115 = tpu.concatenate %114, %111 in 0 : vector<127x8xf32>, vector<1x8xf32> -> vector<128x8xf32>
    %c0_57 = arith.constant 0 : index
    %c0_58 = arith.constant 0 : index
    %c0_59 = arith.constant 0 : index
    %116 = vector.load %arg8[%c0_57, %c0_58, %c0_59] : memref<3x1x8xf32, #tpu.memory_space<vmem>>, vector<3x1x8xf32>
    %117 = vector.extract_strided_slice %116 {offsets = [0, 0, 0], sizes = [1, 1, 8], strides = [1, 1, 1]} : vector<3x1x8xf32> to vector<1x1x8xf32>
    %118 = vector.shape_cast %117 : vector<1x1x8xf32> to vector<1x8xf32>
    %119 = tpu.transpose %113, [1, 0] : vector<128x8xf32> -> vector<8x128xf32>
    %cst_60 = arith.constant dense<0.000000e+00> : vector<1x128xf32>
    %120 = tpu.matmul %118, %119, %cst_60 {dimension_numbers = #tpu.dot_dimension_numbers<[1], [0], [0], [1], [0, 0, 1, 1], [], []>} : vector<1x8xf32>, vector<8x128xf32>, vector<1x128xf32> -> vector<1x128xf32>
    %121 = vector.extract_strided_slice %116 {offsets = [1, 0, 0], sizes = [1, 1, 8], strides = [1, 1, 1]} : vector<3x1x8xf32> to vector<1x1x8xf32>
    %122 = vector.shape_cast %121 : vector<1x1x8xf32> to vector<1x8xf32>
    %123 = tpu.transpose %110, [1, 0] : vector<128x8xf32> -> vector<8x128xf32>
    %cst_61 = arith.constant dense<0.000000e+00> : vector<1x128xf32>
    %124 = tpu.matmul %122, %123, %cst_61 {dimension_numbers = #tpu.dot_dimension_numbers<[1], [0], [0], [1], [0, 0, 1, 1], [], []>} : vector<1x8xf32>, vector<8x128xf32>, vector<1x128xf32> -> vector<1x128xf32>
    %125 = arith.addf %120, %124 : vector<1x128xf32>
    %126 = vector.extract_strided_slice %116 {offsets = [2, 0, 0], sizes = [1, 1, 8], strides = [1, 1, 1]} : vector<3x1x8xf32> to vector<1x1x8xf32>
    %127 = vector.shape_cast %126 : vector<1x1x8xf32> to vector<1x8xf32>
    %128 = tpu.transpose %115, [1, 0] : vector<128x8xf32> -> vector<8x128xf32>
    %cst_62 = arith.constant dense<0.000000e+00> : vector<1x128xf32>
    %129 = tpu.matmul %127, %128, %cst_62 {dimension_numbers = #tpu.dot_dimension_numbers<[1], [0], [0], [1], [0, 0, 1, 1], [], []>} : vector<1x8xf32>, vector<8x128xf32>, vector<1x128xf32> -> vector<1x128xf32>
    %130 = arith.addf %125, %129 : vector<1x128xf32>
    %c0_63 = arith.constant 0 : index
    %c0_64 = arith.constant 0 : index
    %131 = vector.load %arg9[%c0_63, %c0_64] : memref<1x1xf32, #tpu.memory_space<vmem>>, vector<1x1xf32>
    %132 = vector.broadcast %131 : vector<1x1xf32> to vector<1x128xf32>
    %133 = arith.addf %130, %132 : vector<1x128xf32>
    %134 = math.tanh %133 : vector<1x128xf32>
    %c0_65 = arith.constant 0 : index
    %c0_66 = arith.constant 0 : index
    %c0_67 = arith.constant 0 : index
    %135 = vector.load %arg10[%c0_65, %c0_66, %c0_67] : memref<1x1x128xf32, #tpu.memory_space<vmem>>, vector<1x1x128xf32>
    %136 = vector.shape_cast %135 : vector<1x1x128xf32> to vector<1x128xf32>
    %137 = vector.shape_cast %134 : vector<1x128xf32> to vector<1x1x128xf32>
    tpu.vector_store %arg10[%c0_65, %c0_66, %c0_67], %137 {strides = array<i32>} : memref<1x1x128xf32, #tpu.memory_space<vmem>>, vector<1x1x128xf32>,
    return
  }
  func.func @transform_0(%arg0: i32) -> (i32, i32, i32) {
    %c0_i32 = arith.constant 0 : i32
    %c0_i32_0 = arith.constant 0 : i32
    %c0_i32_1 = arith.constant 0 : i32
    return %arg0, %c0_i32, %c0_i32_0 : i32, i32, i32
  }
  func.func @transform_1(%arg0: i32) -> (i32, i32, i32) {
    %c0_i32 = arith.constant 0 : i32
    %c0_i32_0 = arith.constant 0 : i32
    %c0_i32_1 = arith.constant 0 : i32
    %c0_i32_2 = arith.constant 0 : i32
    return %c0_i32, %c0_i32_0, %c0_i32_1 : i32, i32, i32
  }
  func.func @transform_2(%arg0: i32) -> (i32, i32) {
    %c0_i32 = arith.constant 0 : i32
    %c0_i32_0 = arith.constant 0 : i32
    %c0_i32_1 = arith.constant 0 : i32
    return %c0_i32, %c0_i32_0 : i32, i32
  }
  func.func @transform_3(%arg0: i32) -> (i32, i32, i32) {
    %c0_i32 = arith.constant 0 : i32
    %c0_i32_0 = arith.constant 0 : i32
    %c0_i32_1 = arith.constant 0 : i32
    %c0_i32_2 = arith.constant 0 : i32
    return %c0_i32, %c0_i32_0, %c0_i32_1 : i32, i32, i32
  }
  func.func @transform_4(%arg0: i32) -> (i32, i32) {
    %c0_i32 = arith.constant 0 : i32
    %c0_i32_0 = arith.constant 0 : i32
    %c0_i32_1 = arith.constant 0 : i32
    return %c0_i32, %c0_i32_0 : i32, i32
  }
  func.func @transform_5(%arg0: i32) -> (i32, i32, i32) {
    %c0_i32 = arith.constant 0 : i32
    %c0_i32_0 = arith.constant 0 : i32
    %c0_i32_1 = arith.constant 0 : i32
    %c0_i32_2 = arith.constant 0 : i32
    return %c0_i32, %c0_i32_0, %c0_i32_1 : i32, i32, i32
  }
  func.func @transform_6(%arg0: i32) -> (i32, i32) {
    %c0_i32 = arith.constant 0 : i32
    %c0_i32_0 = arith.constant 0 : i32
    %c0_i32_1 = arith.constant 0 : i32
    return %c0_i32, %c0_i32_0 : i32, i32
  }
  func.func @transform_7(%arg0: i32) -> (i32, i32, i32) {
    %c0_i32 = arith.constant 0 : i32
    %c0_i32_0 = arith.constant 0 : i32
    %c0_i32_1 = arith.constant 0 : i32
    %c0_i32_2 = arith.constant 0 : i32
    return %c0_i32, %c0_i32_0, %c0_i32_1 : i32, i32, i32
  }
  func.func @transform_8(%arg0: i32) -> (i32, i32) {
    %c0_i32 = arith.constant 0 : i32
    %c0_i32_0 = arith.constant 0 : i32
    %c0_i32_1 = arith.constant 0 : i32
    return %c0_i32, %c0_i32_0 : i32, i32
  }
  func.func @transform_9(%arg0: i32) -> (i32, i32, i32) {
    %c0_i32 = arith.constant 0 : i32
    %c0_i32_0 = arith.constant 0 : i32
    %c0_i32_1 = arith.constant 0 : i32
    return %arg0, %c0_i32, %c0_i32_0 : i32, i32, i32
  }
}

</mosaic_0001>

<bundles_post_ra>
// kernel: sub.3
= control target key start
LH: loop header
LB: loop body
LE: loop exit
PB: predicated region body
PF: predicated region fallthrough
CT: control target
= control target key end

     0   :  { %s34_s0 = inlined_call_operand.vmem [shape: f32[2,8], index: 0, kind: input, shape index: {}]   ;;  %s35_s1 = inlined_call_operand.vmem [shape: f32[2,8], index: 1, kind: input, shape index: {}]   ;;  %s36_s2 = inlined_call_operand.vmem [shape: f32[2,8], index: 2, kind: output, shape index: {}]  }
   0x1   :  { %v3_v0 = vld [vmem:[%s34_s0] sm:$0x3] }
   0x2   :  { %v4_v1 = vld [vmem:[%s35_s1] sm:$0x3] }
   0x3   :  { %v7_v2 = vsub.f32 %v3_v0, %v4_v1 }
   0x5   :  { %9 = vst [vmem:[%s36_s2] sm:$0x3] %v7_v2 }

// kernel: _lambda_.7
= control target key start
LH: loop header
LB: loop body
LE: loop exit
PB: predicated region body
PF: predicated region fallthrough
CT: control target
= control target key end

     0   :  { %v190_v0 = vmov 0.0   ;;  %vm191_vm0 = vmmov 0   ;;  %s192_s11 = smov 64   ;;  %vm56_vm1 = vcmask 261120   ;;  %v193_v9 = vmov 0   ;;  %s277_s2 = inlined_call_operand.vmem [shape: bf16[32,128], index: 2, kind: input, shape index: {}]   ;;  %s278_s0 = inlined_call_operand.vmem [shape: f32[2,8,32], index: 0, kind: input, shape index: {}]   ;;  %s279_s4 = inlined_call_operand.vmem [shape: f32[1,64], index: 4, kind: input, shape index: {}]   ;;  %s280_s3 = inlined_call_operand.vmem [shape: f32[1,128], index: 3, kind: input, shape index: {}]   ;;  %s281_s5 = inlined_call_operand.<no memory space> [shape: f32[1,1], index: 5, kind: input, shape index: {}]   ;;  %s282_s1 = inlined_call_operand.vmem [shape: f32[2,8,1], index: 1, kind: input, shape index: {}]   ;;  %s283_s7 = inlined_call_operand.vmem [shape: f32[2,8,1], index: 7, kind: output, shape index: {1}]   ;;  %s284_s6 = inlined_call_operand.vmem [shape: f32[2,8,64], index: 6, kind: output, shape index: {0}]  }
   0x1   :  { %174 = vmatprep.subr.bf16.mxu0 %v190_v0  ;;  %v188_v1 = vld [vmem:[%s277_s2 + $0x8] sm:$0xff]   ;;  %178 = vmatprep.mubr.msk.bf16.mxu0 %vm191_vm0, %v190_v0  ;;  %v189_v2 = vld [vmem:[%s277_s2] sm:$0xff]   ;;  %v13_v20 = vstv %s281_s5  ;;  %vm134_vm2 = vcmask 523264   ;;  %vm154_vm3 = vcmask 7168  }
   0x2   :  { %175 = vmatpush3.bf16.msra.mxu0 %v188_v1  ;;  %v28_v3 = vld [vmem:[%s278_s0] sm:$0xff]  ;;  %v29_v4 = vld [vmem:[%s278_s0 + $0x8] sm:$0xff]  ;;  %187 = vset.pattern.permute.xlu1 %v193_v9  ;;  %14 = vst [vmem:[#allocation2] sm:$0x1] %v13_v20 }
   0x3   :  { %v169_v5 = vld [vmem:[%s279_s4] ss:$0 sm:$0xff]  ;;  %176 = vmatprep.subr.bf16.mxu0 %v190_v0  ;;  %v32_v6 = vpack.c.bf16 %v29_v4, %v28_v3  ;;  %186 = vset.pattern.permute.xlu0 %v193_v9  ;;  %v31_v25 = vld [vmem:[%s282_s1 + $0x8] sm:$0xff] }
   0x4   :  { %121 = vrot.lane.b32.xlu0 %v169_v5, %s192_s11  ;;  %v165_v7 = vld [vmem:[%s280_s3] ss:$0 sm:$0xff] }
   0x5   :  { %v30_v26 = vld [vmem:[%s282_s1] sm:$0xff] }
   0x6   :  { %177 = vmatpush3.bf16.msra.mxu0 %v189_v2 }
   0x9   :  { %179 = vmatmul.mubr.msk.bf16.vlgmr.msra.gmra.mxu0 %vm56_vm1, %v32_v6  ;;  %v170_v27 = vld [vmem:[#allocation2] ss:$0 sm:$0xff] }
  0x76   :  { %v122_v12 = vpop.permute.xlu0 %121 }
  0xc9   :  { %v94_v8 = vpop.f32.mrf.mxu0 }
  0xca   :  { %v95_v10 = vadd.f32 %v165_v7, %v94_v8 }
  0xcb   :  { %v180_v11 = vpop.f32.mrf.mxu0 }
  0xcc   :  { %v113_v13 = vmax.f32 %v95_v10, 0.0 }
  0xcd   :  { %v97_v14 = vpop.f32.mrf.mxu0 }
  0xce   :  { %v124_v15 = vmul.f32 %v122_v12, %v113_v13  ;;  %v98_v16 = vadd.f32 %v165_v7, %v97_v14 }
  0xcf   :  { %v181_v17 = vpop.f32.mrf.mxu0 }
  0xd0   :  { %v114_v18 = vmax.f32 %v98_v16, 0.0  ;;  %128 = vrot.lane.b32.xlu0 %v124_v15, %s192_s11 }
  0xd2   :  { %v125_v19 = vmul.f32 %v122_v12, %v114_v18 }
  0xd4   :  { %130 = vrot.lane.b32.xlu1 %v125_v19, %s192_s11 }
 0x142   :  { %v129_v21 = vpop.permute.xlu0 %128 }
 0x143   :  { %v135_v22 = vsel %vm134_vm2, %v129_v21, 0.0 }
 0x144   :  { %136 = vadd.xlane.f32.xlu1 %v135_v22 }
 0x146   :  { %v131_v23 = vpop.permute.xlu1 %130 }
 0x147   :  { %v138_v24 = vsel %vm134_vm2, %v131_v23, 0.0 }
 0x148   :  { %139 = vadd.xlane.f32.xlu0 %v138_v24 }
 0x155   :  { %108 = vperm.xlu1 %187, %v31_v25  }
 0x15e   :  { %103 = vperm.xlu0 %186, %v30_v26  }
 0x1cd   :  { %v137_v28 = vpop.xlane.xlu1 %136 }
 0x1ce   :  { %v148_v29 = vadd.f32 %v170_v27, %v137_v28 }
 0x1d0   :  { %v150_v30 = vmul.f32 %v148_v29, %v30_v26 }
 0x1d1   :  { %v140_v31 = vpop.xlane.xlu0 %139  ;;  %v109_v32 = vpop.permute.xlu1 %108 }
 0x1d2   :  { %155 = vst.msk [vmem:[%s283_s7] sm:$0xff] %vm154_vm3, %v150_v30  ;;  %v149_v33 = vadd.f32 %v170_v27, %v140_v31  ;;  %v112_v34 = vmul.f32 %v109_v32, %v98_v16 }
 0x1d4   :  { %v151_v35 = vmul.f32 %v149_v33, %v31_v25  ;;  %153 = vst.msk [vmem:[%s284_s6 + $0x8] sm:$0xff] %vm134_vm2, %v112_v34 }
 0x1d6   :  { %156 = vst.msk [vmem:[%s283_s7 + $0x8] sm:$0xff] %vm154_vm3, %v151_v35 }
 0x1d9   :  { %v104_v36 = vpop.permute.xlu0 %103 }
 0x1da   :  { %v111_v37 = vmul.f32 %v104_v36, %v95_v10 }
 0x1dc   :  { %152 = vst.msk [vmem:[%s284_s6] sm:$0xff] %vm134_vm2, %v111_v37 }

// kernel: _lambda_.5
= control target key start
LH: loop header
LB: loop body
LE: loop exit
PB: predicated region body
PF: predicated region fallthrough
CT: control target
= control target key end

     0   :  { %v1324_v0 = vmov 0.0   ;;  %vm1325_vm0 = vmmov 0   ;;  %vm72_vm1 = vcmask 261120   ;;  %v1326_v7 = vmov 0   ;;  %s1327_s15 = smov 96   ;;  %s1329_s18 = smov 80   ;;  %s1602_s3 = inlined_call_operand.vmem [shape: bf16[32,96], index: 3, kind: input, shape index: {}]   ;;  %s1603_s0 = inlined_call_operand.vmem [shape: f32[2,8,32], index: 0, kind: input, shape index: {}]   ;;  %s1604_s4 = inlined_call_operand.vmem [shape: f32[1,96], index: 4, kind: input, shape index: {}]   ;;  %s1605_s1 = inlined_call_operand.vmem [shape: f32[2,8,1], index: 1, kind: input, shape index: {}]   ;;  %s1606_s2 = inlined_call_operand.vmem [shape: f32[2,1,8], index: 2, kind: input, shape index: {}]   ;;  %s1607_s5 = inlined_call_operand.vmem [shape: bf16[32,32], index: 5, kind: input, shape index: {}]   ;;  %s1608_s6 = inlined_call_operand.vmem [shape: f32[1,32], index: 6, kind: input, shape index: {}]   ;;  %s1609_s7 = inlined_call_operand.vmem [shape: bf16[32,64], index: 7, kind: input, shape index: {}]   ;;  %s1610_s9 = inlined_call_operand.vmem [shape: bf16[64,32], index: 9, kind: input, shape index: {}]   ;;  %s1611_s11 = inlined_call_operand.vmem [shape: f32[4,32], index: 11, kind: input, shape index: {}]   ;;  %s1612_s8 = inlined_call_operand.vmem [shape: f32[1,64], index: 8, kind: input, shape index: {}]   ;;  %s1613_s10 = inlined_call_operand.vmem [shape: f32[1,32], index: 10, kind: input, shape index: {}]   ;;  %s1614_s12 = inlined_call_operand.vmem [shape: f32[2,8,32], index: 12, kind: output, shape index: {}]  }
   0x1   :  { %1198 = vmatprep.subr.bf16.mxu0 %v1324_v0  ;;  %v1290_v1 = vld [vmem:[%s1602_s3 + $0x8] sm:$0xff]   ;;  %1202 = vmatprep.mubr.msk.bf16.mxu0 %vm1325_vm0, %v1324_v0  ;;  %v1291_v2 = vld [vmem:[%s1602_s3] sm:$0xff]   ;;  %vm148_vm2 = vcmask 130048   ;;  %vm304_vm3 = vcmask 64512   ;;  %s1330_s19 = smov 112   ;;  %s1331_s20 = smov 48  }
   0x2   :  { %1211 = vmatprep.subr.mxu1 %v1324_v0  ;;  %1213 = vmatprep.mubr.msk.f32.mxu1 %vm1325_vm0, %v1324_v0  ;;  %v1413_v3 = vld [vmem:[%s1603_s0] sm:$0xff]  ;;  %v1418_v4 = vld [vmem:[%s1603_s0 + $0x8] sm:$0xff]  ;;  %s1332_s25 = smov 16   ;;  %vm1043_vm4 = vcmask 523264  }
   0x3   :  { %1199 = vmatpush3.bf16.msra.mxu0 %v1290_v1  ;;  %v48_v5 = vpack.c.bf16 %v1418_v4, %v1413_v3  ;;  %v1136_v6 = vld [vmem:[%s1604_s4] ss:$0 sm:$0xff]  ;;  %1283 = vset.pattern.permute.xlu1 %v1326_v7  ;;  %v45_v10 = vld [vmem:[%s1605_s1 + $0x8] sm:$0xff]  ;;  %v1141_v21 = vld [vmem:[%s1606_s2 + $0x1] ss:$0 sm:$0xff] }
   0x4   :  { %1200 = vmatprep.subr.bf16.mxu0 %v1324_v0  ;;  %v44_v8 = vld [vmem:[%s1605_s1] sm:$0xff]  ;;  %1289 = vset.pattern.permute.xlu0 %v1326_v7 }
   0x5   :  { %119 = vperm.xlu1 %1283, %v44_v8   ;;  %v1140_v18 = vld [vmem:[%s1606_s2] ss:$0 sm:$0xff]  ;;  %s1328_s2 = smov 64  }
   0x7   :  { %1201 = vmatpush3.bf16.msra.mxu0 %v1291_v2 }
   0x8   :  { %1206 = vmatprep.subr.mxu0 %v1324_v0 }
   0x9   :  { %124 = vperm.xlu1 %1283, %v45_v10  }
   0xa   :  { %1203 = vmatmul.mubr.msk.bf16.vlgmr.msra.gmra.mxu0 %vm72_vm1, %v48_v5 }
   0xb   :  { %1208 = vmatprep.mubr.msk.f32.mxu0 %vm1325_vm0, %v1324_v0 }
  0x80   :  { %v1457_v19 = vpop.permute.xlu1 %119 }
  0x81   :  { %v139_v20 = vmul.f32 %v1140_v18, %v1457_v19 }
  0x83   :  { %v141_v23 = vsub.f32 1.0, %v139_v20 }
  0x84   :  { %v1463_v22 = vpop.permute.xlu1 %124 }
  0x85   :  { %v140_v24 = vmul.f32 %v1141_v21, %v1463_v22  ;;  %v1466_v25 = vmul.f32 -1e+09, %v141_v23 }
  0x87   :  { %v142_v27 = vsub.f32 1.0, %v140_v24 }
  0x89   :  { %v1469_v32 = vmul.f32 -1e+09, %v142_v27 }
  0xca   :  { %v110_v9 = vpop.f32.mrf.mxu0 }
  0xcb   :  { %v1436_v11 = vadd.f32 %v1136_v6, %v110_v9 }
  0xcc   :  { %v1204_v12 = vpop.f32.mrf.mxu0 }
  0xcd   :  { %146 = vrot.lane.b32.xlu0 %v1436_v11, %s1327_s15 }
  0xce   :  { %v113_v13 = vpop.f32.mrf.mxu0 }
  0xcf   :  { %v1439_v14 = vadd.f32 %v1136_v6, %v113_v13 }
  0xd0   :  { %v1205_v15 = vpop.f32.mrf.mxu0 }
  0xd1   :  { %224 = vrot.lane.b32.xlu0 %v1439_v14, %s1327_s15 }
 0x13f   :  { %v147_v16 = vpop.permute.xlu0 %146 }
 0x140   :  { %1207 = vmatpush3.xpose.msk.msra.mxu0 %vm148_vm2, %v147_v16 }
 0x141   :  { %1221 = vmatprep.subr.mxu0 %v1324_v0 }
 0x143   :  { %1209 = vmatmul.mubr.msk.f32.vlgmr.msra.gmra.mxu0 %vm148_vm2, %v1436_v11  ;;  %v225_v17 = vpop.permute.xlu0 %224 }
 0x144   :  { %1212 = vmatpush3.xpose.msk.msra.mxu1 %vm148_vm2, %v225_v17  ;;  %1223 = vmatprep.mubr.msk.f32.mxu0 %vm1325_vm0, %v1324_v0 }
 0x145   :  { %1216 = vmatprep.subr.mxu1 %v1324_v0 }
 0x147   :  { %1214 = vmatmul.mubr.msk.f32.vlgmr.msra.gmra.mxu1 %vm148_vm2, %v1439_v14 }
 0x148   :  { %1218 = vmatprep.mubr.msk.f32.mxu1 %vm1325_vm0, %v1324_v0 }
 0x203   :  { %v219_v26 = vpop.f32.mrf.mxu0 }
 0x204   :  { %v300_v28 = vmul.f32 0.25, %v219_v26 }
 0x205   :  { %v1210_v29 = vpop.f32.mrf.mxu0 }
 0x206   :  { %v302_v30 = vadd.f32 %v300_v28, %v1466_v25 }
 0x207   :  { %v296_v31 = vpop.f32.mrf.mxu1 }
 0x208   :  { %v301_v33 = vmul.f32 0.25, %v296_v31  ;;  %v305_v34 = vsel %vm304_vm3, %v302_v30, -inf }
 0x209   :  { %v1215_v35 = vpop.f32.mrf.mxu1  ;;  %306 = vmax.xlane.f32.xlu0 %v305_v34  ;;  %v1293_v34 = vld [vmem:[%s1607_s5] sm:$0xff]  }
 0x20a   :  { %v303_v36 = vadd.f32 %v301_v33, %v1469_v32 }
 0x20c   :  { %v308_v37 = vsel %vm304_vm3, %v303_v36, -inf }
 0x20d   :  { %309 = vmax.xlane.f32.xlu1 %v308_v37 }
 0x21e   :  { %327 = vrot.lane.b32.xlu1 %v1436_v11, %s1328_s2 }
 0x222   :  { %481 = vrot.lane.b32.xlu1 %v1436_v11, %s1329_s18 }
 0x226   :  { %559 = vrot.lane.b32.xlu1 %v1439_v14, %s1329_s18 }
 0x22a   :  { %557 = vrot.lane.b32.xlu1 %v1439_v14, %s1330_s19 }
 0x292   :  { %v307_v38 = vpop.xlane.xlu0 %306 }
 0x293   :  { %v311_v39 = vsub.f32 %v302_v30, %v307_v38 }
 0x295   :  { %v313_v40 = vmul.f32 1.442695, %v311_v39 }
 0x296   :  { %v310_v41 = vpop.xlane.xlu1 %309 }
 0x297   :  { %1300 = vpow2.f32 %v313_v40  ;;  %v312_v42 = vsub.f32 %v303_v36, %v310_v41 }
 0x299   :  { %v315_v43 = vmul.f32 1.442695, %v312_v42 }
 0x29a   :  { %v328_v44 = vpop.permute.xlu1 %327 }
 0x29b   :  { %1302 = vpow2.f32 %v315_v43  ;;  %1217 = vmatpush3.msra.mxu1 %v328_v44 }
 0x29c   :  { %1226 = vmatprep.subr.mxu1 %v1324_v0 }
 0x29e   :  { %v482_v52 = vpop.permute.xlu1 %481 }
 0x2a2   :  { %v560_v56 = vpop.permute.xlu1 %559 }
 0x2a4   :  { %v1301_v45 = vpop.eup %1300 }
 0x2a5   :  { %v317_v46 = vsel %vm304_vm3, %v1301_v45, 0.0 }
 0x2a6   :  { %318 = vadd.xlane.f32.xlu0 %v317_v46  ;;  %v558_v59 = vpop.permute.xlu1 %557  ;;  %v1154_v46 = vld [vmem:[%s1608_s6] ss:$0 sm:$0xff] }
 0x2a8   :  { %v1303_v47 = vpop.eup %1302 }
 0x2a9   :  { %v320_v48 = vsel %vm304_vm3, %v1303_v47, 0.0 }
 0x2aa   :  { %321 = vadd.xlane.f32.xlu0 %v320_v48 }
 0x2c0   :  { %403 = vrot.lane.b32.xlu0 %v1439_v14, %s1328_s2 }
 0x2c4   :  { %479 = vrot.lane.b32.xlu0 %v1436_v11, %s1330_s19 }
 0x32f   :  { %v319_v49 = vpop.xlane.xlu0 %318 }
 0x330   :  { %1304 = vrcp.f32 %v319_v49 }
 0x333   :  { %v322_v50 = vpop.xlane.xlu0 %321 }
 0x334   :  { %1306 = vrcp.f32 %v322_v50 }
 0x337   :  { %v404_v51 = vpop.permute.xlu0 %403 }
 0x338   :  { %1222 = vmatpush3.msra.mxu0 %v404_v51 }
 0x339   :  { %1231 = vmatprep.subr.mxu0 %v1324_v0 }
 0x33b   :  { %v480_v58 = vpop.permute.xlu0 %479 }
 0x33d   :  { %v1305_v53 = vpop.eup %1304 }
 0x33e   :  { %v325_v54 = vmul.f32 %v1305_v53, %v1301_v45 }
 0x340   :  { %1219 = vmatmul.mubr.msk.f32.vlgmr.msra.gmra.mxu1 %vm304_vm3, %v325_v54 }
 0x341   :  { %v1307_v55 = vpop.eup %1306  ;;  %1227 = vmatpush3.xpose.msk.msra.mxu1 %vm148_vm2, %v482_v52  ;;  %1228 = vmatprep.mubr.msk.f32.mxu1 %vm1325_vm0, %v1324_v0 }
 0x342   :  { %v326_v57 = vmul.f32 %v1307_v55, %v1303_v47  ;;  %1236 = vmatprep.subr.mxu1 %v1324_v0 }
 0x344   :  { %1224 = vmatmul.mubr.msk.f32.vlgmr.msra.gmra.mxu0 %vm304_vm3, %v326_v57  ;;  %1229 = vmatmul.mubr.msk.f32.vlgmr.msra.gmra.mxu1 %vm148_vm2, %v480_v58 }
 0x345   :  { %1232 = vmatpush3.xpose.msk.msra.mxu0 %vm148_vm2, %v560_v56  ;;  %1233 = vmatprep.mubr.msk.f32.mxu0 %vm1325_vm0, %v1324_v0 }
 0x346   :  { %1241 = vmatprep.subr.mxu0 %v1324_v0  ;;  %1238 = vmatprep.mubr.msk.f32.mxu1 %vm1325_vm0, %v1324_v0 }
 0x348   :  { %1234 = vmatmul.mubr.msk.f32.vlgmr.msra.gmra.mxu0 %vm148_vm2, %v558_v59 }
 0x349   :  { %1243 = vmatprep.mubr.msk.f32.mxu0 %vm1325_vm0, %v1324_v0 }
 0x400   :  { %v1500_v60 = vpop.f32.mrf.mxu1 }
 0x402   :  { %v1220_v61 = vpop.f32.mrf.mxu1 }
 0x404   :  { %v1502_v62 = vpop.f32.mrf.mxu0  ;;  %v553_v63 = vpop.f32.mrf.mxu1 }
 0x405   :  { %v635_v1 = vmul.f32 0.25, %v553_v63 }
 0x406   :  { %v1225_v2 = vpop.f32.mrf.mxu0  ;;  %v1230_v5 = vpop.f32.mrf.mxu1 }
 0x407   :  { %v637_v6 = vadd.f32 %v635_v1, %v1466_v25  ;;  %v1295_v5 = vld [vmem:[%s1609_s7] sm:$0xff]  }
 0x408   :  { %v631_v7 = vpop.f32.mrf.mxu0 }
 0x409   :  { %v636_v8 = vmul.f32 0.25, %v631_v7  ;;  %v639_v9 = vsel %vm304_vm3, %v637_v6, -inf }
 0x40a   :  { %640 = vmax.xlane.f32.xlu0 %v639_v9  ;;  %v1235_v10 = vpop.f32.mrf.mxu0 }
 0x40b   :  { %v638_v12 = vadd.f32 %v636_v8, %v1469_v32 }
 0x40d   :  { %v642_v13 = vsel %vm304_vm3, %v638_v12, -inf }
 0x40e   :  { %643 = vmax.xlane.f32.xlu1 %v642_v13 }
 0x41f   :  { %661 = vrot.lane.b32.xlu1 %v1436_v11, %s1331_s20 }
 0x493   :  { %v641_v15 = vpop.xlane.xlu0 %640 }
 0x494   :  { %v645_v16 = vsub.f32 %v637_v6, %v641_v15  ;;  %v1296_v6 = vld [vmem:[%s1610_s9 + $0x18] sm:$0xff]   ;;  %v921_v15 = vlaneseq }
 0x496   :  { %v647_v17 = vmul.f32 1.442695, %v645_v16  ;;  %v1555_v16 = vshrl.u32 %v921_v15, 7 }
 0x497   :  { %v644_v18 = vpop.xlane.xlu1 %643 }
 0x498   :  { %1308 = vpow2.f32 %v647_v17  ;;  %v646_v20 = vsub.f32 %v638_v12, %v644_v18  ;;  %v923_v17 = vsub.s32 0, %v1555_v16  ;;  %v1561_v18 = vld [vmem:[%s1611_s11] sm:$0xf] }
 0x49a   :  { %v649_v21 = vmul.f32 1.442695, %v646_v20 }
 0x49b   :  { %v662_v23 = vpop.permute.xlu1 %661 }
 0x49c   :  { %1310 = vpow2.f32 %v649_v21  ;;  %1237 = vmatpush3.msra.mxu1 %v662_v23  ;;  %v924_v23 = vrot.slane %v1561_v18, %v923_v17 }
 0x49d   :  { %1246 = vmatprep.subr.bf16.mxu1 %v1324_v0 }
 0x4a5   :  { %v1309_v24 = vpop.eup %1308 }
 0x4a6   :  { %v651_v25 = vsel %vm304_vm3, %v1309_v24, 0.0 }
 0x4a7   :  { %652 = vadd.xlane.f32.xlu0 %v651_v25 }
 0x4a9   :  { %v1311_v26 = vpop.eup %1310 }
 0x4aa   :  { %v654_v27 = vsel %vm304_vm3, %v1311_v26, 0.0 }
 0x4ab   :  { %655 = vadd.xlane.f32.xlu0 %v654_v27 }
 0x4c1   :  { %737 = vrot.lane.b32.xlu0 %v1439_v14, %s1331_s20  ;;  %v1292_v14 = vld [vmem:[%s1607_s5 + $0x8] sm:$0xff]  }
 0x530   :  { %v653_v11 = vpop.xlane.xlu0 %652 }
 0x531   :  { %1312 = vrcp.f32 %v653_v11 }
 0x534   :  { %v656_v28 = vpop.xlane.xlu0 %655 }
 0x535   :  { %1314 = vrcp.f32 %v656_v28 }
 0x538   :  { %v738_v29 = vpop.permute.xlu0 %737 }
 0x539   :  { %1242 = vmatpush3.msra.mxu0 %v738_v29 }
 0x53a   :  { %1254 = vmatprep.subr.bf16.mxu0 %v1324_v0 }
 0x53e   :  { %v1313_v30 = vpop.eup %1312 }
 0x53f   :  { %v659_v31 = vmul.f32 %v1313_v30, %v1309_v24  ;;  %v929_v24 = vsub.s32 1, %v1555_v16 }
 0x541   :  { %1239 = vmatmul.mubr.msk.f32.vlgmr.msra.gmra.mxu1 %vm304_vm3, %v659_v31  ;;  %v930_v11 = vrot.slane %v1561_v18, %v929_v24 }
 0x542   :  { %v1315_v32 = vpop.eup %1314  ;;  %1250 = vmatprep.mubr.msk.bf16.mxu1 %vm1325_vm0, %v1324_v0  ;;  %1247 = vmatpush3.bf16.msra.mxu1 %v1292_v14  ;;  %v1299_v14 = vld [vmem:[%s1610_s9] sm:$0xff]  }
 0x543   :  { %v660_v33 = vmul.f32 %v1315_v32, %v1311_v26  ;;  %1248 = vmatprep.subr.bf16.mxu1 %v1324_v0  ;;  %v1297_v32 = vld [vmem:[%s1610_s9 + $0x10] sm:$0xff]  }
 0x545   :  { %1244 = vmatmul.mubr.msk.f32.vlgmr.msra.gmra.mxu0 %vm304_vm3, %v660_v33  ;;  %v1298_v33 = vld [vmem:[%s1610_s9 + $0x8] sm:$0xff]  }
 0x546   :  { %1258 = vmatprep.mubr.msk.bf16.mxu0 %vm1325_vm0, %v1324_v0  ;;  %1249 = vmatpush3.bf16.msra.mxu1 %v1293_v34  ;;  %v1158_v34 = vld [vmem:[%s1612_s8] ss:$0 sm:$0xff] }
 0x547   :  { %1262 = vmatprep.subr.bf16.mxu1 %v1324_v0 }
 0x601   :  { %v733_v35 = vpop.f32.mrf.mxu1 }
 0x603   :  { %v1240_v36 = vpop.f32.mrf.mxu1 }
 0x605   :  { %v809_v37 = vpop.f32.mrf.mxu0 }
 0x606   :  { %v1284_v38 = vpack.i.bf16 %v809_v37, %v733_v35 }
 0x607   :  { %v1245_v39 = vpop.f32.mrf.mxu0 }
 0x608   :  { %1285 = vrot.lane.b32.xlu1 %v1284_v38, %s1332_s25 }
 0x67a   :  { %v1286_v40 = vpop.permute.xlu1 %1285 }
 0x67b   :  { %v1288_v41 = vunpack.i.h.bf16 %v1286_v40  ;;  %v1287_v42 = vunpack.i.l.bf16 %v1286_v40 }
 0x67d   :  { %v822_v43 = vsel %vm148_vm2, %v1502_v62, %v1288_v41  ;;  %v821_v44 = vsel %vm148_vm2, %v1500_v60, %v1287_v42 }
 0x67e   :  { %v823_v45 = vpack.c.bf16 %v822_v43, %v821_v44 }
 0x680   :  { %1251 = vmatmul.mubr.msk.bf16.vlgmr.msra.gmra.mxu1 %vm72_vm1, %v823_v45 }
 0x681   :  { %1270 = vmatprep.mubr.msk.bf16.mxu1 %vm1325_vm0, %v1324_v0  ;;  %1263 = vmatpush3.bf16.msra.mxu1 %v1296_v6 }
 0x682   :  { %1264 = vmatprep.subr.bf16.mxu1 %v1324_v0 }
 0x685   :  { %1265 = vmatpush3.bf16.msra.mxu1 %v1297_v32 }
 0x686   :  { %1266 = vmatprep.subr.bf16.mxu1 %v1324_v0 }
 0x689   :  { %1267 = vmatpush3.bf16.msra.mxu1 %v1298_v33 }
 0x68a   :  { %1268 = vmatprep.subr.bf16.mxu1 %v1324_v0 }
 0x68d   :  { %1269 = vmatpush3.bf16.msra.mxu1 %v1299_v14 }
 0x740   :  { %v884_v47 = vpop.f32.mrf.mxu1 }
 0x741   :  { %v885_v48 = vadd.f32 %v1154_v46, %v884_v47 }
 0x742   :  { %v1252_v49 = vpop.f32.mrf.mxu1 }
 0x743   :  { %v892_v50 = vadd.f32 %v885_v48, %v1413_v3 }
 0x744   :  { %v887_v51 = vpop.f32.mrf.mxu1 }
 0x745   :  { %v888_v52 = vadd.f32 %v1154_v46, %v887_v51  ;;  %v894_v53 = vsel %vm72_vm1, %v892_v50, 0.0 }
 0x746   :  { %895 = vadd.xlane.f32.xlu1 %v894_v53  ;;  %v1253_v54 = vpop.f32.mrf.mxu1 }
 0x747   :  { %v893_v55 = vadd.f32 %v888_v52, %v1418_v4  ;;  %v1294_v4 = vld [vmem:[%s1609_s7 + $0x8] sm:$0xff]  }
 0x748   :  { %1255 = vmatpush3.bf16.msra.mxu0 %v1294_v4 }
 0x749   :  { %v897_v56 = vsel %vm72_vm1, %v893_v55, 0.0  ;;  %1256 = vmatprep.subr.bf16.mxu0 %v1324_v0  ;;  %v1162_v0 = vld [vmem:[%s1613_s10] ss:$0 sm:$0xff] }
 0x74a   :  { %898 = vadd.xlane.f32.xlu0 %v897_v56 }
 0x74c   :  { %1257 = vmatpush3.bf16.msra.mxu0 %v1295_v5 }
 0x7cf   :  { %v896_v57 = vpop.xlane.xlu1 %895 }
 0x7d0   :  { %v901_v58 = vmul.f32 0.03125, %v896_v57 }
 0x7d2   :  { %v903_v59 = vsub.f32 %v892_v50, %v901_v58 }
 0x7d3   :  { %v899_v60 = vpop.xlane.xlu0 %898 }
 0x7d4   :  { %v902_v61 = vmul.f32 0.03125, %v899_v60  ;;  %v905_v62 = vmul.f32 %v903_v59, %v903_v59 }
 0x7d6   :  { %v904_v63 = vsub.f32 %v893_v55, %v902_v61  ;;  %v907_v3 = vsel %vm72_vm1, %v905_v62, 0.0 }
 0x7d7   :  { %908 = vadd.xlane.f32.xlu0 %v907_v3 }
 0x7d8   :  { %v906_v1 = vmul.f32 %v904_v63, %v904_v63 }
 0x7da   :  { %v910_v2 = vsel %vm72_vm1, %v906_v1, 0.0 }
 0x7db   :  { %911 = vadd.xlane.f32.xlu1 %v910_v2 }
 0x860   :  { %v909_v7 = vpop.xlane.xlu0 %908 }
 0x861   :  { %v913_v8 = vmul.f32 0.03125, %v909_v7  ;;  %v1118_v7 = vsub.s32 2, %v1555_v16 }
 0x863   :  { %v915_v9 = vadd.f32 1e-05, %v913_v8  ;;  %v1124_v8 = vsub.s32 3, %v1555_v16 }
 0x864   :  { %v912_v10 = vpop.xlane.xlu1 %911 }
 0x865   :  { %1316 = vrsqrt.f32 %v915_v9  ;;  %v914_v12 = vmul.f32 0.03125, %v912_v10  ;;  %v1119_v9 = vrot.slane %v1561_v18, %v1118_v7 }
 0x867   :  { %v916_v13 = vadd.f32 1e-05, %v914_v12  ;;  %v1125_v12 = vrot.slane %v1561_v18, %v1124_v8 }
 0x869   :  { %1318 = vrsqrt.f32 %v916_v13 }
 0x872   :  { %v1317_v20 = vpop.eup %1316 }
 0x873   :  { %v919_v21 = vmul.f32 %v1317_v20, %v903_v59 }
 0x875   :  { %v925_v27 = vmul.f32 %v924_v23, %v919_v21 }
 0x876   :  { %v1319_v25 = vpop.eup %1318 }
 0x877   :  { %v920_v26 = vmul.f32 %v1319_v25, %v904_v63  ;;  %v931_v29 = vadd.f32 %v930_v11, %v925_v27 }
 0x879   :  { %v926_v28 = vmul.f32 %v924_v23, %v920_v26 }
 0x87b   :  { %v932_v30 = vadd.f32 %v930_v11, %v926_v28 }
 0x87d   :  { %v933_v31 = vpack.c.bf16 %v932_v30, %v931_v29 }
 0x87f   :  { %1259 = vmatmul.mubr.msk.bf16.vlgmr.msra.gmra.mxu0 %vm72_vm1, %v933_v31 }
 0x93f   :  { %v994_v35 = vpop.f32.mrf.mxu0 }
 0x940   :  { %v995_v37 = vadd.f32 %v1158_v34, %v994_v35 }
 0x941   :  { %v1260_v36 = vpop.f32.mrf.mxu0 }
 0x942   :  { %v1001_v41 = vmax.f32 %v995_v37, 0.0 }
 0x943   :  { %v997_v38 = vpop.f32.mrf.mxu0 }
 0x944   :  { %v998_v39 = vadd.f32 %v1158_v34, %v997_v38 }
 0x945   :  { %v1261_v40 = vpop.f32.mrf.mxu0 }
 0x946   :  { %v1002_v42 = vmax.f32 %v998_v39, 0.0 }
 0x948   :  { %v1003_v43 = vpack.c.bf16 %v1002_v42, %v1001_v41 }
 0x94a   :  { %1271 = vmatmul.mubr.msk.bf16.vlgmr.msra.gmra.mxu1 %vm1043_vm4, %v1003_v43 }
 0xa0a   :  { %v1081_v44 = vpop.f32.mrf.mxu1 }
 0xa0b   :  { %v1082_v45 = vadd.f32 %v1162_v0, %v1081_v44 }
 0xa0c   :  { %v1272_v46 = vpop.f32.mrf.mxu1 }
 0xa0d   :  { %v1088_v47 = vadd.f32 %v1082_v45, %v931_v29 }
 0xa0e   :  { %v1084_v48 = vpop.f32.mrf.mxu1 }
 0xa0f   :  { %v1085_v49 = vadd.f32 %v1162_v0, %v1084_v48  ;;  %v1090_v50 = vsel %vm72_vm1, %v1088_v47, 0.0 }
 0xa10   :  { %1091 = vadd.xlane.f32.xlu0 %v1090_v50  ;;  %v1273_v51 = vpop.f32.mrf.mxu1 }
 0xa11   :  { %v1089_v52 = vadd.f32 %v1085_v49, %v932_v30 }
 0xa13   :  { %v1093_v53 = vsel %vm72_vm1, %v1089_v52, 0.0 }
 0xa14   :  { %1094 = vadd.xlane.f32.xlu1 %v1093_v53 }
 0xa99   :  { %v1092_v54 = vpop.xlane.xlu0 %1091 }
 0xa9a   :  { %v1096_v55 = vmul.f32 0.03125, %v1092_v54 }
 0xa9c   :  { %v1098_v56 = vsub.f32 %v1088_v47, %v1096_v55 }
 0xa9d   :  { %v1095_v57 = vpop.xlane.xlu1 %1094 }
 0xa9e   :  { %v1097_v58 = vmul.f32 0.03125, %v1095_v57  ;;  %v1100_v59 = vmul.f32 %v1098_v56, %v1098_v56 }
 0xaa0   :  { %v1099_v60 = vsub.f32 %v1089_v52, %v1097_v58  ;;  %v1102_v61 = vsel %vm72_vm1, %v1100_v59, 0.0 }
 0xaa1   :  { %1103 = vadd.xlane.f32.xlu0 %v1102_v61 }
 0xaa2   :  { %v1101_v62 = vmul.f32 %v1099_v60, %v1099_v60 }
 0xaa4   :  { %v1105_v63 = vsel %vm72_vm1, %v1101_v62, 0.0 }
 0xaa5   :  { %1106 = vadd.xlane.f32.xlu1 %v1105_v63 }
 0xb2a   :  { %v1104_v3 = vpop.xlane.xlu0 %1103 }
 0xb2b   :  { %v1108_v1 = vmul.f32 0.03125, %v1104_v3 }
 0xb2d   :  { %v1110_v2 = vadd.f32 1e-05, %v1108_v1 }
 0xb2e   :  { %v1107_v4 = vpop.xlane.xlu1 %1106 }
 0xb2f   :  { %1320 = vrsqrt.f32 %v1110_v2  ;;  %v1109_v5 = vmul.f32 0.03125, %v1107_v4 }
 0xb31   :  { %v1111_v6 = vadd.f32 1e-05, %v1109_v5 }
 0xb33   :  { %1322 = vrsqrt.f32 %v1111_v6 }
 0xb3c   :  { %v1321_v10 = vpop.eup %1320 }
 0xb3d   :  { %v1114_v13 = vmul.f32 %v1321_v10, %v1098_v56 }
 0xb3f   :  { %v1120_v15 = vmul.f32 %v1119_v9, %v1114_v13 }
 0xb40   :  { %v1323_v17 = vpop.eup %1322 }
 0xb41   :  { %v1126_v20 = vadd.f32 %v1125_v12, %v1120_v15  ;;  %v1115_v21 = vmul.f32 %v1323_v17, %v1099_v60 }
 0xb43   :  { %v1128_v23 = vmul.f32 %v1126_v20, %v1457_v19  ;;  %v1121_v24 = vmul.f32 %v1119_v9, %v1115_v21 }
 0xb45   :  { %1130 = vst.msk [vmem:[%s1614_s12] sm:$0xff] %vm72_vm1, %v1128_v23  ;;  %v1127_v25 = vadd.f32 %v1125_v12, %v1121_v24 }
 0xb47   :  { %v1129_v16 = vmul.f32 %v1127_v25, %v1463_v22 }
 0xb49   :  { %1131 = vst.msk [vmem:[%s1614_s12 + $0x8] sm:$0xff] %vm72_vm1, %v1129_v16 }

// kernel: _lambda_.8
= control target key start
LH: loop header
LB: loop body
LE: loop exit
PB: predicated region body
PF: predicated region fallthrough
CT: control target
= control target key end

     0   :  { %s1534_s30 = smov 0   ;;  %s1698_s0 = inlined_call_operand.vmem [shape: f32[2,32,8], index: 0, kind: input, shape index: {}]   ;;  %s1699_s1 = inlined_call_operand.vmem [shape: f32[2,8,32], index: 1, kind: input, shape index: {}]   ;;  %s1700_s2 = inlined_call_operand.vmem [shape: f32[2,8,32], index: 2, kind: input, shape index: {}]   ;;  %s1701_s3 = inlined_call_operand.vmem [shape: f32[2,32,32], index: 3, kind: input, shape index: {}]   ;;  %s1702_s4 = inlined_call_operand.vmem [shape: f32[2,32,1], index: 4, kind: input, shape index: {}]   ;;  %s1703_s5 = inlined_call_operand.vmem [shape: bf16[3,16,32], index: 5, kind: input, shape index: {}]   ;;  %s1704_s6 = inlined_call_operand.vmem [shape: f32[1,32], index: 6, kind: input, shape index: {}]   ;;  %s1705_s7 = inlined_call_operand.vmem [shape: bf16[3,32,16], index: 7, kind: input, shape index: {}]   ;;  %s1706_s8 = inlined_call_operand.vmem [shape: f32[1,16], index: 8, kind: input, shape index: {}]   ;;  %s1707_s9 = inlined_call_operand.vmem [shape: f32[2,32,32], index: 9, kind: output, shape index: {}]  }
   0x1 LB: > { %s1292_s10 = sadd.s32 4294967295, %s1480_s30   ;;  %p1296_p0 = scmp.ge.s32.totalorder %s1480_s30, 1  ;;  %s1480_s30 = sphi %s1534_s30, %s19_s30  }
   0x2   : > { %p325_p1 = scmp.lt.s32.totalorder %s1480_s30, 3 }
   0x4   : > { %p326_p2 = pnand %p1296_p0, %p325_p1 }
   0x5   : > { %p379_p3 = scmp.lt.s32.totalorder (!%p326_p2), %s1292_s10, 1 }
   0x6   : > { %329 = sbr.rel (%p326_p2) target bundleno = 794 (0x31a), region = 56 }
   0xb   : > { %v1482_v0 = vmov 0   ;;  %s1709_s10 = smov (!%p379_p3, %s1292_s10), 1  ;;  %vm422_vm0 = vcmask 64512   ;;  %v1457_v11 = vld [vmem:[%s1703_s5 + $0x8] sm:$0xff]   ;;  %v1458_v12 = vld [vmem:[%s1703_s5] sm:$0xff]   ;;  %v1575_v13 = vld [vmem:[%s1703_s5 + $0x10] sm:$0xff]  }
   0xc   : > { %1455 = vset.pattern.permute.xlu0 %v1482_v0  ;;  %1456 = vset.pattern.permute.xlu1 %v1482_v0  ;;  %s1542_s11 = sshll.u32 %s1709_s10, 5  ;;  %s1299_s12 = sshll.u32 %s1709_s10, 3  ;;  %vm686_vm1 = vcmask 130048   ;;  %vm645_vm2 = vcmask 1040384   ;;  %vm658_vm3 = vcmask 1046528   ;;  %vm941_vm4 = vcmask 261120  }
   0xd   : > { %s391_s15 = scalar_lea.vmem %s1700_s2, %s1299_s12  ;;  %s383_s18 = scalar_lea.vmem %s1698_s0, %s1542_s11 }
   0xe   : > { %v413_v1 = vld [vmem:[%s391_s15] sm:$0xff]  ;;  %s387_s21 = scalar_lea.vmem %s1699_s1, %s1299_s12  ;;  %v409_v3 = vld [vmem:[%s383_s18 + $0x8] sm:$0xff]  ;;  %v410_v4 = vld [vmem:[%s383_s18 + $0x10] sm:$0xff]  ;;  %s401_s24 = scalar_lea.vmem %s1702_s4, %s1542_s11 }
   0xf   : > { %1387 = vmatprep.subr.mxu0 %v413_v1  ;;  %v408_v2 = vld [vmem:[%s383_s18] sm:$0xff]  ;;  %v420_v7 = vld [vmem:[%s401_s24 + $0x10] sm:$0xff]  ;;  %v411_v8 = vld [vmem:[%s383_s18 + $0x18] sm:$0xff]  ;;  %s396_s14 = scalar_lea.vmem %s1701_s3, %s1542_s11  ;;  %s1483_s12 = smov 16  }
  0x10   : > { %1388 = vmatpush3.msra.mxu0 %v413_v1  ;;  %1389 = vmatprep.mubr.msk.f32.mxu0 %vm422_vm0, %v408_v2  ;;  %v412_v5 = vld [vmem:[%s387_s21] sm:$0xff]  ;;  %v419_v9 = vld [vmem:[%s401_s24 + $0x8] sm:$0xff]  ;;  %v421_v10 = vld [vmem:[%s401_s24 + $0x18] sm:$0xff]  ;;  %s406_s15 = scalar_lea.vmem %s1707_s9, %s1542_s11 }
  0x11   : > { %v418_v6 = vld [vmem:[%s401_s24] sm:$0xff]  ;;  %1390 = vmatmul.mubr.msk.f32.vlgmr.msra.gmra.mxu0 %vm422_vm0, %v409_v3  ;;  %1395 = vmatprep.subr.mxu1 %v412_v5  ;;  %v415_v24 = vld [vmem:[%s396_s14 + $0x8] sm:$0xff]  ;;  %v417_v32 = vld [vmem:[%s396_s14 + $0x18] sm:$0xff] }
  0x12   : > { %1392 = vmatprep.mubr.msk.f32.mxu0 %vm422_vm0, %v410_v4  ;;  %1396 = vmatpush3.msra.mxu1 %v412_v5  ;;  %v414_v26 = vld [vmem:[%s396_s14] sm:$0xff]  ;;  %v416_v37 = vld [vmem:[%s396_s14 + $0x10] sm:$0xff] }
  0x13   : > { %1397 = vmatprep.mubr.msk.f32.mxu1 %vm422_vm0, %v408_v2  ;;  %619 = vperm.xlu0 %1455, %v418_v6  }
  0x14   : > { %1398 = vmatmul.mubr.msk.f32.vlgmr.msra.gmra.mxu1 %vm422_vm0, %v409_v3  ;;  %629 = vperm.xlu1 %1456, %v420_v7  }
  0x15   : > { %1393 = vmatmul.mubr.msk.f32.gmra.mxu0 %vm422_vm0, %v411_v8  ;;  %1400 = vmatprep.mubr.msk.f32.mxu1 %vm422_vm0, %v410_v4 }
  0x16   : > { %1403 = vmatprep.subr.bf16.mxu0 %v1457_v11  ;;  %1409 = vmatprep.subr.bf16.mxu1 %v1458_v12 }
  0x17   : > { %624 = vperm.xlu0 %1455, %v419_v9   ;;  %1404 = vmatpush3.bf16.msra.mxu0 %v1457_v11  ;;  %v1462_v9 = vld [vmem:[%s1705_s7 + $0x8] sm:$0xff]   ;;  %v1463_v11 = vld [vmem:[%s1705_s7] sm:$0xff]  }
  0x18   : > { %1401 = vmatmul.mubr.msk.f32.gmra.mxu1 %vm422_vm0, %v411_v8  ;;  %634 = vperm.xlu1 %1456, %v421_v10   ;;  %v1460_v8 = vld [vmem:[%s1705_s7 + $0x18] sm:$0xff]   ;;  %v1461_v10 = vld [vmem:[%s1705_s7 + $0x10] sm:$0xff]  }
  0x19   : > { %1410 = vmatpush3.bf16.msra.mxu1 %v1458_v12  ;;  %1415 = vmatprep.subr.bf16.mxu0 %v1575_v13  ;;  %v1464_v12 = vld [vmem:[%s1705_s7 + $0x28] sm:$0xff]  }
  0x1a   : > { %1421 = vmatprep.subr.bf16.mxu1 %v1460_v8 }
  0x8e   : > { %v1582_v22 = vpop.permute.xlu0 %619 }
  0x8f   : > { %v1584_v30 = vpop.permute.xlu1 %629 }
  0x92   : > { %v1586_v31 = vpop.permute.xlu0 %624 }
  0x93   : > { %v1594_v45 = vpop.permute.xlu1 %634 }
  0xd1   : > { %v1391_v14 = vpop.f32.mrf.mxu0 }
  0xd2   : > { %v522_v15 = vmul.f32 1.442695, %v1391_v14 }
  0xd3   : > { %v501_v16 = vpop.f32.mrf.mxu0 }
  0xd4   : > { %1466 = vpow2.f32 %v522_v15  ;;  %v520_v17 = vmul.f32 1.442695, %v501_v16  ;;  %v1399_v23 = vpop.f32.mrf.mxu1 }
  0xd5   : > { %v1394_v18 = vpop.f32.mrf.mxu0 }
  0xd6   : > { %1468 = vpow2.f32 %v520_v17  ;;  %v526_v19 = vmul.f32 1.442695, %v1394_v18  ;;  %v598_v27 = vpop.f32.mrf.mxu1 }
  0xd7   : > { %v511_v20 = vpop.f32.mrf.mxu0 }
  0xd8   : > { %1470 = vpow2.f32 %v526_v19  ;;  %v524_v21 = vmul.f32 1.442695, %v511_v20  ;;  %v1402_v36 = vpop.f32.mrf.mxu1 }
  0xda   : > { %1472 = vpow2.f32 %v524_v21  ;;  %v608_v46 = vpop.f32.mrf.mxu1 }
  0xe1   : > { %v1467_v25 = vpop.eup %1466 }
  0xe2   : > { %v529_v28 = vmul.f32 %v1467_v25, %v415_v24  ;;  %v1328_v25 = vld [vmem:[%s1704_s6] ss:$0 sm:$0xff] }
  0xe3   : > { %v1469_v29 = vpop.eup %1468 }
  0xe4   : > { %v604_v33 = vadd.f32 %v1399_v23, %v529_v28  ;;  %v528_v34 = vmul.f32 %v1469_v29, %v414_v26 }
  0xe5   : > { %v1471_v35 = vpop.eup %1470 }
  0xe6   : > { %v599_v38 = vadd.f32 %v598_v27, %v528_v34  ;;  %v1589_v39 = vmul.f32 %v1586_v31, %v604_v33  ;;  %v531_v40 = vmul.f32 %v1471_v35, %v417_v32 }
  0xe7   : > { %v1473_v41 = vpop.eup %1472 }
  0xe8   : > { %v1592_v42 = vmul.f32 %v1582_v22, %v599_v38  ;;  %v614_v43 = vadd.f32 %v1402_v36, %v531_v40  ;;  %v530_v44 = vmul.f32 %v1473_v41, %v416_v37  ;;  %v647_v47 = vrot.slane %v1589_v39, 7 }
  0xe9   : > { %v660_v57 = vrot.slane %v1589_v39, 1 }
  0xea   : > { %v1598_v48 = vmul.f32 %v1594_v45, %v614_v43  ;;  %v609_v49 = vadd.f32 %v608_v46, %v530_v44  ;;  %v675_v50 = vpack.c.bf16 %v1589_v39, %v1592_v42  ;;  %v646_v51 = vrot.slane %v1592_v42, 7 }
  0xeb   : > { %v659_v55 = vrot.slane %v1592_v42, 1 }
  0xec   : > { %v1604_v52 = vmul.f32 %v1584_v30, %v609_v49  ;;  %1405 = vmatprep.mubr.msk.bf16.mxu0 %vm686_vm1, %v675_v50  ;;  %v648_v53 = vsel %vm645_vm2, %v646_v51, %v647_v47  ;;  %v657_v54 = vsel %vm645_vm2, 0.0, %v646_v51  ;;  %v651_v58 = vrot.slane %v1598_v48, 7 }
  0xed   : > { %v671_v56 = vpack.c.bf16 %v648_v53, %v657_v54  ;;  %v661_v0 = vsel %vm658_vm3, %v659_v55, %v660_v57  ;;  %v664_v4 = vrot.slane %v1598_v48, 1 }
  0xee   : > { %v649_v59 = vrot.slane %v1604_v52, 7  ;;  %v676_v60 = vpack.c.bf16 %v1598_v48, %v1604_v52  ;;  %v662_v61 = vrot.slane %v1604_v52, 1 }
  0xef   : > { %1411 = vmatprep.mubr.msk.bf16.mxu1 %vm686_vm1, %v671_v56  ;;  %v670_v6 = vsel %vm658_vm3, %v664_v4, 0.0 }
  0xf0   : > { %v650_v62 = vsel %vm645_vm2, %v647_v47, %v649_v59  ;;  %1406 = vmatmul.mubr.msk.bf16.vlgmr.msra.gmra.mxu0 %vm686_vm1, %v676_v60  ;;  %v652_v63 = vsel %vm645_vm2, %v649_v59, %v651_v58  ;;  %v663_v1 = vsel %vm658_vm3, %v660_v57, %v662_v61  ;;  %v665_v5 = vsel %vm658_vm3, %v662_v61, %v664_v4 }
  0xf1   : > { %1416 = vmatpush3.bf16.msra.mxu0 %v1575_v13  ;;  %v672_v2 = vpack.c.bf16 %v652_v63, %v650_v62  ;;  %v803_v3 = vpack.c.bf16 %v663_v1, %v661_v0  ;;  %v804_v7 = vpack.c.bf16 %v670_v6, %v665_v5 }
  0xf2   : > { %1429 = vmatprep.subr.bf16.mxu0 %v1462_v9 }
  0xf3   : > { %1412 = vmatmul.mubr.msk.bf16.vlgmr.msra.gmra.mxu1 %vm686_vm1, %v672_v2  ;;  %1417 = vmatprep.mubr.msk.bf16.mxu0 %vm686_vm1, %v803_v3  ;;  %v1465_v2 = vld [vmem:[%s1705_s7 + $0x20] sm:$0xff]  }
  0xf4   : > { %1422 = vmatpush3.bf16.msra.mxu1 %v1460_v8 }
  0xf5   : > { %1423 = vmatprep.subr.bf16.mxu1 %v1461_v10 }
  0xf8   : > { %1418 = vmatmul.mubr.msk.bf16.vlgmr.msra.gmra.mxu0 %vm686_vm1, %v804_v7  ;;  %1424 = vmatpush3.bf16.msra.mxu1 %v1461_v10 }
  0xf9   : > { %1430 = vmatpush3.bf16.msra.mxu0 %v1462_v9  ;;  %1437 = vmatprep.subr.bf16.mxu1 %v1464_v12 }
  0xfa   : > { %1431 = vmatprep.subr.bf16.mxu0 %v1463_v11 }
  0xfd   : > { %1432 = vmatpush3.bf16.msra.mxu0 %v1463_v11 }
 0x1b0   : > { %v1407_v13 = vpop.f32.mrf.mxu0 }
 0x1b2   : > { %v727_v14 = vpop.f32.mrf.mxu0 }
 0x1b3   : > { %v1413_v15 = vpop.f32.mrf.mxu1 }
 0x1b4   : > { %v1408_v16 = vpop.f32.mrf.mxu0  ;;  %v797_v19 = vadd.f32 %v1413_v15, %v1407_v13 }
 0x1b5   : > { %v788_v17 = vpop.f32.mrf.mxu1 }
 0x1b6   : > { %v730_v18 = vpop.f32.mrf.mxu0  ;;  %v789_v23 = vadd.f32 %v788_v17, %v727_v14 }
 0x1b7   : > { %v1414_v20 = vpop.f32.mrf.mxu1 }
 0x1b8   : > { %v1419_v21 = vpop.f32.mrf.mxu0  ;;  %v800_v27 = vadd.f32 %v1414_v20, %v1408_v16 }
 0x1b9   : > { %v871_v24 = vadd.f32 %v1419_v21, %v797_v19  ;;  %v791_v28 = vpop.f32.mrf.mxu1 }
 0x1ba   : > { %v854_v26 = vpop.f32.mrf.mxu0  ;;  %v792_v36 = vadd.f32 %v791_v28, %v730_v18 }
 0x1bb   : > { %v869_v29 = vadd.f32 %v854_v26, %v789_v23  ;;  %v882_v33 = vadd.f32 %v1328_v25, %v871_v24  ;;  %v1349_v23 = vld [vmem:[%s1706_s8] ss:$0 sm:$0xff] }
 0x1bc   : > { %v1420_v32 = vpop.f32.mrf.mxu0 }
 0x1bd   : > { %v880_v34 = vadd.f32 %v1328_v25, %v869_v29  ;;  %v872_v35 = vadd.f32 %v1420_v32, %v800_v27  ;;  %v886_v43 = vmax.f32 %v882_v33, 0.0 }
 0x1be   : > { %v857_v37 = vpop.f32.mrf.mxu0 }
 0x1bf   : > { %v884_v38 = vmax.f32 %v880_v34, 0.0  ;;  %v883_v40 = vadd.f32 %v1328_v25, %v872_v35  ;;  %v870_v41 = vadd.f32 %v857_v37, %v792_v36  ;;  %v895_v51 = vrot.slane %v886_v43, 7 }
 0x1c0   : > { %v907_v53 = vrot.slane %v886_v43, 1 }
 0x1c1   : > { %v887_v44 = vmax.f32 %v883_v40, 0.0  ;;  %v881_v46 = vadd.f32 %v1328_v25, %v870_v41  ;;  %v892_v47 = vrot.slane %v884_v38, 7  ;;  %v904_v54 = vrot.slane %v884_v38, 1 }
 0x1c3   : > { %v897_v49 = vrot.slane %v887_v44, 7  ;;  %v885_v50 = vmax.f32 %v881_v46, 0.0  ;;  %v909_v59 = vrot.slane %v887_v44, 1  ;;  %v923_v60 = vpack.c.bf16 %v887_v44, %v886_v43 }
 0x1c4   : > { %v903_v61 = vsel %vm645_vm2, 0.0, %v892_v47 }
 0x1c5   : > { %v893_v55 = vrot.slane %v885_v50, 7  ;;  %v905_v56 = vrot.slane %v885_v50, 1  ;;  %v922_v57 = vpack.c.bf16 %v885_v50, %v884_v38  ;;  %v898_v58 = vsel %vm645_vm2, %v895_v51, %v897_v49 }
 0x1c6   : > { %v910_v6 = vsel %vm658_vm3, %v907_v53, %v909_v59  ;;  %v915_v7 = vsel %vm658_vm3, %v909_v59, 0.0 }
 0x1c7   : > { %v896_v62 = vsel %vm645_vm2, %v893_v55, %v895_v51  ;;  %1425 = vmatprep.mubr.msk.bf16.mxu1 %vm941_vm4, %v922_v57  ;;  %v894_v63 = vsel %vm645_vm2, %v892_v47, %v893_v55  ;;  %v906_v0 = vsel %vm658_vm3, %v904_v54, %v905_v56  ;;  %v908_v1 = vsel %vm658_vm3, %v905_v56, %v907_v53 }
 0x1c8   : > { %1426 = vmatmul.mubr.msk.bf16.vlgmr.msra.gmra.mxu1 %vm941_vm4, %v923_v60  ;;  %v916_v3 = vpack.c.bf16 %v894_v63, %v903_v61  ;;  %v1064_v4 = vpack.c.bf16 %v908_v1, %v906_v0  ;;  %v917_v5 = vpack.c.bf16 %v898_v58, %v896_v62  ;;  %v1065_v8 = vpack.c.bf16 %v915_v7, %v910_v6 }
 0x1c9   : > { %1438 = vmatpush3.bf16.msra.mxu1 %v1464_v12 }
 0x1ca   : > { %1433 = vmatprep.mubr.msk.bf16.mxu0 %vm941_vm4, %v916_v3  ;;  %1441 = vmatprep.mubr.msk.bf16.mxu1 %vm941_vm4, %v1064_v4 }
 0x1cb   : > { %1434 = vmatmul.mubr.msk.bf16.vlgmr.msra.gmra.mxu0 %vm941_vm4, %v917_v5  ;;  %1439 = vmatprep.subr.bf16.mxu1 %v1465_v2 }
 0x1cd   : > { %1440 = vmatpush3.bf16.msra.mxu1 %v1465_v2 }
 0x1d0   : > { %1442 = vmatmul.mubr.msk.bf16.vlgmr.msra.gmra.mxu1 %vm941_vm4, %v1065_v8 }
 0x288   : > { %v1427_v9 = vpop.f32.mrf.mxu1 }
 0x28a   : > { %v982_v10 = vpop.f32.mrf.mxu1 }
 0x28b   : > { %v1435_v11 = vpop.f32.mrf.mxu0 }
 0x28c   : > { %v1428_v13 = vpop.f32.mrf.mxu1  ;;  %v1058_v20 = vadd.f32 %v1435_v11, %v1427_v9 }
 0x28d   : > { %v1049_v12 = vpop.f32.mrf.mxu0 }
 0x28e   : > { %v985_v14 = vpop.f32.mrf.mxu1  ;;  %v1050_v17 = vadd.f32 %v1049_v12, %v982_v10 }
 0x28f   : > { %v1436_v15 = vpop.f32.mrf.mxu0 }
 0x290   : > { %v1443_v16 = vpop.f32.mrf.mxu1  ;;  %v1061_v29 = vadd.f32 %v1436_v15, %v1428_v13 }
 0x291   : > { %v1052_v18 = vpop.f32.mrf.mxu0  ;;  %v1140_v25 = vadd.f32 %v1443_v16, %v1058_v20 }
 0x292   : > { %v1123_v19 = vpop.f32.mrf.mxu1  ;;  %v1053_v26 = vadd.f32 %v1052_v18, %v985_v14 }
 0x293   : > { %v1138_v21 = vadd.f32 %v1123_v19, %v1050_v17  ;;  %v1151_v33 = vadd.f32 %v1349_v23, %v1140_v25 }
 0x294   : > { %v1444_v24 = vpop.f32.mrf.mxu1 }
 0x295   : > { %v1149_v27 = vadd.f32 %v1349_v23, %v1138_v21  ;;  %v1141_v34 = vadd.f32 %v1444_v24, %v1061_v29 }
 0x296   : > { %v1126_v28 = vpop.f32.mrf.mxu1 }
 0x297   : > { %v1139_v32 = vadd.f32 %v1126_v28, %v1053_v26  ;;  %1157 = vrot.lane.b32.xlu0 %v1149_v27, %s1483_s12  ;;  %v1152_v36 = vadd.f32 %v1349_v23, %v1141_v34 }
 0x299   : > { %v1150_v35 = vadd.f32 %v1349_v23, %v1139_v32 }
 0x29b   : > { %1159 = vrot.lane.b32.xlu1 %v1150_v35, %s1483_s12  ;;  %1161 = vrot.lane.b32.xlu0 %v1151_v33, %s1483_s12 }
 0x29f   : > { %1163 = vrot.lane.b32.xlu1 %v1152_v36, %s1483_s12 }
 0x309   : > { %v1158_v37 = vpop.permute.xlu0 %1157 }
 0x30a   : > { %v1169_v38 = vsub.f32 %v1592_v42, %v1158_v37 }
 0x30c   : > { %v1173_v40 = vmul.f32 %v1169_v38, %v1582_v22 }
 0x30d   : > { %v1160_v41 = vpop.permute.xlu1 %1159  ;;  %v1162_v43 = vpop.permute.xlu0 %1161 }
 0x30e   : > { %v1177_v44 = vsel %vm686_vm1, %v1592_v42, %v1173_v40  ;;  %v1170_v46 = vsub.f32 %v1589_v39, %v1160_v41  ;;  %v1171_v47 = vsub.f32 %v1604_v52, %v1162_v43 }
 0x30f   : > { %v1181_v49 = vmul.f32 %v1177_v44, %v1582_v22 }
 0x310   : > { %v1174_v50 = vmul.f32 %v1170_v46, %v1586_v31  ;;  %v1175_v51 = vmul.f32 %v1171_v47, %v1584_v30 }
 0x311   : > { %1185 = vst.msk [vmem:[%s406_s15] sm:$0xff] %vm941_vm4, %v1181_v49  ;;  %v1164_v53 = vpop.permute.xlu1 %1163 }
 0x312   : > { %v1178_v54 = vsel %vm686_vm1, %v1589_v39, %v1174_v50  ;;  %v1179_v55 = vsel %vm686_vm1, %v1604_v52, %v1175_v51  ;;  %v1172_v42 = vsub.f32 %v1598_v48, %v1164_v53 }
 0x313   : > { %v1182_v56 = vmul.f32 %v1178_v54, %v1586_v31  ;;  %v1183_v57 = vmul.f32 %v1179_v55, %v1584_v30 }
 0x314   : > { %v1176_v22 = vmul.f32 %v1172_v42, %v1594_v45 }
 0x315   : > { %1186 = vst.msk [vmem:[%s406_s15 + $0x8] sm:$0xff] %vm941_vm4, %v1182_v56  ;;  %1187 = vst.msk [vmem:[%s406_s15 + $0x10] sm:$0xff] %vm941_vm4, %v1183_v57 }
 0x316   : > { %v1180_v58 = vsel %vm686_vm1, %v1598_v48, %v1176_v22 }
 0x317   : > { %v1184_v39 = vmul.f32 %v1180_v58, %v1594_v45 }
 0x319   : > { %1188 = vst.msk [vmem:[%s406_s15 + $0x18] sm:$0xff] %vm941_vm4, %v1184_v39 }
 0x31a PF: > { %s19_s30 = sadd.s32 1, %s1480_s30  }
 0x31b   : > { %p16_p4 = scmp.ge.s32.totalorder %s19_s30, 4  }
 0x31d   :  { %18 = sbr.rel (!%p16_p4) target bundleno = 1 (0x1), region = 102 }

// kernel: _lambda_.9
= control target key start
LH: loop header
LB: loop body
LE: loop exit
PB: predicated region body
PF: predicated region fallthrough
CT: control target
= control target key end

     0   :  { %s4082_s0 = inlined_call_operand.vmem [shape: f32[2,32,32], index: 0, kind: input, shape index: {}]   ;;  %s4083_s1 = inlined_call_operand.vmem [shape: bf16[3,32,32], index: 1, kind: input, shape index: {}]   ;;  %s4084_s2 = inlined_call_operand.vmem [shape: f32[1,32], index: 2, kind: input, shape index: {}]   ;;  %s4085_s3 = inlined_call_operand.vmem [shape: bf16[3,32,16], index: 3, kind: input, shape index: {}]   ;;  %s4086_s4 = inlined_call_operand.vmem [shape: f32[1,16], index: 4, kind: input, shape index: {}]   ;;  %s4087_s5 = inlined_call_operand.vmem [shape: bf16[3,16,8], index: 5, kind: input, shape index: {}]   ;;  %s4088_s6 = inlined_call_operand.vmem [shape: f32[1,8], index: 6, kind: input, shape index: {}]   ;;  %s4089_s7 = inlined_call_operand.vmem [shape: f32[3,1,8], index: 7, kind: input, shape index: {}]   ;;  %s4090_s8 = inlined_call_operand.<no memory space> [shape: f32[1,1], index: 8, kind: input, shape index: {}]   ;;  %s4091_s9 = inlined_call_operand.hbm [shape: f32[2,1,128], index: 9, kind: output, shape index: {}]  }
   0x1   :  { %v14_v0 = vstv %s4090_s8 }
   0x2   :  { %15 = vst [vmem:[#allocation2] sm:$0x1] %v14_v0 }
   0x3   :  { %16 = vsyncpa [#allocation4], 0 }
   0x4   :  { %18 = vsyncpa [#allocation4 + $0x1], 0  ;;  %s3325_s11 = smov 0   ;;  %s3327_s12 = smov 0  }
   0x5   :  { %s3329_s13 = smov 0   ;;  %s3331_s14 = smov 0  }
   0x6 LB: > { %s3346_s8 = sadd.s32 4294967295, %s3266_s14   ;;  %s2526_s15 = sadd.s32 4294967294, %s3266_s14   ;;  %s3266_s14 = sphi %s3331_s14, %s4097_s14   ;;  %s3262_s13 = sphi %s3329_s13, %s4096_s13   ;;  %s3258_s12 = sphi %s3327_s12, %s4095_s12   ;;  %s3254_s11 = sphi %s3325_s11, %s4094_s11  }
   0x7   : > { %s3350_s16 = sadd.s32 1, %s3266_s14   ;;  %s225_s17 = sadd.s32 1, %s3262_s13 }
   0x8   : > { %s222_s18 = ssub.s32 %s3266_s14, %s3350_s16  ;;  %p235_p0 = scmp.ne.s32.totalorder %s3262_s13, %s3258_s12 }
   0x9   : > { %p223_p1 = scmp.eq.s32.totalorder %s222_s18, 0  ;;  %p236_p2 = scmp.eq.s32.totalorder %s3346_s8, 1 }
   0xa   : > { %p241_p3 = scmp.ne.s32.totalorder %s3258_s12, %s3254_s11  ;;  %p242_p4 = scmp.eq.s32.totalorder %s2526_s15, 1 }
   0xb   : > { %s3361_s19 = scalar_select %p223_p1, %s3262_s13, %s225_s17  }
   0xc   : > { %p3363_p5 = por %p236_p2, %p235_p0  ;;  %p3367_p6 = por %p242_p4, %p241_p3 }
   0xd   : > { %p2529_p7 = scmp.ge.s32.totalorder %s3266_s14, 1  ;;  %p292_p8 = scmp.lt.s32.totalorder %s3266_s14, 3 }
   0xf   : > { %p293_p9 = pnand %p2529_p7, %p292_p8 }
  0x10   : > { %p327_p10 = scmp.lt.s32.totalorder (!%p293_p9), %s3346_s8, 1  ;;  %s325_s30 = sand.u32 (!%p293_p9), 1, %s3258_s12  }
  0x11   : > { %296 = sbr.rel (%p293_p9) target bundleno = 1508 (0x5e4), region = 56  ;;  %s326_s15 = scalar_lea.vmem (!%p293_p9), [#allocation3], %s325_s30 }
  0x12   : > { %s2471_s17 = sshll.u32 (!%p293_p9), %s326_s15, 4  ;;  %s2459_s24 = scalar_lea.sflag (!%p293_p9), [#allocation4], %s325_s30  ;;  %s2472_s17 = int_to_ptr.vmem [resolvable:$true] %s2471_s17 }
  0x13   : > { %s3206_s25 = scalar_lea.vmem (!%p293_p9), %s2472_s17, 16  ;;  %s3271_s26 = smov (!%p293_p9), [#allocation3]  }
  0x14   : > { %p3207_p11 = scmp.ne.s32.totalorder (!%p293_p9), %s2472_s17, %s3206_s25  ;;  %s3210_s27 = sshll.u32 (!%p293_p9), %s3271_s26, 4  ;;  %s3211_s27 = int_to_ptr.vmem [resolvable:$false] %s3210_s27 }
  0x15   : > { %p3213_p0 = scmp.lt.s32.totalorder (!%p293_p9), %s2472_s17, %s3211_s27 }
  0x16   : > { %v3189_v1 = vld [vmem:[%s4083_s1 + $0x18] sm:$0xff]   ;;  %v3190_v2 = vld [vmem:[%s4083_s1 + $0x8] sm:$0xff]   ;;  %v3191_v3 = vld [vmem:[%s4083_s1 + $0x10] sm:$0xff]   ;;  %s328_s28 = scalar_select %p327_p10, %s3346_s8, 1  ;;  %vm392_vm0 = vcmask 261120   ;;  %vm341_vm1 = vcmask 1040384   ;;  %v616_v33 = vlaneseq }
  0x17   : > { %2851 = vmatprep.subr.bf16.mxu0 %v3189_v1  ;;  %2859 = vmatprep.subr.bf16.mxu1 %v3190_v2  ;;  %v3192_v4 = vld [vmem:[%s4083_s1] sm:$0xff]   ;;  %v3193_v5 = vld [vmem:[%s4083_s1 + $0x28] sm:$0xff]   ;;  %vm354_vm2 = vcmask 1046528   ;;  %v3268_v38 = vmov 0.0   ;;  %p3208_p12 = pnand %p3207_p11, %p3363_p5 }
  0x18   : > { %2852 = vmatpush3.bf16.msra.mxu0 %v3189_v1  ;;  %2860 = vmatpush3.bf16.msra.mxu1 %v3190_v2  ;;  %s2706_s10 = sshll.u32 %s328_s28, 5  ;;  %v3194_v20 = vld [vmem:[%s4083_s1 + $0x20] sm:$0xff]   ;;  %v626_v34 = vand.u32 127, %v616_v33  ;;  %v3412_v36 = vshrl.u32 %v616_v33, 7 }
  0x19   : > { %2853 = vmatprep.subr.bf16.mxu0 %v3191_v3  ;;  %2861 = vmatprep.subr.bf16.mxu1 %v3192_v4  ;;  %s331_s23 = scalar_lea.vmem %s4082_s0, %s2706_s10  ;;  %v2552_v52 = vld [vmem:[%s4084_s2] ss:$0 sm:$0xff]  ;;  %s2703_s10 = sshll.u32 %s3346_s8, 4 }
  0x1a   : > { %v333_v6 = vld [vmem:[%s331_s23] sm:$0xff]  ;;  %v334_v7 = vld [vmem:[%s331_s23 + $0x8] sm:$0xff]  ;;  %v335_v8 = vld [vmem:[%s331_s23 + $0x10] sm:$0xff]  ;;  %v3410_v35 = vmul.u32 2, %v626_v34  ;;  %v618_v61 = vadd.s32 8, %v3412_v36  ;;  %v619_v1 = vadd.s32 16, %v3412_v36  ;;  %p3209_p13 = pneg %p3208_p12 }
  0x1b   : > { %v343_v9 = vrot.slane %v334_v7, 7  ;;  %v355_v10 = vrot.slane %v333_v6, 1  ;;  %v356_v11 = vrot.slane %v334_v7, 1  ;;  %v373_v12 = vpack.c.bf16 %v334_v7, %v333_v6  ;;  %v336_v13 = vld [vmem:[%s331_s23 + $0x18] sm:$0xff]  ;;  %s4047_s23 = scalar_lea.hbm %s4091_s9, %s2703_s10  ;;  %s3212_s8 = scalar_lea.vmem %s3211_s27, 32 }
  0x1c   : > { %2854 = vmatpush3.bf16.msra.mxu0 %v3191_v3  ;;  %2862 = vmatpush3.bf16.msra.mxu1 %v3192_v4  ;;  %v345_v14 = vrot.slane %v335_v8, 7  ;;  %v347_v15 = vrot.slane %v336_v13, 7  ;;  %v358_v16 = vrot.slane %v335_v8, 1  ;;  %v360_v17 = vrot.slane %v336_v13, 1  ;;  %p3214_p1 = scmp.lt.s32.totalorder %s3212_s8, %s3206_s25 }
  0x1d   : > { %2867 = vmatprep.subr.bf16.mxu0 %v3193_v5  ;;  %2855 = vmatprep.mubr.msk.bf16.mxu0 %vm392_vm0, %v373_v12  ;;  %v374_v18 = vpack.c.bf16 %v336_v13, %v335_v8  ;;  %v342_v19 = vrot.slane %v333_v6, 7  ;;  %v357_v21 = vsel %vm354_vm2, %v355_v10, %v356_v11  ;;  %v3415_v37 = vadd.s32 1, %v3410_v35 }
  0x1e   : > { %v346_v22 = vsel %vm341_vm1, %v343_v9, %v345_v14  ;;  %v348_v23 = vsel %vm341_vm1, %v345_v14, %v347_v15  ;;  %v359_v24 = vsel %vm354_vm2, %v356_v11, %v358_v16  ;;  %v361_v30 = vsel %vm354_vm2, %v358_v16, %v360_v17  ;;  %p3215_p2 = por %p3214_p1, %p3213_p0 }
  0x1f   : > { %2856 = vmatmul.mubr.msk.bf16.vlgmr.msra.gmra.mxu0 %vm392_vm0, %v374_v18  ;;  %v344_v25 = vsel %vm341_vm1, %v342_v19, %v343_v9  ;;  %v353_v26 = vsel %vm341_vm1, 0.0, %v342_v19  ;;  %v368_v27 = vpack.c.bf16 %v348_v23, %v346_v22  ;;  %v515_v28 = vpack.c.bf16 %v359_v24, %v357_v21  ;;  %v3195_v23 = vld [vmem:[%s4085_s3 + $0x18] sm:$0xff]   ;;  %v3196_v24 = vld [vmem:[%s4085_s3 + $0x8] sm:$0xff]  }
  0x20   : > { %v367_v29 = vpack.c.bf16 %v344_v25, %v353_v26  ;;  %2868 = vmatpush3.bf16.msra.mxu0 %v3193_v5  ;;  %v366_v31 = vsel %vm354_vm2, %v360_v17, 0.0  ;;  %vm628_vm3 = vcmp.eq.s32.totalorder %v3412_v36, %v3410_v35  ;;  %vm637_vm4 = vcmp.eq.s32.totalorder %v3412_v36, %v3415_v37  ;;  %v3197_v25 = vld [vmem:[%s4085_s3 + $0x10] sm:$0xff]   ;;  %v3198_v26 = vld [vmem:[%s4085_s3] sm:$0xff]   ;;  %p3216_p3 = pnand %p3215_p2, %p3209_p13 }
  0x21   : > { %2869 = vmatprep.subr.bf16.mxu0 %v3194_v20  ;;  %2871 = vmatprep.mubr.msk.bf16.mxu0 %vm392_vm0, %v515_v28  ;;  %v516_v32 = vpack.c.bf16 %v366_v31, %v361_v30  ;;  %vm645_vm5 = vmor %vm628_vm3, %vm637_vm4  ;;  %vm629_vm8 = vcmp.eq.s32.totalorder %v618_v61, %v3410_v35  ;;  %vm638_vm9 = vcmp.eq.s32.totalorder %v618_v61, %v3415_v37  ;;  %v620_v7 = vadd.s32 24, %v3412_v36 }
  0x22   : > { %2863 = vmatprep.mubr.msk.bf16.mxu1 %vm392_vm0, %v367_v29  ;;  %v3422_v39 = vsel %vm645_vm5, 1.0, %v3268_v38  ;;  %vm630_vm11 = vcmp.eq.s32.totalorder %v619_v1, %v3410_v35  ;;  %vm639_vm12 = vcmp.eq.s32.totalorder %v619_v1, %v3415_v37  ;;  %v621_v8 = vadd.s32 32, %v3412_v36  ;;  %vm646_vm14 = vmor %vm629_vm8, %vm638_vm9 }
  0x23   : > { %2864 = vmatmul.mubr.msk.bf16.vlgmr.msra.gmra.mxu1 %vm392_vm0, %v368_v27  ;;  %vm647_vm15 = vmor %vm630_vm11, %vm639_vm12  ;;  %vm631_vm3 = vcmp.eq.s32.totalorder %v620_v7, %v3410_v35  ;;  %vm640_vm4 = vcmp.eq.s32.totalorder %v620_v7, %v3415_v37  ;;  %v622_v12 = vadd.s32 40, %v3412_v36  ;;  %v623_v13 = vadd.s32 48, %v3412_v36  ;;  %v3199_v27 = vld [vmem:[%s4085_s3 + $0x28] sm:$0xff]  }
  0x24   : > { %2870 = vmatpush3.bf16.msra.mxu0 %v3194_v20  ;;  %2883 = vmatprep.mubr.msk.f32.mxu1 %vm392_vm0, %v3422_v39  ;;  %vm632_vm5 = vcmp.eq.s32.totalorder %v621_v8, %v3410_v35  ;;  %v3446_v15 = vsel %vm646_vm14, 1.0, %v3268_v38  ;;  %v3449_v16 = vsel %vm647_vm15, 1.0, %v3268_v38  ;;  %v624_v17 = vadd.s32 56, %v3412_v36 }
  0x25   : > { %vm633_vm9 = vcmp.eq.s32.totalorder %v622_v12, %v3410_v35  ;;  %vm634_vm11 = vcmp.eq.s32.totalorder %v623_v13, %v3410_v35  ;;  %vm643_vm12 = vcmp.eq.s32.totalorder %v623_v13, %v3415_v37  ;;  %2895 = vmatprep.subr.bf16.mxu0 %v3195_v23 }
  0x26   : > { %vm651_vm14 = vmor %vm634_vm11, %vm643_vm12  ;;  %vm635_vm15 = vcmp.eq.s32.totalorder %v624_v17, %v3410_v35 }
  0x27   : > { %2872 = vmatmul.mubr.msk.bf16.vlgmr.msra.gmra.mxu0 %vm392_vm0, %v516_v32  ;;  %v3476_v21 = vsel %vm651_vm14, 1.0, %v3268_v38 }
  0x28   : > { %2896 = vmatpush3.bf16.msra.mxu0 %v3195_v23 }
  0x29   : > { %2897 = vmatprep.subr.bf16.mxu0 %v3197_v25 }
  0x2c   : > { %2898 = vmatpush3.bf16.msra.mxu0 %v3197_v25 }
  0x2d   : > { %2919 = vmatprep.subr.bf16.mxu0 %v3199_v27 }
  0xdf   : > { %v2857_v40 = vpop.f32.mrf.mxu0 }
  0xe1   : > { %v433_v41 = vpop.f32.mrf.mxu0 }
  0xe3   : > { %v2865_v42 = vpop.f32.mrf.mxu1  ;;  %v2858_v43 = vpop.f32.mrf.mxu0 }
  0xe4   : > { %v509_v46 = vadd.f32 %v2865_v42, %v2857_v40 }
  0xe5   : > { %v500_v44 = vpop.f32.mrf.mxu1  ;;  %v436_v45 = vpop.f32.mrf.mxu0 }
  0xe6   : > { %v501_v50 = vadd.f32 %v500_v44, %v433_v41 }
  0xe7   : > { %v2866_v47 = vpop.f32.mrf.mxu1  ;;  %v2873_v48 = vpop.f32.mrf.mxu0 }
  0xe8   : > { %v591_v49 = vadd.f32 %v2873_v48, %v509_v46  ;;  %v512_v54 = vadd.f32 %v2866_v47, %v2858_v43  ;;  %v3200_v46 = vld [vmem:[%s4085_s3 + $0x20] sm:$0xff]  }
  0xe9   : > { %v503_v51 = vpop.f32.mrf.mxu1  ;;  %v574_v53 = vpop.f32.mrf.mxu0 }
  0xea   : > { %v589_v55 = vadd.f32 %v574_v53, %v501_v50  ;;  %v504_v57 = vadd.f32 %v503_v51, %v436_v45  ;;  %v602_v58 = vadd.f32 %v2552_v52, %v591_v49 }
  0xeb   : > { %v2874_v56 = vpop.f32.mrf.mxu0 }
  0xec   : > { %v592_v59 = vadd.f32 %v2874_v56, %v512_v54  ;;  %v600_v0 = vadd.f32 %v2552_v52, %v589_v55  ;;  %v610_v4 = vmul.f32 0.1, %v602_v58  ;;  %vm606_vm7 = vcmp.ge.f32.partialorder %v602_v58, 0.0 }
  0xed   : > { %v577_v60 = vpop.f32.mrf.mxu0 }
  0xee   : > { %v603_v62 = vadd.f32 %v2552_v52, %v592_v59  ;;  %v590_v63 = vadd.f32 %v577_v60, %v504_v57  ;;  %v614_v9 = vsel %vm606_vm7, %v602_v58, %v610_v4  ;;  %v608_v10 = vmul.f32 0.1, %v600_v0  ;;  %vm648_vm7 = vmor %vm631_vm3, %vm640_vm4 }
  0xef   : > { %vm604_vm13 = vcmp.ge.f32.partialorder %v600_v0, 0.0  ;;  %v3461_v18 = vsel %vm648_vm7, 1.0, %v3268_v38  ;;  %vm644_vm3 = vcmp.eq.s32.totalorder %v624_v17, %v3415_v37 }
  0xf0   : > { %v601_v2 = vadd.f32 %v2552_v52, %v590_v63  ;;  %vm607_vm6 = vcmp.ge.f32.partialorder %v603_v62, 0.0  ;;  %v611_v3 = vmul.f32 0.1, %v603_v62  ;;  %v612_v14 = vsel %vm604_vm13, %v600_v0, %v608_v10  ;;  %vm652_vm4 = vmor %vm635_vm15, %vm644_vm3 }
  0xf1   : > { %v3483_v22 = vsel %vm652_vm4, 1.0, %v3268_v38 }
  0xf2   : > { %v615_v5 = vsel %vm607_vm6, %v603_v62, %v611_v3  ;;  %v609_v6 = vmul.f32 0.1, %v601_v2  ;;  %vm605_vm10 = vcmp.ge.f32.partialorder %v601_v2, 0.0  ;;  %vm641_vm6 = vcmp.eq.s32.totalorder %v621_v8, %v3415_v37 }
  0xf3   : > { %2875 = vmatprep.subr.mxu1 %v615_v5  ;;  %vm649_vm8 = vmor %vm632_vm5, %vm641_vm6  ;;  %vm1242_vm5 = vcmask 523264  }
  0xf4   : > { %2876 = vmatpush3.msra.mxu1 %v615_v5  ;;  %v613_v11 = vsel %vm605_vm10, %v601_v2, %v609_v6  ;;  %vm642_vm10 = vcmp.eq.s32.totalorder %v622_v12, %v3415_v37  ;;  %v3464_v19 = vsel %vm649_vm8, 1.0, %v3268_v38 }
  0xf5   : > { %2877 = vmatprep.subr.mxu1 %v614_v9  ;;  %vm650_vm13 = vmor %vm633_vm9, %vm642_vm10 }
  0xf6   : > { %2878 = vmatpush3.msra.mxu1 %v614_v9  ;;  %v3473_v20 = vsel %vm650_vm13, 1.0, %v3268_v38 }
  0xf7   : > { %2879 = vmatprep.subr.mxu1 %v613_v11 }
  0xf8   : > { %2880 = vmatpush3.msra.mxu1 %v613_v11 }
  0xf9   : > { %2881 = vmatprep.subr.mxu1 %v612_v14 }
  0xfa   : > { %2882 = vmatpush3.msra.mxu1 %v612_v14 }
  0xfb   : > { %2884 = vmatmul.mubr.msk.f32.vlgmr.msra.gmra.mxu1 %vm392_vm0, %v3446_v15  ;;  %2907 = vmatprep.subr.bf16.mxu1 %v3196_v24 }
  0xfc   : > { %2886 = vmatprep.mubr.msk.f32.mxu1 %vm392_vm0, %v3449_v16  ;;  %2908 = vmatpush3.bf16.msra.mxu1 %v3196_v24 }
  0xfd   : > { %2909 = vmatprep.subr.bf16.mxu1 %v3198_v26 }
  0xff   : > { %2887 = vmatmul.mubr.msk.f32.gmra.mxu1 %vm392_vm0, %v3461_v18 }
 0x100   : > { %2889 = vmatprep.mubr.msk.f32.mxu1 %vm392_vm0, %v3464_v19  ;;  %2910 = vmatpush3.bf16.msra.mxu1 %v3198_v26 }
 0x103   : > { %2890 = vmatmul.mubr.msk.f32.gmra.mxu1 %vm392_vm0, %v3473_v20 }
 0x104   : > { %2892 = vmatprep.mubr.msk.f32.mxu1 %vm392_vm0, %v3476_v21 }
 0x107   : > { %2893 = vmatmul.mubr.msk.f32.gmra.mxu1 %vm392_vm0, %v3483_v22 }
 0x1bb   : > { %v2885_v28 = vpop.f32.mrf.mxu1 }
 0x1bc   : > { %v807_v30 = vrot.slane %v2885_v28, 7  ;;  %v831_v51 = vrot.slane %v2885_v28, 1 }
 0x1bd   : > { %v759_v29 = vpop.f32.mrf.mxu1 }
 0x1be   : > { %v806_v31 = vrot.slane %v759_v29, 7  ;;  %v862_v32 = vpack.c.bf16 %v2885_v28, %v759_v29  ;;  %v830_v54 = vrot.slane %v759_v29, 1  ;;  %v1200_v29 = vadd.s32 112, %v3412_v36 }
 0x1bf   : > { %v2888_v33 = vpop.f32.mrf.mxu1 }
 0x1c0   : > { %v808_v34 = vsel %vm341_vm1, %v806_v31, %v807_v30  ;;  %v829_v40 = vsel %vm341_vm1, 0.0, %v806_v31  ;;  %2899 = vmatprep.mubr.msk.bf16.mxu0 %vm392_vm0, %v862_v32  ;;  %v811_v43 = vrot.slane %v2888_v33, 7  ;;  %v832_v0 = vsel %vm354_vm2, %v830_v54, %v831_v51 }
 0x1c1   : > { %v854_v41 = vpack.c.bf16 %v808_v34, %v829_v40  ;;  %v769_v42 = vpop.f32.mrf.mxu1  ;;  %v835_v9 = vrot.slane %v2888_v33, 1  ;;  %vm1208_vm6 = vcmp.eq.s32.totalorder %v1200_v29, %v3410_v35  ;;  %vm1216_vm7 = vcmp.eq.s32.totalorder %v1200_v29, %v3415_v37 }
 0x1c2   : > { %v809_v44 = vrot.slane %v769_v42, 7  ;;  %v863_v45 = vpack.c.bf16 %v2888_v33, %v769_v42  ;;  %v833_v50 = vrot.slane %v769_v42, 1  ;;  %vm1224_vm8 = vmor %vm1208_vm6, %vm1216_vm7 }
 0x1c3   : > { %v2891_v47 = vpop.f32.mrf.mxu1  ;;  %2911 = vmatprep.mubr.msk.bf16.mxu1 %vm392_vm0, %v854_v41 }
 0x1c4   : > { %v810_v48 = vsel %vm341_vm1, %v807_v30, %v809_v44  ;;  %v812_v49 = vsel %vm341_vm1, %v809_v44, %v811_v43  ;;  %2900 = vmatmul.mubr.msk.bf16.vlgmr.msra.gmra.mxu0 %vm392_vm0, %v863_v45  ;;  %v815_v55 = vrot.slane %v2891_v47, 7  ;;  %v834_v59 = vsel %vm354_vm2, %v831_v51, %v833_v50 }
 0x1c5   : > { %v855_v52 = vpack.c.bf16 %v812_v49, %v810_v48  ;;  %v779_v53 = vpop.f32.mrf.mxu1  ;;  %2920 = vmatpush3.bf16.msra.mxu0 %v3199_v27  ;;  %v1049_v5 = vpack.c.bf16 %v834_v59, %v832_v0  ;;  %v839_v11 = vrot.slane %v2891_v47, 1  ;;  %v836_v14 = vsel %vm354_vm2, %v833_v50, %v835_v9 }
 0x1c6   : > { %v813_v56 = vrot.slane %v779_v53, 7  ;;  %v864_v57 = vpack.c.bf16 %v2891_v47, %v779_v53  ;;  %2921 = vmatprep.subr.bf16.mxu0 %v3200_v46  ;;  %v837_v4 = vrot.slane %v779_v53, 1  ;;  %v2602_v30 = vsel %vm1224_vm8, 1.0, %v3268_v38 }
 0x1c7   : > { %v2894_v58 = vpop.f32.mrf.mxu1  ;;  %2912 = vmatmul.mubr.msk.bf16.vlgmr.msra.gmra.mxu1 %vm392_vm0, %v855_v52 }
 0x1c8   : > { %v814_v60 = vsel %vm341_vm1, %v811_v43, %v813_v56  ;;  %v816_v61 = vsel %vm341_vm1, %v813_v56, %v815_v55  ;;  %2903 = vmatprep.mubr.msk.bf16.mxu0 %vm392_vm0, %v864_v57  ;;  %v819_v1 = vrot.slane %v2894_v58, 7  ;;  %v838_v12 = vsel %vm354_vm2, %v835_v9, %v837_v4 }
 0x1c9   : > { %v789_v62 = vpop.f32.mrf.mxu1  ;;  %v856_v63 = vpack.c.bf16 %v816_v61, %v814_v60  ;;  %2922 = vmatpush3.bf16.msra.mxu0 %v3200_v46  ;;  %v840_v17 = vsel %vm354_vm2, %v837_v4, %v839_v11  ;;  %v1050_v23 = vpack.c.bf16 %v838_v12, %v836_v14  ;;  %v843_v25 = vrot.slane %v2894_v58, 1  ;;  %v2595_v61 = vld [vmem:[%s4086_s4] ss:$0 sm:$0xff] }
 0x1ca   : > { %v817_v2 = vrot.slane %v789_v62, 7  ;;  %v865_v3 = vpack.c.bf16 %v2894_v58, %v789_v62  ;;  %v841_v8 = vrot.slane %v789_v62, 1 }
 0x1cb   : > { %2915 = vmatprep.mubr.msk.bf16.mxu1 %vm392_vm0, %v856_v63  ;;  %v853_v27 = vsel %vm354_vm2, %v843_v25, 0.0 }
 0x1cc   : > { %v818_v6 = vsel %vm341_vm1, %v815_v55, %v817_v2  ;;  %v820_v7 = vsel %vm341_vm1, %v817_v2, %v819_v1  ;;  %2904 = vmatmul.mubr.msk.bf16.gmra.mxu0 %vm392_vm0, %v865_v3  ;;  %v842_v13 = vsel %vm354_vm2, %v839_v11, %v841_v8  ;;  %v844_v26 = vsel %vm354_vm2, %v841_v8, %v843_v25 }
 0x1cd   : > { %2923 = vmatprep.mubr.msk.bf16.mxu0 %vm392_vm0, %v1049_v5  ;;  %v857_v10 = vpack.c.bf16 %v820_v7, %v818_v6  ;;  %v1051_v24 = vpack.c.bf16 %v842_v13, %v840_v17  ;;  %v1052_v28 = vpack.c.bf16 %v853_v27, %v844_v26 }
 0x1cf   : > { %2916 = vmatmul.mubr.msk.bf16.gmra.mxu1 %vm392_vm0, %v857_v10 }
 0x1d0   : > { %2968 = vmatprep.mubr.msk.f32.mxu1 %vm1242_vm5, %v2602_v30 }
 0x1d4   : > { %2924 = vmatmul.mubr.msk.bf16.vlgmr.msra.gmra.mxu0 %vm392_vm0, %v1050_v23 }
 0x1d5   : > { %2927 = vmatprep.mubr.msk.bf16.mxu0 %vm392_vm0, %v1051_v24 }
 0x1dc   : > { %2928 = vmatmul.mubr.msk.bf16.gmra.mxu0 %vm392_vm0, %v1052_v28 }
 0x1dd   : > { %2947 = vmatprep.mubr.msk.f32.mxu0 %vm1242_vm5, %v3422_v39 }
 0x284   : > { %v2901_v31 = vpop.f32.mrf.mxu0 }
 0x286   : > { %v929_v32 = vpop.f32.mrf.mxu0 }
 0x287   : > { %v2913_v33 = vpop.f32.mrf.mxu1 }
 0x288   : > { %v2902_v34 = vpop.f32.mrf.mxu0  ;;  %v1027_v4 = vadd.f32 %v2913_v33, %v2901_v31 }
 0x289   : > { %v1018_v40 = vpop.f32.mrf.mxu1 }
 0x28a   : > { %v932_v41 = vpop.f32.mrf.mxu0  ;;  %v1019_v17 = vadd.f32 %v1018_v40, %v929_v32 }
 0x28b   : > { %v2914_v42 = vpop.f32.mrf.mxu1 }
 0x28c   : > { %v2905_v43 = vpop.f32.mrf.mxu0  ;;  %v1030_v0 = vadd.f32 %v2914_v42, %v2902_v34  ;;  %v1201_v34 = vadd.s32 120, %v3412_v36 }
 0x28d   : > { %v1021_v39 = vpop.f32.mrf.mxu1 }
 0x28e   : > { %v945_v44 = vpop.f32.mrf.mxu0  ;;  %v1022_v9 = vadd.f32 %v1021_v39, %v932_v41  ;;  %vm1209_vm14 = vcmp.eq.s32.totalorder %v1201_v34, %v3410_v35  ;;  %vm1217_vm15 = vcmp.eq.s32.totalorder %v1201_v34, %v3415_v37 }
 0x28f   : > { %v2917_v46 = vpop.f32.mrf.mxu1  ;;  %vm1225_vm6 = vmor %vm1209_vm14, %vm1217_vm15 }
 0x290   : > { %v2906_v45 = vpop.f32.mrf.mxu0  ;;  %v1043_v54 = vadd.f32 %v2917_v46, %v2905_v43 }
 0x291   : > { %v1034_v49 = vpop.f32.mrf.mxu1 }
 0x292   : > { %v948_v47 = vpop.f32.mrf.mxu0  ;;  %v1035_v59 = vadd.f32 %v1034_v49, %v945_v44  ;;  %v3201_v49 = vld [vmem:[%s4087_s5 + $0x8] sm:$0xff]  }
 0x293   : > { %v2918_v52 = vpop.f32.mrf.mxu1 }
 0x294   : > { %v2925_v48 = vpop.f32.mrf.mxu0  ;;  %v1046_v60 = vadd.f32 %v2918_v52, %v2906_v45  ;;  %v1199_v52 = vadd.s32 104, %v3412_v36 }
 0x295   : > { %v1037_v57 = vpop.f32.mrf.mxu1  ;;  %v1149_v10 = vadd.f32 %v2925_v48, %v1027_v4  ;;  %v2603_v48 = vsel %vm1225_vm6, 1.0, %v3268_v38 }
 0x296   : > { %v1116_v50 = vpop.f32.mrf.mxu0  ;;  %v1038_v1 = vadd.f32 %v1037_v57, %v948_v47 }
 0x297   : > { %v1164_v27 = vadd.f32 %v2595_v61, %v1149_v10  ;;  %v1147_v28 = vadd.f32 %v1116_v50, %v1019_v17  ;;  %v1194_v50 = vadd.s32 64, %v3412_v36 }
 0x298   : > { %v2926_v51 = vpop.f32.mrf.mxu0 }
 0x299   : > { %v1150_v6 = vadd.f32 %v2926_v51, %v1030_v0  ;;  %v1180_v40 = vmul.f32 0.1, %v1164_v27  ;;  %v1162_v41 = vadd.f32 %v2595_v61, %v1147_v28  ;;  %vm1172_vm13 = vcmp.ge.f32.partialorder %v1164_v27, 0.0 }
 0x29a   : > { %v1119_v53 = vpop.f32.mrf.mxu0  ;;  %v1195_v51 = vadd.s32 72, %v3412_v36  ;;  %vm1202_vm7 = vcmp.eq.s32.totalorder %v1194_v50, %v3410_v35  ;;  %vm1210_vm8 = vcmp.eq.s32.totalorder %v1194_v50, %v3415_v37 }
 0x29b   : > { %v1165_v23 = vadd.f32 %v2595_v61, %v1150_v6  ;;  %v1148_v24 = vadd.f32 %v1119_v53, %v1022_v9  ;;  %v1178_v44 = vmul.f32 0.1, %v1162_v41  ;;  %v1188_v45 = vsel %vm1172_vm13, %v1164_v27, %v1180_v40 }
 0x29c   : > { %v2929_v55 = vpop.f32.mrf.mxu0  ;;  %vm1170_vm4 = vcmp.ge.f32.partialorder %v1162_v41, 0.0 }
 0x29d   : > { %v1153_v56 = vadd.f32 %v2929_v55, %v1043_v54  ;;  %v1181_v31 = vmul.f32 0.1, %v1165_v23  ;;  %v1163_v33 = vadd.f32 %v2595_v61, %v1148_v24  ;;  %vm1173_vm12 = vcmp.ge.f32.partialorder %v1165_v23, 0.0 }
 0x29e   : > { %v1132_v58 = vpop.f32.mrf.mxu0  ;;  %v1186_v47 = vsel %vm1170_vm4, %v1162_v41, %v1178_v44 }
 0x29f   : > { %v1168_v62 = vadd.f32 %v2595_v61, %v1153_v56  ;;  %v1151_v2 = vadd.f32 %v1132_v58, %v1035_v59  ;;  %v1179_v43 = vmul.f32 0.1, %v1163_v33  ;;  %v1189_v39 = vsel %vm1173_vm12, %v1165_v23, %v1181_v31 }
 0x2a0   : > { %v2930_v63 = vpop.f32.mrf.mxu0  ;;  %vm1171_vm3 = vcmp.ge.f32.partialorder %v1163_v33, 0.0 }
 0x2a1   : > { %v1154_v3 = vadd.f32 %v2930_v63, %v1046_v60  ;;  %v1184_v11 = vmul.f32 0.1, %v1168_v62  ;;  %v1166_v12 = vadd.f32 %v2595_v61, %v1151_v2  ;;  %vm1176_vm9 = vcmp.ge.f32.partialorder %v1168_v62, 0.0 }
 0x2a2   : > { %v1135_v5 = vpop.f32.mrf.mxu0  ;;  %v1187_v46 = vsel %vm1171_vm3, %v1163_v33, %v1179_v43 }
 0x2a3   : > { %v1169_v7 = vadd.f32 %v2595_v61, %v1154_v3  ;;  %v1152_v8 = vadd.f32 %v1135_v5, %v1038_v1  ;;  %v1182_v29 = vmul.f32 0.1, %v1166_v12  ;;  %v1192_v30 = vsel %vm1176_vm9, %v1168_v62, %v1184_v11 }
 0x2a4   : > { %vm1174_vm11 = vcmp.ge.f32.partialorder %v1166_v12, 0.0  ;;  %vm1203_vm9 = vcmp.eq.s32.totalorder %v1195_v51, %v3410_v35 }
 0x2a5   : > { %v1185_v13 = vmul.f32 0.1, %v1169_v7  ;;  %v1167_v14 = vadd.f32 %v2595_v61, %v1152_v8  ;;  %vm1177_vm0 = vcmp.ge.f32.partialorder %v1169_v7, 0.0  ;;  %v1190_v42 = vsel %vm1174_vm11, %v1166_v12, %v1182_v29 }
 0x2a7   : > { %v1183_v25 = vmul.f32 0.1, %v1167_v14  ;;  %v1193_v26 = vsel %vm1177_vm0, %v1169_v7, %v1185_v13  ;;  %vm1175_vm10 = vcmp.ge.f32.partialorder %v1167_v14, 0.0  ;;  %vm1218_vm0 = vmor %vm1202_vm7, %vm1210_vm8 }
 0x2a8   : > { %2931 = vmatprep.subr.mxu0 %v1193_v26  ;;  %3130 = vmatprep.subr.mxu1 %v1193_v26 }
 0x2a9   : > { %2932 = vmatpush3.msra.mxu0 %v1193_v26  ;;  %3138 = vmatpush3.msra.mxu1 %v1193_v26  ;;  %v1191_v32 = vsel %vm1175_vm10, %v1167_v14, %v1183_v25  ;;  %vm1211_vm10 = vcmp.eq.s32.totalorder %v1195_v51, %v3415_v37 }
 0x2aa   : > { %2933 = vmatprep.subr.mxu0 %v1192_v30  ;;  %3131 = vmatprep.subr.mxu1 %v1192_v30  ;;  %vm1219_vm13 = vmor %vm1203_vm9, %vm1211_vm10  ;;  %vm1215_vm9 = vcmp.eq.s32.totalorder %v1199_v52, %v3415_v37 }
 0x2ab   : > { %2934 = vmatpush3.msra.mxu0 %v1192_v30  ;;  %3139 = vmatpush3.msra.mxu1 %v1192_v30 }
 0x2ac   : > { %2935 = vmatprep.subr.mxu0 %v1191_v32  ;;  %3132 = vmatprep.subr.mxu1 %v1191_v32 }
 0x2ad   : > { %2936 = vmatpush3.msra.mxu0 %v1191_v32  ;;  %3140 = vmatpush3.msra.mxu1 %v1191_v32 }
 0x2ae   : > { %2937 = vmatprep.subr.mxu0 %v1190_v42  ;;  %3133 = vmatprep.subr.mxu1 %v1190_v42 }
 0x2af   : > { %2938 = vmatpush3.msra.mxu0 %v1190_v42  ;;  %3141 = vmatpush3.msra.mxu1 %v1190_v42 }
 0x2b0   : > { %2939 = vmatprep.subr.mxu0 %v1189_v39  ;;  %3134 = vmatprep.subr.mxu1 %v1189_v39 }
 0x2b1   : > { %2940 = vmatpush3.msra.mxu0 %v1189_v39  ;;  %3142 = vmatpush3.msra.mxu1 %v1189_v39 }
 0x2b2   : > { %2941 = vmatprep.subr.mxu0 %v1188_v45  ;;  %3135 = vmatprep.subr.mxu1 %v1188_v45 }
 0x2b3   : > { %2942 = vmatpush3.msra.mxu0 %v1188_v45  ;;  %3143 = vmatpush3.msra.mxu1 %v1188_v45 }
 0x2b4   : > { %2943 = vmatprep.subr.mxu0 %v1187_v46  ;;  %3136 = vmatprep.subr.mxu1 %v1187_v46 }
 0x2b5   : > { %2944 = vmatpush3.msra.mxu0 %v1187_v46  ;;  %3144 = vmatpush3.msra.mxu1 %v1187_v46 }
 0x2b6   : > { %2945 = vmatprep.subr.mxu0 %v1186_v47  ;;  %3137 = vmatprep.subr.mxu1 %v1186_v47 }
 0x2b7   : > { %2946 = vmatpush3.msra.mxu0 %v1186_v47  ;;  %3145 = vmatpush3.msra.mxu1 %v1186_v47 }
 0x2b8   : > { %2948 = vmatmul.mubr.msk.f32.vlgmr.msra.gmra.mxu0 %vm1242_vm5, %v3446_v15  ;;  %2969 = vmatmul.mubr.msk.f32.vlgmr.msra.gmra.mxu1 %vm1242_vm5, %v2603_v48  ;;  %v1196_v15 = vadd.s32 80, %v3412_v36 }
 0x2b9   : > { %2950 = vmatprep.mubr.msk.f32.mxu0 %vm1242_vm5, %v3449_v16  ;;  %2971 = vmatprep.subr.bf16.mxu0 %v3201_v49  ;;  %v1197_v16 = vadd.s32 88, %v3412_v36 }
 0x2ba   : > { %2972 = vmatpush3.bf16.msra.mxu0 %v3201_v49  ;;  %vm1204_vm11 = vcmp.eq.s32.totalorder %v1196_v15, %v3410_v35  ;;  %vm1212_vm12 = vcmp.eq.s32.totalorder %v1196_v15, %v3415_v37 }
 0x2bb   : > { %vm1220_vm14 = vmor %vm1204_vm11, %vm1212_vm12  ;;  %vm1205_vm15 = vcmp.eq.s32.totalorder %v1197_v16, %v3410_v35  ;;  %vm1213_vm3 = vcmp.eq.s32.totalorder %v1197_v16, %v3415_v37  ;;  %vm1567_vm11 = vcmask 130048  }
 0x2bc   : > { %2951 = vmatmul.mubr.msk.f32.gmra.mxu0 %vm1242_vm5, %v3461_v18  ;;  %v1198_v18 = vadd.s32 96, %v3412_v36  ;;  %vm1221_vm7 = vmor %vm1205_vm15, %vm1213_vm3 }
 0x2bd   : > { %2953 = vmatprep.mubr.msk.f32.mxu0 %vm1242_vm5, %v3464_v19  ;;  %v2596_v19 = vsel %vm1218_vm0, 1.0, %v3268_v38  ;;  %vm1207_vm0 = vcmp.eq.s32.totalorder %v1199_v52, %v3410_v35 }
 0x2be   : > { %vm1206_vm4 = vcmp.eq.s32.totalorder %v1198_v18, %v3410_v35  ;;  %vm1214_vm6 = vcmp.eq.s32.totalorder %v1198_v18, %v3415_v37  ;;  %vm1223_vm10 = vmor %vm1207_vm0, %vm1215_vm9  ;;  %v3202_v35 = vld [vmem:[%s4087_s5] sm:$0xff]   ;;  %v3203_v37 = vld [vmem:[%s4087_s5 + $0x10] sm:$0xff]   ;;  %vm2126_vm9 = vcmask 64512  }
 0x2bf   : > { %vm1222_vm8 = vmor %vm1206_vm4, %vm1214_vm6  ;;  %v2601_v54 = vsel %vm1223_vm10, 1.0, %v3268_v38  ;;  %2989 = vmatprep.subr.bf16.mxu1 %v3202_v35  ;;  %3007 = vmatprep.subr.bf16.mxu0 %v3203_v37 }
 0x2c0   : > { %2954 = vmatmul.mubr.msk.f32.gmra.mxu0 %vm1242_vm5, %v3473_v20  ;;  %v2597_v20 = vsel %vm1219_vm13, 1.0, %v3268_v38  ;;  %v2600_v53 = vsel %vm1222_vm8, 1.0, %v3268_v38  ;;  %2990 = vmatpush3.bf16.msra.mxu1 %v3202_v35 }
 0x2c1   : > { %2956 = vmatprep.mubr.msk.f32.mxu0 %vm1242_vm5, %v3476_v21  ;;  %v2598_v21 = vsel %vm1220_vm14, 1.0, %v3268_v38  ;;  %3025 = vmatprep.subr.mxu1 %v3268_v38 }
 0x2c4   : > { %2957 = vmatmul.mubr.msk.f32.gmra.mxu0 %vm1242_vm5, %v3483_v22  ;;  %v2599_v22 = vsel %vm1221_vm7, 1.0, %v3268_v38 }
 0x2c5   : > { %2959 = vmatprep.mubr.msk.f32.mxu0 %vm1242_vm5, %v2596_v19 }
 0x2c8   : > { %2960 = vmatmul.mubr.msk.f32.gmra.mxu0 %vm1242_vm5, %v2597_v20 }
 0x2c9   : > { %2962 = vmatprep.mubr.msk.f32.mxu0 %vm1242_vm5, %v2598_v21 }
 0x2cc   : > { %2963 = vmatmul.mubr.msk.f32.gmra.mxu0 %vm1242_vm5, %v2599_v22 }
 0x2cd   : > { %2965 = vmatprep.mubr.msk.f32.mxu0 %vm1242_vm5, %v2600_v53 }
 0x2d0   : > { %2966 = vmatmul.mubr.msk.f32.gmra.mxu0 %vm1242_vm5, %v2601_v54  ;;  %vm3269_vm5 = vmmov 0  }
 0x378   : > { %v3602_v55 = vpop.f32.mrf.mxu0  ;;  %v3661_v41 = vpop.f32.mrf.mxu1 }
 0x379   : > { %v1445_v57 = vrot.slane %v3602_v55, 7  ;;  %v1493_v16 = vrot.slane %v3602_v55, 1  ;;  %v1473_v52 = vrot.slane %v3661_v41, 7 }
 0x37a   : > { %v3604_v56 = vpop.f32.mrf.mxu0  ;;  %v3675_v49 = vpop.f32.mrf.mxu1 }
 0x37b   : > { %v1444_v58 = vrot.slane %v3604_v56, 7  ;;  %v1550_v59 = vpack.c.bf16 %v3602_v55, %v3604_v56  ;;  %v1492_v21 = vrot.slane %v3604_v56, 1  ;;  %v1471_v54 = vrot.slane %v3675_v49, 7 }
 0x37c   : > { %v3610_v60 = vpop.f32.mrf.mxu0 }
 0x37d   : > { %v1446_v61 = vsel %vm341_vm1, %v1444_v58, %v1445_v57  ;;  %v1491_v62 = vsel %vm341_vm1, 0.0, %v1444_v58  ;;  %2973 = vmatprep.mubr.msk.bf16.mxu0 %vm1567_vm11, %v1550_v59  ;;  %v1449_v1 = vrot.slane %v3610_v60, 7  ;;  %v1494_v58 = vsel %vm354_vm2, %v1492_v21, %v1493_v16 }
 0x37e   : > { %v1540_v63 = vpack.c.bf16 %v1446_v61, %v1491_v62  ;;  %v3615_v0 = vpop.f32.mrf.mxu0  ;;  %v1474_v59 = vsel %vm341_vm1, %v1471_v54, %v1473_v52  ;;  %v1557_v61 = vpack.c.bf16 %v3661_v41, %v3675_v49 }
 0x37f   : > { %v1447_v2 = vrot.slane %v3615_v0, 7  ;;  %v1551_v3 = vpack.c.bf16 %v3610_v60, %v3615_v0  ;;  %v1495_v50 = vrot.slane %v3615_v0, 1 }
 0x380   : > { %v3621_v4 = vpop.f32.mrf.mxu0  ;;  %2991 = vmatprep.mubr.msk.bf16.mxu1 %vm1567_vm11, %v1540_v63 }
 0x381   : > { %v1448_v5 = vsel %vm341_vm1, %v1445_v57, %v1447_v2  ;;  %v1450_v6 = vsel %vm341_vm1, %v1447_v2, %v1449_v1  ;;  %2974 = vmatmul.mubr.msk.bf16.vlgmr.msra.gmra.mxu0 %vm1567_vm11, %v1551_v3  ;;  %v1453_v9 = vrot.slane %v3621_v4, 7  ;;  %v1496_v35 = vsel %vm354_vm2, %v1493_v16, %v1495_v50 }
 0x382   : > { %v1541_v7 = vpack.c.bf16 %v1450_v6, %v1448_v5  ;;  %v3627_v8 = vpop.f32.mrf.mxu0  ;;  %3008 = vmatpush3.bf16.msra.mxu0 %v3203_v37  ;;  %v1816_v63 = vpack.c.bf16 %v1496_v35, %v1494_v58  ;;  %v1501_v3 = vrot.slane %v3621_v4, 1 }
 0x383   : > { %v1451_v10 = vrot.slane %v3627_v8, 7  ;;  %v1552_v11 = vpack.c.bf16 %v3621_v4, %v3627_v8  ;;  %3060 = vmatprep.subr.mxu0 %v3268_v38  ;;  %v1499_v62 = vrot.slane %v3627_v8, 1 }
 0x384   : > { %v3634_v12 = vpop.f32.mrf.mxu0  ;;  %2992 = vmatmul.mubr.msk.bf16.vlgmr.msra.gmra.mxu1 %vm1567_vm11, %v1541_v7 }
 0x385   : > { %v1452_v13 = vsel %vm341_vm1, %v1449_v1, %v1451_v10  ;;  %v1454_v14 = vsel %vm341_vm1, %v1451_v10, %v1453_v9  ;;  %2977 = vmatprep.mubr.msk.bf16.mxu0 %vm1567_vm11, %v1552_v11  ;;  %v1457_v24 = vrot.slane %v3634_v12, 7  ;;  %v1497_v1 = vrot.slane %v3610_v60, 1 }
 0x386   : > { %v3640_v17 = vpop.f32.mrf.mxu0  ;;  %v1542_v23 = vpack.c.bf16 %v1454_v14, %v1452_v13  ;;  %v1502_v8 = vsel %vm354_vm2, %v1499_v62, %v1501_v3  ;;  %v1505_v4 = vrot.slane %v3634_v12, 1 }
 0x387   : > { %v1455_v25 = vrot.slane %v3640_v17, 7  ;;  %v1553_v26 = vpack.c.bf16 %v3634_v12, %v3640_v17  ;;  %v1503_v0 = vrot.slane %v3640_v17, 1  ;;  %v1500_v5 = vsel %vm354_vm2, %v1497_v1, %v1499_v62 }
 0x388   : > { %v3646_v27 = vpop.f32.mrf.mxu0  ;;  %2995 = vmatprep.mubr.msk.bf16.mxu1 %vm1567_vm11, %v1542_v23  ;;  %v1498_v7 = vsel %vm354_vm2, %v1495_v50, %v1497_v1 }
 0x389   : > { %v1456_v28 = vsel %vm341_vm1, %v1453_v9, %v1455_v25  ;;  %v1458_v29 = vsel %vm341_vm1, %v1455_v25, %v1457_v24  ;;  %2978 = vmatmul.mubr.msk.bf16.gmra.mxu0 %vm1567_vm11, %v1553_v26  ;;  %v1461_v33 = vrot.slane %v3646_v27, 7  ;;  %v1504_v6 = vsel %vm354_vm2, %v1501_v3, %v1503_v0 }
 0x38a   : > { %v3652_v30 = vpop.f32.mrf.mxu0  ;;  %v1543_v31 = vpack.c.bf16 %v1458_v29, %v1456_v28  ;;  %v1817_v9 = vpack.c.bf16 %v1500_v5, %v1498_v7  ;;  %v1818_v11 = vpack.c.bf16 %v1504_v6, %v1502_v8  ;;  %v1509_v13 = vrot.slane %v3646_v27, 1 }
 0x38b   : > { %v1459_v32 = vrot.slane %v3652_v30, 7  ;;  %v1554_v34 = vpack.c.bf16 %v3646_v27, %v3652_v30  ;;  %v1507_v10 = vrot.slane %v3652_v30, 1  ;;  %v1506_v23 = vsel %vm354_vm2, %v1503_v0, %v1505_v4 }
 0x38c   : > { %v3658_v40 = vpop.f32.mrf.mxu0  ;;  %2996 = vmatmul.mubr.msk.bf16.gmra.mxu1 %vm1567_vm11, %v1543_v31  ;;  %v1519_v30 = vrot.slane %v3675_v49, 1 }
 0x38d   : > { %v1460_v42 = vsel %vm341_vm1, %v1457_v24, %v1459_v32  ;;  %v1462_v43 = vsel %vm341_vm1, %v1459_v32, %v1461_v33  ;;  %2981 = vmatprep.mubr.msk.bf16.mxu0 %vm1567_vm11, %v1554_v34  ;;  %v1465_v45 = vrot.slane %v3658_v40, 7  ;;  %v1508_v14 = vsel %vm354_vm2, %v1505_v4, %v1507_v10 }
 0x38e   : > { %v3666_v39 = vpop.f32.mrf.mxu0  ;;  %v1544_v44 = vpack.c.bf16 %v1462_v43, %v1460_v42  ;;  %v1510_v24 = vsel %vm354_vm2, %v1507_v10, %v1509_v13  ;;  %v1819_v25 = vpack.c.bf16 %v1508_v14, %v1506_v23  ;;  %v1513_v12 = vrot.slane %v3658_v40, 1  ;;  %v3753_v23 = vld [vmem:[%s4088_s6] ss:$0 sm:$0xff] }
 0x38f   : > { %v1463_v46 = vrot.slane %v3666_v39, 7  ;;  %v1555_v47 = vpack.c.bf16 %v3658_v40, %v3666_v39  ;;  %v1511_v60 = vrot.slane %v3666_v39, 1  ;;  %v1521_v42 = vrot.slane %v3661_v41, 1 }
 0x390   : > { %v3672_v48 = vpop.f32.mrf.mxu0  ;;  %2999 = vmatprep.mubr.msk.bf16.mxu1 %vm1567_vm11, %v1544_v44 }
 0x391   : > { %v1464_v51 = vsel %vm341_vm1, %v1461_v33, %v1463_v46  ;;  %v1466_v15 = vsel %vm341_vm1, %v1463_v46, %v1465_v45  ;;  %2982 = vmatmul.mubr.msk.bf16.gmra.mxu0 %vm1567_vm11, %v1555_v47  ;;  %v1469_v18 = vrot.slane %v3672_v48, 7  ;;  %v1512_v17 = vsel %vm354_vm2, %v1509_v13, %v1511_v60 }
 0x392   : > { %v1409_v19 = vpop.f32.mrf.mxu0  ;;  %v1545_v20 = vpack.c.bf16 %v1466_v15, %v1464_v51  ;;  %v1820_v28 = vpack.c.bf16 %v1512_v17, %v1510_v24  ;;  %v1517_v29 = vrot.slane %v3672_v48, 1  ;;  %v1514_v32 = vsel %vm354_vm2, %v1511_v60, %v1513_v12 }
 0x393   : > { %v1467_v22 = vrot.slane %v1409_v19, 7  ;;  %v1556_v53 = vpack.c.bf16 %v3672_v48, %v1409_v19  ;;  %v1472_v56 = vsel %vm341_vm1, %v1469_v18, %v1471_v54  ;;  %v1515_v26 = vrot.slane %v1409_v19, 1 }
 0x394   : > { %3000 = vmatmul.mubr.msk.bf16.gmra.mxu1 %vm1567_vm11, %v1545_v20  ;;  %v1547_v2 = vpack.c.bf16 %v1474_v59, %v1472_v56  ;;  %v1520_v33 = vsel %vm354_vm2, %v1517_v29, %v1519_v30  ;;  %v1539_v40 = vsel %vm354_vm2, %v1521_v42, 0.0  ;;  %v1522_v39 = vsel %vm354_vm2, %v1519_v30, %v1521_v42 }
 0x395   : > { %v1468_v37 = vsel %vm341_vm1, %v1465_v45, %v1467_v22  ;;  %v1470_v55 = vsel %vm341_vm1, %v1467_v22, %v1469_v18  ;;  %2985 = vmatprep.mubr.msk.bf16.mxu0 %vm1567_vm11, %v1556_v53  ;;  %v1516_v27 = vsel %vm354_vm2, %v1513_v12, %v1515_v26  ;;  %v1518_v31 = vsel %vm354_vm2, %v1515_v26, %v1517_v29 }
 0x396   : > { %v1546_v57 = vpack.c.bf16 %v1470_v55, %v1468_v37  ;;  %v1821_v34 = vpack.c.bf16 %v1516_v27, %v1514_v32  ;;  %v1822_v43 = vpack.c.bf16 %v1520_v33, %v1518_v31  ;;  %v1823_v44 = vpack.c.bf16 %v1539_v40, %v1522_v39 }
 0x398   : > { %3003 = vmatprep.mubr.msk.bf16.mxu1 %vm1567_vm11, %v1546_v57 }
 0x399   : > { %2986 = vmatmul.mubr.msk.bf16.gmra.mxu0 %vm1567_vm11, %v1557_v61 }
 0x39a   : > { %3009 = vmatprep.mubr.msk.bf16.mxu0 %vm1567_vm11, %v1816_v63 }
 0x39c   : > { %3004 = vmatmul.mubr.msk.bf16.gmra.mxu1 %vm1567_vm11, %v1547_v2 }
 0x39d   : > { %3057 = vmatprep.mubr.msk.f32.mxu1 %vm3269_vm5, %v3268_v38 }
 0x3a1   : > { %3010 = vmatmul.mubr.msk.bf16.vlgmr.msra.gmra.mxu0 %vm1567_vm11, %v1817_v9 }
 0x3a2   : > { %3013 = vmatprep.mubr.msk.bf16.mxu0 %vm1567_vm11, %v1818_v11 }
 0x3a9   : > { %3014 = vmatmul.mubr.msk.bf16.gmra.mxu0 %vm1567_vm11, %v1819_v25 }
 0x3aa   : > { %3017 = vmatprep.mubr.msk.bf16.mxu0 %vm1567_vm11, %v1820_v28 }
 0x3b1   : > { %3018 = vmatmul.mubr.msk.bf16.gmra.mxu0 %vm1567_vm11, %v1821_v34 }
 0x3b2   : > { %3021 = vmatprep.mubr.msk.bf16.mxu0 %vm1567_vm11, %v1822_v43 }
 0x3b9   : > { %3022 = vmatmul.mubr.msk.bf16.gmra.mxu0 %vm1567_vm11, %v1823_v44 }
 0x3ba   : > { %3092 = vmatprep.mubr.msk.f32.mxu0 %vm3269_vm5, %v3268_v38 }
 0x441   : > { %v2975_v45 = vpop.f32.mrf.mxu0 }
 0x443   : > { %v1626_v46 = vpop.f32.mrf.mxu0 }
 0x444   : > { %v2993_v47 = vpop.f32.mrf.mxu1 }
 0x445   : > { %v1762_v41 = vadd.f32 %v2993_v47, %v2975_v45  ;;  %v2976_v48 = vpop.f32.mrf.mxu0 }
 0x446   : > { %v1753_v49 = vpop.f32.mrf.mxu1 }
 0x447   : > { %v1754_v50 = vadd.f32 %v1753_v49, %v1626_v46  ;;  %v1629_v51 = vpop.f32.mrf.mxu0 }
 0x448   : > { %v2994_v15 = vpop.f32.mrf.mxu1 }
 0x449   : > { %v1765_v16 = vadd.f32 %v2994_v15, %v2976_v48  ;;  %v2979_v18 = vpop.f32.mrf.mxu0 }
 0x44a   : > { %v1756_v19 = vpop.f32.mrf.mxu1 }
 0x44b   : > { %v1757_v52 = vadd.f32 %v1756_v19, %v1629_v51  ;;  %v1642_v20 = vpop.f32.mrf.mxu0 }
 0x44c   : > { %v2997_v22 = vpop.f32.mrf.mxu1 }
 0x44d   : > { %v2980_v21 = vpop.f32.mrf.mxu0  ;;  %v1778_v11 = vadd.f32 %v2997_v22, %v2979_v18 }
 0x44e   : > { %v1769_v35 = vpop.f32.mrf.mxu1 }
 0x44f   : > { %v1645_v53 = vpop.f32.mrf.mxu0  ;;  %v1770_v13 = vadd.f32 %v1769_v35, %v1642_v20 }
 0x450   : > { %v2998_v57 = vpop.f32.mrf.mxu1 }
 0x451   : > { %v2983_v54 = vpop.f32.mrf.mxu0  ;;  %v1781_v25 = vadd.f32 %v2998_v57, %v2980_v21 }
 0x452   : > { %v1772_v59 = vpop.f32.mrf.mxu1 }
 0x453   : > { %v1658_v37 = vpop.f32.mrf.mxu0  ;;  %v1773_v32 = vadd.f32 %v1772_v59, %v1645_v53 }
 0x454   : > { %v3001_v63 = vpop.f32.mrf.mxu1 }
 0x455   : > { %v2984_v55 = vpop.f32.mrf.mxu0  ;;  %v1794_v34 = vadd.f32 %v3001_v63, %v2983_v54 }
 0x456   : > { %v1785_v2 = vpop.f32.mrf.mxu1 }
 0x457   : > { %v1661_v58 = vpop.f32.mrf.mxu0  ;;  %v1786_v47 = vadd.f32 %v1785_v2, %v1658_v37 }
 0x458   : > { %v3002_v8 = vpop.f32.mrf.mxu1 }
 0x459   : > { %v2987_v56 = vpop.f32.mrf.mxu0  ;;  %v1797_v49 = vadd.f32 %v3002_v8, %v2984_v55 }
 0x45a   : > { %v1788_v14 = vpop.f32.mrf.mxu1 }
 0x45b   : > { %v1674_v61 = vpop.f32.mrf.mxu0 }
 0x45c   : > { %v3005_v30 = vpop.f32.mrf.mxu1 }
 0x45d   : > { %v3738_v62 = vpop.f32.mrf.mxu0  ;;  %v1810_v54 = vadd.f32 %v3005_v30, %v2987_v56 }
 0x45e   : > { %v1801_v39 = vpop.f32.mrf.mxu1 }
 0x45f   : > { %v3740_v0 = vpop.f32.mrf.mxu0  ;;  %v1802_v57 = vadd.f32 %v1801_v39, %v1674_v61 }
 0x460   : > { %v3006_v20 = vpop.f32.mrf.mxu1 }
 0x461   : > { %v3011_v1 = vpop.f32.mrf.mxu0 }
 0x462   : > { %v3742_v3 = vadd.f32 %v3011_v1, %v1762_v41  ;;  %v1813_v1 = vadd.f32 %v3006_v20, %v3738_v62  ;;  %v1804_v56 = vpop.f32.mrf.mxu1 }
 0x463   : > { %v1891_v5 = vpop.f32.mrf.mxu0 }
 0x464   : > { %v3744_v6 = vadd.f32 %v1891_v5, %v1754_v50  ;;  %v1789_v50 = vadd.f32 %v1788_v14, %v1661_v58 }
 0x465   : > { %v3012_v7 = vpop.f32.mrf.mxu0 }
 0x466   : > { %v3746_v9 = vadd.f32 %v3012_v7, %v1765_v16 }
 0x467   : > { %v1894_v10 = vpop.f32.mrf.mxu0 }
 0x468   : > { %v3748_v60 = vadd.f32 %v1894_v10, %v1757_v52 }
 0x469   : > { %v3015_v4 = vpop.f32.mrf.mxu0 }
 0x46a   : > { %v1960_v17 = vadd.f32 %v3015_v4, %v1778_v11 }
 0x46b   : > { %v1907_v24 = vpop.f32.mrf.mxu0 }
 0x46c   : > { %v1983_v26 = vadd.f32 %v3753_v23, %v1960_v17  ;;  %v1958_v28 = vadd.f32 %v1907_v24, %v1770_v13 }
 0x46d   : > { %v3016_v29 = vpop.f32.mrf.mxu0 }
 0x46e   : > { %v2015_v12 = vmul.f32 0.1, %v1983_v26  ;;  %v1981_v27 = vadd.f32 %v3753_v23, %v1958_v28  ;;  %v1961_v31 = vadd.f32 %v3016_v29, %v1781_v25  ;;  %vm1999_vm12 = vcmp.ge.f32.partialorder %v1983_v26, 0.0 }
 0x46f   : > { %v1910_v33 = vpop.f32.mrf.mxu0 }
 0x470   : > { %v2013_v42 = vmul.f32 0.1, %v1981_v27  ;;  %v1984_v43 = vadd.f32 %v3753_v23, %v1961_v31  ;;  %v3758_v44 = vsel %vm1999_vm12, %v1983_v26, %v2015_v12  ;;  %vm1997_vm13 = vcmp.ge.f32.partialorder %v1981_v27, 0.0 }
 0x471   : > { %v3019_v40 = vpop.f32.mrf.mxu0  ;;  %v1959_v45 = vadd.f32 %v1910_v33, %v1773_v32  ;;  %v2068_v15 = vrot.slane %v3758_v44, 7  ;;  %v1805_v26 = vadd.f32 %v1804_v56, %v3740_v0 }
 0x472   : > { %v1964_v46 = vadd.f32 %v3019_v40, %v1794_v34  ;;  %vm2000_vm14 = vcmp.ge.f32.partialorder %v1984_v43, 0.0  ;;  %v2016_v41 = vmul.f32 0.1, %v1984_v43  ;;  %v3762_v16 = vsel %vm1997_vm13, %v1981_v27, %v2013_v42 }
 0x473   : > { %v1923_v48 = vpop.f32.mrf.mxu0  ;;  %v1982_v51 = vadd.f32 %v3753_v23, %v1959_v45  ;;  %v2064_v2 = vrot.slane %v3762_v16, 7 }
 0x474   : > { %v3764_v18 = vsel %vm2000_vm14, %v1984_v43, %v2016_v41  ;;  %v1962_v19 = vadd.f32 %v1923_v48, %v1786_v47  ;;  %v1987_v53 = vadd.f32 %v3753_v23, %v1964_v46  ;;  %v2101_v48 = vrot.slane %v3758_v44, 1 }
 0x475   : > { %v3020_v52 = vpop.f32.mrf.mxu0  ;;  %v2070_v21 = vrot.slane %v3764_v18, 7  ;;  %vm1998_vm15 = vcmp.ge.f32.partialorder %v1982_v51, 0.0  ;;  %v2014_v22 = vmul.f32 0.1, %v1982_v51 }
 0x476   : > { %v1985_v35 = vadd.f32 %v3753_v23, %v1962_v19  ;;  %v1965_v37 = vadd.f32 %v3020_v52, %v1797_v49  ;;  %vm2003_vm4 = vcmp.ge.f32.partialorder %v1987_v53, 0.0  ;;  %v2019_v8 = vmul.f32 0.1, %v1987_v53 }
 0x477   : > { %v1926_v55 = vpop.f32.mrf.mxu0  ;;  %v3769_v58 = vsel %vm1998_vm15, %v1982_v51, %v2014_v22  ;;  %v3772_v63 = vsel %vm341_vm1, %v2068_v15, %v2070_v21  ;;  %v2103_v49 = vrot.slane %v3764_v18, 1 }
 0x478   : > { %v1963_v59 = vadd.f32 %v1926_v55, %v1789_v50  ;;  %v2066_v5 = vrot.slane %v3769_v58, 7  ;;  %vm2001_vm3 = vcmp.ge.f32.partialorder %v1985_v35, 0.0  ;;  %v2017_v10 = vmul.f32 0.1, %v1985_v35 }
 0x479   : > { %v3023_v7 = vpop.f32.mrf.mxu0  ;;  %v1988_v61 = vadd.f32 %v3753_v23, %v1965_v37  ;;  %v3796_v32 = vsel %vm2003_vm4, %v1987_v53, %v2019_v8  ;;  %v2099_v50 = vrot.slane %v3769_v58, 1  ;;  %v2097_v37 = vrot.slane %v3762_v16, 1 }
 0x47a   : > { %v1986_v11 = vadd.f32 %v3753_v23, %v1963_v59  ;;  %v1968_v4 = vadd.f32 %v3023_v7, %v1810_v54  ;;  %v3780_v14 = vsel %vm341_vm1, %v2066_v5, %v2068_v15  ;;  %v3785_v62 = vsel %vm341_vm1, %v2064_v2, %v2066_v5 }
 0x47b   : > { %v1939_v13 = vpop.f32.mrf.mxu0  ;;  %v3787_v17 = vsel %vm2001_vm3, %v1985_v35, %v2017_v10  ;;  %vm2004_vm6 = vcmp.ge.f32.partialorder %v1988_v61, 0.0  ;;  %v2020_v24 = vmul.f32 0.1, %v1988_v61  ;;  %v2109_v51 = vrot.slane %v3796_v32, 1 }
 0x47c   : > { %v1966_v25 = vadd.f32 %v1939_v13, %v1802_v57  ;;  %v2072_v28 = vrot.slane %v3787_v17, 7  ;;  %vm2002_vm7 = vcmp.ge.f32.partialorder %v1986_v11, 0.0  ;;  %v2018_v29 = vmul.f32 0.1, %v1986_v11 }
 0x47d   : > { %v3024_v30 = vpop.f32.mrf.mxu0  ;;  %v3791_v12 = vsel %vm2004_vm6, %v1988_v61, %v2020_v24  ;;  %v1991_v27 = vadd.f32 %v3753_v23, %v1968_v4  ;;  %v2105_v34 = vrot.slane %v3787_v17, 1  ;;  %v3839_v7 = vsel %vm354_vm2, %v2101_v48, %v2103_v49  ;;  %v2445_v24 = vld [vmem:[#allocation2] sm:$0x1] }
 0x47e   : > { %v1989_v31 = vadd.f32 %v3753_v23, %v1966_v25  ;;  %v1969_v33 = vadd.f32 %v3024_v30, %v1813_v1  ;;  %v3799_v42 = vsel %vm2002_vm7, %v1986_v11, %v2018_v29  ;;  %v3804_v43 = vsel %vm341_vm1, %v2070_v21, %v2072_v28 }
 0x47f   : > { %v1942_v0 = vpop.f32.mrf.mxu0  ;;  %v2111_v40 = vrot.slane %v3791_v12, 1  ;;  %v2107_v39 = vrot.slane %v3799_v42, 1  ;;  %vm2007_vm8 = vcmp.ge.f32.partialorder %v1991_v27, 0.0  ;;  %v2023_v45 = vmul.f32 0.1, %v1991_v27 }
 0x480   : > { %vm2005_vm0 = vcmp.ge.f32.partialorder %v1989_v31, 0.0  ;;  %v2021_v46 = vmul.f32 0.1, %v1989_v31  ;;  %v1992_v47 = vadd.f32 %v3753_v23, %v1969_v33  ;;  %v1967_v41 = vadd.f32 %v1942_v0, %v1805_v26 }
 0x481   : > { %v3813_v19 = vsel %vm2007_vm8, %v1991_v27, %v2023_v45  ;;  %v3817_v22 = vsel %vm354_vm2, %v2109_v51, %v2111_v40  ;;  %v3820_v53 = vsel %vm354_vm2, %v2107_v39, %v2109_v51  ;;  %v3823_v54 = vsel %vm354_vm2, %v2105_v34, %v2107_v39 }
 0x482   : > { %v2037_v15 = vsel %vm2005_vm0, %v1989_v31, %v2021_v46  ;;  %vm2008_vm10 = vcmp.ge.f32.partialorder %v1992_v47, 0.0  ;;  %v2024_v20 = vmul.f32 0.1, %v1992_v47  ;;  %v1990_v21 = vadd.f32 %v3753_v23, %v1967_v41 }
 0x483   : > { %v2113_v52 = vrot.slane %v2037_v15, 1  ;;  %v3826_v35 = vsel %vm354_vm2, %v2103_v49, %v2105_v34  ;;  %v2084_v59 = vrot.slane %v3813_v19, 7  ;;  %v3843_v8 = vsel %vm354_vm2, %v2099_v50, %v2101_v48  ;;  %v2124_v49 = vld [vmem:[%s4089_s7 + $0x1] sm:$0x1] }
 0x484   : > { %vm2006_vm11 = vcmp.ge.f32.partialorder %v1990_v21, 0.0  ;;  %v2022_v55 = vmul.f32 0.1, %v1990_v21  ;;  %v3829_v57 = vsel %vm2008_vm10, %v1992_v47, %v2024_v20  ;;  %v3848_v10 = vsel %vm354_vm2, %v2097_v37, %v2099_v50 }
 0x485   : > { %v2086_v1 = vrot.slane %v3829_v57, 7  ;;  %3026 = vmatpush3.xpose.msk.msra.mxu1 %vm2126_vm9, %v3829_v57  ;;  %v3836_v5 = vsel %vm354_vm2, %v2111_v40, %v2113_v52  ;;  %v2117_v61 = vrot.slane %v3813_v19, 1  ;;  %v3270_v29 = vmov 0  }
 0x486   : > { %v2038_v56 = vsel %vm2006_vm11, %v1990_v21, %v2022_v55  ;;  %3027 = vmatprep.subr.mxu1 %v3268_v38  ;;  %3188 = vset.pattern.permute.xlu0 %v3270_v29  ;;  %v2080_v27 = vrot.slane %v2037_v15, 7  ;;  %v2078_v33 = vrot.slane %v3791_v12, 7  ;;  %v2076_v0 = vrot.slane %v3796_v32, 7 }
 0x487   : > { %v2082_v11 = vrot.slane %v2038_v56, 7  ;;  %v2115_v4 = vrot.slane %v2038_v56, 1  ;;  %v2087_v13 = vsel %vm341_vm1, %v2084_v59, %v2086_v1  ;;  %2448 = vperm.xlu0 %3188, %v2445_v24   ;;  %v2074_v40 = vrot.slane %v3799_v42, 7 }
 0x488   : > { %3061 = vmatpush3.xpose.msk.msra.mxu0 %vm2126_vm9, %v2087_v13  ;;  %v2081_v34 = vsel %vm341_vm1, %v2078_v33, %v2080_v27  ;;  %v2079_v39 = vsel %vm341_vm1, %v2076_v0, %v2078_v33  ;;  %v2119_v48 = vrot.slane %v3829_v57, 1 }
 0x489   : > { %3028 = vmatpush3.xpose.msk.msra.mxu1 %vm2126_vm9, %v3813_v19  ;;  %3062 = vmatprep.subr.mxu0 %v3268_v38  ;;  %v3859_v25 = vsel %vm354_vm2, %v2115_v4, %v2117_v61  ;;  %v3863_v26 = vsel %vm354_vm2, %v2113_v52, %v2115_v4  ;;  %v2085_v30 = vsel %vm341_vm1, %v2082_v11, %v2084_v59 }
 0x48a   : > { %3029 = vmatprep.subr.mxu1 %v3268_v38  ;;  %v2083_v31 = vsel %vm341_vm1, %v2080_v27, %v2082_v11  ;;  %v2077_v45 = vsel %vm341_vm1, %v2074_v40, %v2076_v0  ;;  %v2122_v51 = vsel %vm354_vm2, %v2119_v48, 0.0  ;;  %v2120_v52 = vsel %vm354_vm2, %v2117_v61, %v2119_v48 }
 0x48c   : > { %3063 = vmatpush3.xpose.msk.msra.mxu0 %vm2126_vm9, %v2085_v30 }
 0x48d   : > { %3030 = vmatpush3.xpose.msk.msra.mxu1 %vm2126_vm9, %v2038_v56  ;;  %3064 = vmatprep.subr.mxu0 %v3268_v38 }
 0x48e   : > { %3031 = vmatprep.subr.mxu1 %v3268_v38 }
 0x490   : > { %3065 = vmatpush3.xpose.msk.msra.mxu0 %vm2126_vm9, %v2083_v31 }
 0x491   : > { %3032 = vmatpush3.xpose.msk.msra.mxu1 %vm2126_vm9, %v2037_v15  ;;  %3066 = vmatprep.subr.mxu0 %v3268_v38  ;;  %v2123_v15 = vld [vmem:[%s4089_s7] sm:$0x1] }
 0x492   : > { %3033 = vmatprep.subr.mxu1 %v3268_v38 }
 0x494   : > { %3067 = vmatpush3.xpose.msk.msra.mxu0 %vm2126_vm9, %v2081_v34 }
 0x495   : > { %3034 = vmatpush3.xpose.msk.msra.mxu1 %vm2126_vm9, %v3791_v12  ;;  %3068 = vmatprep.subr.mxu0 %v3268_v38  ;;  %v2075_v12 = vsel %vm341_vm1, %v2072_v28, %v2074_v40  ;;  %v1980_v28 = vadd.f32 %v3753_v23, %v3746_v9  ;;  %v1978_v9 = vadd.f32 %v3753_v23, %v3748_v60 }
 0x496   : > { %3035 = vmatprep.subr.mxu1 %v3268_v38 }
 0x497   : > { %vm1996_vm12 = vcmp.ge.f32.partialorder %v1980_v28, 0.0  ;;  %vm1994_vm14 = vcmp.ge.f32.partialorder %v1978_v9, 0.0 }
 0x498   : > { %3069 = vmatpush3.xpose.msk.msra.mxu0 %vm2126_vm9, %v2079_v39 }
 0x499   : > { %3036 = vmatpush3.xpose.msk.msra.mxu1 %vm2126_vm9, %v3796_v32  ;;  %3070 = vmatprep.subr.mxu0 %v3268_v38  ;;  %v2012_v32 = vmul.f32 0.1, %v1980_v28 }
 0x49a   : > { %3037 = vmatprep.subr.mxu1 %v3268_v38 }
 0x49c   : > { %3071 = vmatpush3.xpose.msk.msra.mxu0 %vm2126_vm9, %v2077_v45 }
 0x49d   : > { %3038 = vmatpush3.xpose.msk.msra.mxu1 %vm2126_vm9, %v3799_v42  ;;  %3072 = vmatprep.subr.mxu0 %v3268_v38 }
 0x49e   : > { %3039 = vmatprep.subr.mxu1 %v3268_v38 }
 0x4a0   : > { %3073 = vmatpush3.xpose.msk.msra.mxu0 %vm2126_vm9, %v2075_v12 }
 0x4a1   : > { %3040 = vmatpush3.xpose.msk.msra.mxu1 %vm2126_vm9, %v3787_v17  ;;  %3074 = vmatprep.subr.mxu0 %v3268_v38  ;;  %v1979_v17 = vadd.f32 %v3753_v23, %v3742_v3  ;;  %v2010_v3 = vmul.f32 0.1, %v1978_v9 }
 0x4a2   : > { %3041 = vmatprep.subr.mxu1 %v3268_v38 }
 0x4a3   : > { %vm1995_vm13 = vcmp.ge.f32.partialorder %v1979_v17, 0.0 }
 0x4a4   : > { %3075 = vmatpush3.xpose.msk.msra.mxu0 %vm2126_vm9, %v3804_v43 }
 0x4a5   : > { %3042 = vmatpush3.xpose.msk.msra.mxu1 %vm2126_vm9, %v3764_v18  ;;  %3076 = vmatprep.subr.mxu0 %v3268_v38  ;;  %v3927_v18 = vsel %vm1996_vm12, %v1980_v28, %v2012_v32 }
 0x4a6   : > { %3043 = vmatprep.subr.mxu1 %v3268_v38  ;;  %v2062_v60 = vrot.slane %v3927_v18, 7  ;;  %v2095_v19 = vrot.slane %v3927_v18, 1 }
 0x4a8   : > { %3077 = vmatpush3.xpose.msk.msra.mxu0 %vm2126_vm9, %v3772_v63  ;;  %v1977_v63 = vadd.f32 %v3753_v23, %v3744_v6  ;;  %v2098_v20 = vsel %vm354_vm2, %v2095_v19, %v2097_v37  ;;  %v2125_v37 = vld [vmem:[%s4089_s7 + $0x2] sm:$0x1] }
 0x4a9   : > { %3044 = vmatpush3.xpose.msk.msra.mxu1 %vm2126_vm9, %v3758_v44  ;;  %3078 = vmatprep.subr.mxu0 %v3268_v38  ;;  %v2011_v44 = vmul.f32 0.1, %v1979_v17 }
 0x4aa   : > { %3045 = vmatprep.subr.mxu1 %v3268_v38  ;;  %v2009_v43 = vmul.f32 0.1, %v1977_v63  ;;  %vm1993_vm15 = vcmp.ge.f32.partialorder %v1977_v63, 0.0 }
 0x4ac   : > { %3079 = vmatpush3.xpose.msk.msra.mxu0 %vm2126_vm9, %v3780_v14  ;;  %v2065_v14 = vsel %vm341_vm1, %v2062_v60, %v2064_v2  ;;  %v2025_v2 = vsel %vm1993_vm15, %v1977_v63, %v2009_v43 }
 0x4ad   : > { %3046 = vmatpush3.xpose.msk.msra.mxu1 %vm2126_vm9, %v3769_v58  ;;  %3080 = vmatprep.subr.mxu0 %v3268_v38  ;;  %v3936_v58 = vsel %vm1995_vm13, %v1979_v17, %v2011_v44  ;;  %v2057_v47 = vrot.slane %v2025_v2, 7 }
 0x4ae   : > { %3047 = vmatprep.subr.mxu1 %v3268_v38  ;;  %v2060_v42 = vrot.slane %v3936_v58, 7  ;;  %v2093_v21 = vrot.slane %v3936_v58, 1 }
 0x4af   : > { %v2089_v50 = vsel %vm341_vm1, 0.0, %v2057_v47 }
 0x4b0   : > { %3081 = vmatpush3.xpose.msk.msra.mxu0 %vm2126_vm9, %v3785_v62  ;;  %v3944_v62 = vsel %vm1994_vm14, %v1978_v9, %v2010_v3  ;;  %v2063_v23 = vsel %vm341_vm1, %v2060_v42, %v2062_v60 }
 0x4b1   : > { %3048 = vmatpush3.xpose.msk.msra.mxu1 %vm2126_vm9, %v3762_v16  ;;  %3082 = vmatprep.subr.mxu0 %v3268_v38  ;;  %v2058_v6 = vrot.slane %v3944_v62, 7  ;;  %v2090_v16 = vrot.slane %v2025_v2, 1 }
 0x4b2   : > { %3049 = vmatprep.subr.mxu1 %v3268_v38 }
 0x4b3   : > { %v2061_v46 = vsel %vm341_vm1, %v2058_v6, %v2060_v42  ;;  %v2059_v41 = vsel %vm341_vm1, %v2057_v47, %v2058_v6 }
 0x4b4   : > { %3083 = vmatpush3.xpose.msk.msra.mxu0 %vm2126_vm9, %v2065_v14 }
 0x4b5   : > { %3050 = vmatpush3.xpose.msk.msra.mxu1 %vm2126_vm9, %v3927_v18  ;;  %3084 = vmatprep.subr.mxu0 %v3268_v38 }
 0x4b6   : > { %3051 = vmatprep.subr.mxu1 %v3268_v38 }
 0x4b8   : > { %3085 = vmatpush3.xpose.msk.msra.mxu0 %vm2126_vm9, %v2063_v23 }
 0x4b9   : > { %3052 = vmatpush3.xpose.msk.msra.mxu1 %vm2126_vm9, %v3936_v58  ;;  %3086 = vmatprep.subr.mxu0 %v3268_v38 }
 0x4ba   : > { %3053 = vmatprep.subr.mxu1 %v3268_v38 }
 0x4bc   : > { %3087 = vmatpush3.xpose.msk.msra.mxu0 %vm2126_vm9, %v2061_v46 }
 0x4bd   : > { %3054 = vmatpush3.xpose.msk.msra.mxu1 %vm2126_vm9, %v3944_v62  ;;  %3088 = vmatprep.subr.mxu0 %v3268_v38 }
 0x4be   : > { %3055 = vmatprep.subr.mxu1 %v3268_v38 }
 0x4c0   : > { %3089 = vmatpush3.xpose.msk.msra.mxu0 %vm2126_vm9, %v2059_v41 }
 0x4c1   : > { %3056 = vmatpush3.xpose.msk.msra.mxu1 %vm2126_vm9, %v2025_v2  ;;  %3090 = vmatprep.subr.mxu0 %v3268_v38 }
 0x4c2   : > { %3095 = vmatprep.subr.mxu1 %v3268_v38 }
 0x4c4   : > { %3058 = vmatmul.mubr.msk.f32.vlgmr.msra.gmra.mxu1 %vm2126_vm9, %v2124_v49  ;;  %3091 = vmatpush3.xpose.msk.msra.mxu0 %vm2126_vm9, %v2089_v50 }
 0x4c5   : > { %3096 = vmatpush3.xpose.msk.msra.mxu1 %vm2126_vm9, %v2122_v51  ;;  %3127 = vmatprep.mubr.msk.f32.mxu1 %vm3269_vm5, %v3268_v38 }
 0x4c6   : > { %3097 = vmatprep.subr.mxu1 %v3268_v38 }
 0x4c7   : > { %3093 = vmatmul.mubr.msk.f32.vlgmr.msra.gmra.mxu0 %vm2126_vm9, %v2123_v15 }
 0x4c9   : > { %3098 = vmatpush3.xpose.msk.msra.mxu1 %vm2126_vm9, %v2120_v52 }
 0x4ca   : > { %3099 = vmatprep.subr.mxu1 %v3268_v38 }
 0x4cd   : > { %3100 = vmatpush3.xpose.msk.msra.mxu1 %vm2126_vm9, %v3859_v25 }
 0x4ce   : > { %3101 = vmatprep.subr.mxu1 %v3268_v38 }
 0x4d1   : > { %3102 = vmatpush3.xpose.msk.msra.mxu1 %vm2126_vm9, %v3863_v26 }
 0x4d2   : > { %3103 = vmatprep.subr.mxu1 %v3268_v38 }
 0x4d5   : > { %3104 = vmatpush3.xpose.msk.msra.mxu1 %vm2126_vm9, %v3836_v5  ;;  %v2453_v5 = vsub.s32 0, %v3412_v36 }
 0x4d6   : > { %3105 = vmatprep.subr.mxu1 %v3268_v38 }
 0x4d9   : > { %3106 = vmatpush3.xpose.msk.msra.mxu1 %vm2126_vm9, %v3817_v22  ;;  %v2091_v22 = vrot.slane %v3944_v62, 1 }
 0x4da   : > { %3107 = vmatprep.subr.mxu1 %v3268_v38 }
 0x4dd   : > { %3108 = vmatpush3.xpose.msk.msra.mxu1 %vm2126_vm9, %v3820_v53  ;;  %v2096_v53 = vsel %vm354_vm2, %v2093_v21, %v2095_v19 }
 0x4de   : > { %3109 = vmatprep.subr.mxu1 %v3268_v38 }
 0x4e1   : > { %3110 = vmatpush3.xpose.msk.msra.mxu1 %vm2126_vm9, %v3823_v54  ;;  %v2094_v54 = vsel %vm354_vm2, %v2091_v22, %v2093_v21 }
 0x4e2   : > { %3111 = vmatprep.subr.mxu1 %v3268_v38 }
 0x4e5   : > { %3112 = vmatpush3.xpose.msk.msra.mxu1 %vm2126_vm9, %v3826_v35  ;;  %v2092_v35 = vsel %vm354_vm2, %v2090_v16, %v2091_v22 }
 0x4e6   : > { %3113 = vmatprep.subr.mxu1 %v3268_v38 }
 0x4e9   : > { %3114 = vmatpush3.xpose.msk.msra.mxu1 %vm2126_vm9, %v3839_v7 }
 0x4ea   : > { %3115 = vmatprep.subr.mxu1 %v3268_v38 }
 0x4ed   : > { %3116 = vmatpush3.xpose.msk.msra.mxu1 %vm2126_vm9, %v3843_v8 }
 0x4ee   : > { %3117 = vmatprep.subr.mxu1 %v3268_v38 }
 0x4f1   : > { %3118 = vmatpush3.xpose.msk.msra.mxu1 %vm2126_vm9, %v3848_v10 }
 0x4f2   : > { %3119 = vmatprep.subr.mxu1 %v3268_v38 }
 0x4f5   : > { %3120 = vmatpush3.xpose.msk.msra.mxu1 %vm2126_vm9, %v2098_v20 }
 0x4f6   : > { %3121 = vmatprep.subr.mxu1 %v3268_v38 }
 0x4f9   : > { %3122 = vmatpush3.xpose.msk.msra.mxu1 %vm2126_vm9, %v2096_v53 }
 0x4fa   : > { %3123 = vmatprep.subr.mxu1 %v3268_v38 }
 0x4fd   : > { %3124 = vmatpush3.xpose.msk.msra.mxu1 %vm2126_vm9, %v2094_v54 }
 0x4fe   : > { %3125 = vmatprep.subr.mxu1 %v3268_v38 }
 0x501   : > { %3126 = vmatpush3.xpose.msk.msra.mxu1 %vm2126_vm9, %v2092_v35 }
 0x502   : > { %v2449_v7 = vpop.permute.xlu0 %2448 }
 0x503   : > { %v2454_v56 = vrot.slane %v2449_v7, %v2453_v5 }
 0x504   : > { %3128 = vmatmul.mubr.msk.f32.vlgmr.msra.gmra.mxu1 %vm2126_vm9, %v2125_v37 }
 0x584   : > { %v2228_v55 = vpop.f32.mrf.mxu1 }
 0x586   : > { %v3059_v57 = vpop.f32.mrf.mxu1 }
 0x587   : > { %v2334_v59 = vpop.f32.mrf.mxu0 }
 0x588   : > { %v2335_v38 = vadd.f32 %v2334_v59, %v2228_v55 }
 0x589   : > { %v3094_v1 = vpop.f32.mrf.mxu0 }
 0x5c4   : > { %v2440_v8 = vpop.f32.mrf.mxu1 }
 0x5c5   : > { %v2444_v10 = vadd.f32 %v2440_v8, %v2335_v38 }
 0x5c6   : > { %v3129_v61 = vpop.f32.mrf.mxu1 }
 0x5c7   : > { %v2455_v11 = vadd.f32 %v2454_v56, %v2444_v10 }
 0x5c9   : > { %3204 = vtanh.f32 %v2455_v11 }
 0x5d6   : > { %v3205_v36 = vpop.eup %3204 }
 0x5d7   : > { %2457 = vst [vmem:[%s326_s15] sm:$0x1] %v3205_v36 }
 0x5d8   : > { %3219 = shalt.err (!%p3216_p3)
}
 0x5d9   : > { %s3220_s28 = scalar_lea.hbm %s4047_s23, 16  ;;  %s3224_s10 = scalar_lea.hbm %s4091_s9, 32 }
 0x5da   : > { %p3221_p4 = scmp.ne.s32.totalorder %s4047_s23, %s3220_s28  ;;  %p3225_p9 = scmp.lt.s32.totalorder %s4047_s23, %s4091_s9 }
 0x5db   : > { %p3226_p10 = scmp.lt.s32.totalorder %s3224_s10, %s3220_s28 }
 0x5dc   : > { %p3222_p7 = pnand %p3221_p4, %p3363_p5 }
 0x5dd   : > { %p3227_p11 = por %p3226_p10, %p3225_p9 }
 0x5de   : > { %p3223_p8 = pneg %p3222_p7 }
 0x5e0   : > { %p3228_p12 = pnand %p3227_p11, %p3223_p8 }
 0x5e2   : > { %3231 = shalt.err (!%p3228_p12)
}
 0x5e3   : > { %3146 = dma.vmem_to_hbm [thread:$0]  (%p3363_p5), %s2472_s17, 16, %s4047_s23, %s2459_s24  }
 0x5e4 PF: > { %p3152_p13 = scmp.ge.s32.totalorder %s3266_s14, 2  ;;  %s2483_s22 = sand.u32 1, %s3254_s11  }
 0x5e5   : > { %s2484_s25 = scalar_lea.sflag [#allocation4], %s2483_s22 }
 0x5e6   : > { %p3149_p0 = pnand %p3152_p13, %p3367_p6 }
 0x5e8   : > { %p3150_p1 = pneg %p3149_p0 }
 0x5ea   : > { %3249 = dma.done.wait (%p3150_p1), %s2484_s25, 16  }
 0x5eb   : > { %3251 = vsyncadd (%p3150_p1), %s2484_s25, 4294967280  ;;  %p21_p2 = scmp.ge.s32.totalorder %s3350_s16, 4   ;;  %s4094_s11 = smov %s3258_s12 }
 0x5ec   : > { %s4095_s12 = smov %s3262_s13  ;;  %s4096_s13 = smov %s3361_s19 }
 0x5ed   : > { %s4097_s14 = smov %s3350_s16  ;;  %23 = sbr.rel (!%p21_p2) target bundleno = 6 (0x6), region = 97 }
 0x5f2   :  { %2488 = vsyncpa [#allocation4], 1 }
 0x5f3   :  { %2490 = vsyncpa [#allocation4 + $0x1], 1 }

</bundles_post_ra>
